<compile_context>
chip_gen: v6e
topology: v6e:2x2x1
jax: 0.10.0
libtpu: 0.0.40
codegen_flags: <defaults>
</compile_context>

<pallas_src>
import functools
import math

import numpy as np
import jax
import jax.numpy as jnp
from jax.experimental import pallas as pl
from jax.experimental.pallas import tpu as pltpu

# ----------------------------- configuration --------------------------------
B = 2                      # batch
IN_CH = 3                  # RGB
IMG = 16                   # image size (stand-in for 160)
PATCH = 4                  # patch size (stand-in for 16)
HIDDEN = 32                # hidden dim (stand-in for 2048)
HEADS = 4                  # heads (stand-in for 8)
DEPTH = 2                  # layers (stand-in for 8)
MLP_DIM = 64               # mlp dim (stand-in for 4096)
NUM_CLASSES = 8            # stand-in for 64
S8 = IMG // 8              # Unflatten spatial size
S4 = S8 * S8
NPATCH = (IMG // PATCH) ** 2
T = NPATCH + 1             # tokens (class token + patches)
TP = ((T + 7) // 8) * 8    # token dim padded to a multiple of 8
PATCH_DIM = IN_CH * PATCH * PATCH
LN_EPS = 1e-6


# ---------------- bilinear upsample (align_corners=False) as a matrix -------
def _bilinear_matrix(out_size, in_size):
    """U[i, p] = weight of input row p for output row i (PyTorch semantics)."""
    u = np.zeros((out_size, in_size), np.float32)
    scale = in_size / out_size
    for i in range(out_size):
        src = max((i + 0.5) * scale - 0.5, 0.0)
        i0 = min(int(math.floor(src)), in_size - 1)
        i1 = min(i0 + 1, in_size - 1)
        f = src - i0
        u[i, i0] += 1.0 - f
        u[i, i1] += f
    return u


_U_NP = _bilinear_matrix(IMG, S8)            # (IMG, S8)


# ------------------------------ Pallas kernels -------------------------------
def _embed_kernel(p_ref, w_ref, add_ref, o_ref):
    # p rows per image: row 0 = zero (class-token slot), rows 1..NPATCH =
    # patches, tail rows = zero padding.  add = [cls+pos0 ; patch_b+pos ; 0].
    bsz, tp, pd = p_ref.shape
    pm = p_ref[...].reshape(bsz * tp, pd)                       # stacked tokens
    y = jnp.dot(pm, w_ref[...], preferred_element_type=jnp.float32)
    y = y.reshape(bsz, tp, -1) + add_ref[...][None, :, :]
    o_ref[...] = y.astype(o_ref.dtype)


def _block_kernel(h_in_ref, g1_ref, b1_ref, wqkv_ref, bqkv_ref, wo_ref, bo_ref,
                  g2_ref, b2_ref, w1_ref, bm1_ref, w2_ref, bm2_ref,
                  o_ref, slab_ref, *, heads, eps, n_tokens):
    layer = pl.program_id(0)

    @pl.when(layer == 0)
    def _():
        o_ref[...] = h_in_ref[...]           # seed the resident activation block

    x3 = o_ref[...]                          # (B, Tp, H) bf16 residual stream
    bsz, tp, hd = x3.shape
    m = bsz * tp
    dh = hd // heads
    scale = 1.0 / math.sqrt(dh)
    x = x3.reshape(m, hd).astype(jnp.float32)          # stacked tokens (M, H)

    def layernorm(v, g, b):
        # fused statistics: one pass computing mean and mean-of-squares
        mu = jnp.mean(v, axis=-1, keepdims=True)
        ex2 = jnp.mean(v * v, axis=-1, keepdims=True)
        var = ex2 - mu * mu
        return (v - mu) * jax.lax.rsqrt(var + eps) * g + b

    # ---------------- pre-LN multi-head self-attention ----------------
    y = layernorm(x, g1_ref[...], b1_ref[...]).astype(jnp.bfloat16)
    qkv = (jnp.dot(y, wqkv_ref[...], preferred_element_type=jnp.float32)
           + bqkv_ref[...])                                     # (M, 3H) f32

    # -1e9 additive mask on padded key positions (token index >= n_tokens)
    kidx = jax.lax.broadcasted_iota(jnp.int32, (1, 1, tp), 2)
    kmask = jnp.where(kidx < n_tokens, 0.0, -1e9)

    for hh in range(heads):                  # static unroll over heads
        lo = hh * dh
        q = qkv[:, lo:lo + dh].reshape(bsz, tp, dh).astype(jnp.bfloat16)
        k = qkv[:, hd + lo:hd + lo + dh].reshape(bsz, tp, dh).astype(jnp.bfloat16)
        v = qkv[:, 2 * hd + lo:2 * hd + lo + dh].reshape(bsz, tp, dh).astype(jnp.bfloat16)
        s = jnp.einsum("btd,bsd->bts", q, k,
                       preferred_element_type=jnp.float32) * scale + kmask
        s = s - jnp.max(s, axis=-1, keepdims=True)
        p = jnp.exp(s)
        p = p / jnp.sum(p, axis=-1, keepdims=True)              # exact softmax
        oh = jnp.einsum("bts,bsd->btd", p.astype(jnp.bfloat16), v,
                        preferred_element_type=jnp.float32)
        slab_ref[:, lo:lo + dh] = oh.reshape(m, dh)   # head slab -> ONE out-proj

    attn = (jnp.dot(slab_ref[...].astype(jnp.bfloat16), wo_ref[...],
                    preferred_element_type=jnp.float32) + bo_ref[...])
    x = x + attn

    # ---------------- pre-LN MLP (exact erf GELU, PyTorch default) ------------
    y = layernorm(x, g2_ref[...], b2_ref[...]).astype(jnp.bfloat16)
    y = (jnp.dot(y, w1_ref[...], preferred_element_type=jnp.float32)
         + bm1_ref[...])
    y = 0.5 * y * (1.0 + jax.lax.erf(y * (1.0 / math.sqrt(2.0))))
    y = (jnp.dot(y.astype(jnp.bfloat16), w2_ref[...],
                 preferred_element_type=jnp.float32) + bm2_ref[...])
    o_ref[...] = (x + y).reshape(bsz, tp, hd).astype(o_ref.dtype)


def _head_linear_kernel(h_ref, g_ref, b_ref, w_ref, bias_ref, o_ref, *, eps):
    # Class token = token 0 of every image.  The tiny (B, H) LayerNorm is
    # recomputed per class tile so the grid stays safely "parallel" (megacore).
    x = h_ref[...][:, 0, :].astype(jnp.float32)                 # (B, H)
    mu = jnp.mean(x, axis=-1, keepdims=True)
    ex2 = jnp.mean(x * x, axis=-1, keepdims=True)
    z = (x - mu) * jax.lax.rsqrt(ex2 - mu * mu + eps) * g_ref[...] + b_ref[...]
    o_ref[...] = (jnp.dot(z.astype(jnp.bfloat16), w_ref[...],
                          preferred_element_type=jnp.float32) + bias_ref[...])


def _upsample_kernel(y_ref, u_ref, ut_ref, o_ref):
    # Separable bilinear upsample of one (S8, S8) class map: U @ Y @ U^T, then
    # exact sigmoid.  No folded (S8^2 -> IMG^2) or (H -> IMG^2) weight needed.
    t = jnp.dot(u_ref[...], y_ref[...], preferred_element_type=jnp.float32)
    o = jnp.dot(t, ut_ref[...], preferred_element_type=jnp.float32)
    o_ref[...] = 1.0 / (1.0 + jnp.exp(-o))


# ------------------------------ Pallas wrappers -------------------------------
def vit_embed(x, vp):
    bsz = x.shape[0]
    # non-overlapping PATCHxPATCH patches, flattened in Conv2d weight order
    p = x.reshape(bsz, IN_CH, IMG // PATCH, PATCH, IMG // PATCH, PATCH)
    p = p.transpose(0, 2, 4, 1, 3, 5).reshape(bsz, NPATCH, PATCH_DIM)
    # row 0 = class-token slot, tail rows = token padding (both zero)
    p = jnp.pad(p, ((0, 0), (1, TP - T), (0, 0)))
    add = jnp.concatenate(
        [vp["cls"] + vp["pos"][0:1],
         vp["patch_b"][None, :] + vp["pos"][1:T],
         jnp.zeros((TP - T, HIDDEN), jnp.float32)], axis=0)     # (TP, H)
    return pl.pallas_call(
        _embed_kernel,
        out_shape=jax.ShapeDtypeStruct((bsz, TP, HIDDEN), jnp.bfloat16),
        grid=(1,),
        in_specs=[
            pl.BlockSpec((bsz, TP, PATCH_DIM), lambda i: (0, 0, 0)),
            pl.BlockSpec((PATCH_DIM, HIDDEN), lambda i: (0, 0)),
            pl.BlockSpec((TP, HIDDEN), lambda i: (0, 0)),
        ],
        out_specs=pl.BlockSpec((bsz, TP, HIDDEN), lambda i: (0, 0, 0)),
        compiler_params=pltpu.CompilerParams(dimension_semantics=("arbitrary",)),
    )(p.astype(jnp.bfloat16), vp["patch_w"], add)


def vit_blocks(h, blk):
    bsz = h.shape[0]
    args = (h,
            blk["ln1_g"], blk["ln1_b"], blk["w_qkv"], blk["b_qkv"],
            blk["w_out"], blk["b_out"], blk["ln2_g"], blk["ln2_b"],
            blk["w_fc1"], blk["b_fc1"], blk["w_fc2"], blk["b_fc2"])
    # activations: same block every layer -> resident in VMEM across the grid
    in_specs = [pl.BlockSpec((bsz, TP, HIDDEN), lambda l: (0, 0, 0))]
    # per-layer weight slice of the (DEPTH, r, c) stacks
    in_specs += [pl.BlockSpec((None,) + tuple(a.shape[1:]), lambda l: (l, 0, 0))
                 for a in args[1:]]
    return pl.pallas_call(
        functools.partial(_block_kernel, heads=HEADS, eps=LN_EPS, n_tokens=T),
        out_shape=jax.ShapeDtypeStruct((bsz, TP, HIDDEN), jnp.bfloat16),
        grid=(DEPTH,),
        in_specs=in_specs,
        out_specs=pl.BlockSpec((bsz, TP, HIDDEN), lambda l: (0, 0, 0)),
        scratch_shapes=[pltpu.VMEM((bsz * TP, HIDDEN), jnp.float32)],
        compiler_params=pltpu.CompilerParams(dimension_semantics=("arbitrary",)),
    )(*args)


def head_linear(h, vp, seg_w, seg_b):
    bsz = h.shape[0]
    return pl.pallas_call(
        functools.partial(_head_linear_kernel, eps=LN_EPS),
        out_shape=jax.ShapeDtypeStruct((NUM_CLASSES, bsz, S4), jnp.float32),
        grid=(NUM_CLASSES,),
        in_specs=[
            # only the first 8 token rows (containing the class token) are DMA'd
            pl.BlockSpec((bsz, 8, HIDDEN), lambda n: (0, 0, 0)),
            pl.BlockSpec((1, HIDDEN), lambda n: (0, 0)),
            pl.BlockSpec((1, HIDDEN), lambda n: (0, 0)),
            pl.BlockSpec((None, HIDDEN, S4), lambda n: (n, 0, 0)),
            pl.BlockSpec((None, 1, S4), lambda n: (n, 0, 0)),
        ],
        out_specs=pl.BlockSpec((None, bsz, S4), lambda n: (n, 0, 0)),
        compiler_params=pltpu.CompilerParams(dimension_semantics=("parallel",)),
    )(h, vp["ln_g"], vp["ln_b"], seg_w, seg_b)


def upsample_sigmoid(seg):
    # seg: (NC, B, S8*S8) -> one (S8, S8) map per (class, image) channel
    nc, bsz, _ = seg.shape
    y = seg.reshape(nc * bsz, S8, S8)
    u = jnp.asarray(_U_NP)               # (IMG, S8)
    ut = jnp.asarray(_U_NP.T)             # (S8, IMG)
    out = pl.pallas_call(
        _upsample_kernel,
        out_shape=jax.ShapeDtypeStruct((nc * bsz, IMG, IMG), jnp.float32),
        grid=(nc * bsz,),
        in_specs=[
            pl.BlockSpec((None, S8, S8), lambda c: (c, 0, 0)),
            pl.BlockSpec((IMG, S8), lambda c: (0, 0)),
            pl.BlockSpec((S8, IMG), lambda c: (0, 0)),
        ],
        out_specs=pl.BlockSpec((None, IMG, IMG), lambda c: (c, 0, 0)),
        compiler_params=pltpu.CompilerParams(dimension_semantics=("parallel",)),
    )(y, u, ut)
    return out.reshape(nc, bsz, IMG, IMG).transpose(1, 0, 2, 3)


# ------------------------------ full model forward ----------------------------
def model_forward(params, x):
    vp = params["vit"]
    h = vit_embed(x, vp)                                    # (B, TP, H) bf16
    h = vit_blocks(h, vp["blocks"])                         # all layers, 1 call
    seg = head_linear(h, vp, params["seg_w"], params["seg_b"])   # (NC, B, S4)
    return upsample_sigmoid(seg)                            # (B, NC, IMG, IMG)


# ------------------------------ parameter init --------------------------------
def init_params(seed=0):
    key = jax.random.PRNGKey(seed)
    ks = iter(jax.random.split(key, 64))

    def W(*shape, s=0.02):
        return jax.random.normal(next(ks), shape, jnp.float32) * s

    def Z(*shape):
        return jnp.zeros(shape, jnp.float32)

    def stacked(r, c):   # per-layer weights stacked along depth, stored bf16
        return jnp.stack([W(r, c) for _ in range(DEPTH)]).astype(jnp.bfloat16)

    blocks = dict(
        ln1_g=jnp.ones((DEPTH, 1, HIDDEN), jnp.float32), ln1_b=Z(DEPTH, 1, HIDDEN),
        w_qkv=stacked(HIDDEN, 3 * HIDDEN), b_qkv=Z(DEPTH, 1, 3 * HIDDEN),
        w_out=stacked(HIDDEN, HIDDEN), b_out=Z(DEPTH, 1, HIDDEN),
        ln2_g=jnp.ones((DEPTH, 1, HIDDEN), jnp.float32), ln2_b=Z(DEPTH, 1, HIDDEN),
        w_fc1=stacked(HIDDEN, MLP_DIM), b_fc1=Z(DEPTH, 1, MLP_DIM),
        w_fc2=stacked(MLP_DIM, HIDDEN), b_fc2=Z(DEPTH, 1, HIDDEN),
    )
    vit = dict(
        patch_w=W(PATCH_DIM, HIDDEN).astype(jnp.bfloat16), patch_b=Z(HIDDEN),
        cls=W(1, HIDDEN), pos=W(T, HIDDEN),
        blocks=blocks,
        ln_g=jnp.ones((1, HIDDEN), jnp.float32), ln_b=Z(1, HIDDEN),
    )
    return dict(
        vit=vit,
        # transform_output Linear(HIDDEN, NC*S8*S8), stored per class so the
        # head grid streams one (HIDDEN, S8*S8) slice per step (no per-forward
        # weight reshuffling and no upsample folding).
        seg_w=W(NUM_CLASSES, HIDDEN, S4).astype(jnp.bfloat16),
        seg_b=Z(NUM_CLASSES, 1, S4),
    )


# ----------------------------------- main --------------------------------------
if __name__ == "__main__":
    params = init_params(0)
    x = jax.random.normal(jax.random.PRNGKey(0), (B, IN_CH, IMG, IMG), jnp.float32)
    out = jax.block_until_ready(jax.jit(model_forward)(params, x))
    assert out.shape == (B, NUM_CLASSES, IMG, IMG), out.shape
    assert bool(jnp.all(jnp.isfinite(out)))
    assert bool(jnp.all((out >= 0.0) & (out <= 1.0)))   # sigmoid output range
    print("KERNEL_OK")
</pallas_src>

<mosaic_0001>
module attributes {stable_mosaic.version = 11 : i64} {
  func.func @_embed_kernel(%arg0: i32, %arg1: memref<2x24x48xbf16, #tpu.memory_space<vmem>>, %arg2: memref<48x32xbf16, #tpu.memory_space<vmem>>, %arg3: memref<24x32xf32, #tpu.memory_space<vmem>>, %arg4: memref<2x24x32xbf16, #tpu.memory_space<vmem>>) attributes {dimension_semantics = [#tpu.dimension_semantics<arbitrary>], iteration_bounds = array<i64: 1>, scalar_prefetch = 0 : i64, scratch_operands = 0 : i64, tpu.core_type = #tpu.core_type<tc>, window_params = [{pipeline_mode = #tpu.pipeline_mode<synchronous>, transform_indices = @transform_0, window_bounds = array<i64: 2, 24, 48>}, {pipeline_mode = #tpu.pipeline_mode<synchronous>, transform_indices = @transform_1, window_bounds = array<i64: 48, 32>}, {pipeline_mode = #tpu.pipeline_mode<synchronous>, transform_indices = @transform_2, window_bounds = array<i64: 24, 32>}, {pipeline_mode = #tpu.pipeline_mode<synchronous>, transform_indices = @transform_3, window_bounds = array<i64: 2, 24, 32>}]} {
    %c0 = arith.constant 0 : index
    %c0_0 = arith.constant 0 : index
    %c0_1 = arith.constant 0 : index
    %0 = vector.load %arg1[%c0, %c0_0, %c0_1] : memref<2x24x48xbf16, #tpu.memory_space<vmem>>, vector<2x24x48xbf16>
    %1 = vector.shape_cast %0 : vector<2x24x48xbf16> to vector<48x48xbf16>
    %c0_2 = arith.constant 0 : index
    %c0_3 = arith.constant 0 : index
    %2 = vector.load %arg2[%c0_2, %c0_3] : memref<48x32xbf16, #tpu.memory_space<vmem>>, vector<48x32xbf16>
    %cst = arith.constant dense<0.000000e+00> : vector<48x32xf32>
    %3 = tpu.matmul %1, %2, %cst {dimension_numbers = #tpu.dot_dimension_numbers<[1], [0], [0], [1], [0, 0, 1, 1], [], []>} : vector<48x48xbf16>, vector<48x32xbf16>, vector<48x32xf32> -> vector<48x32xf32>
    %4 = vector.shape_cast %3 : vector<48x32xf32> to vector<2x24x32xf32>
    %c0_4 = arith.constant 0 : index
    %c0_5 = arith.constant 0 : index
    %5 = vector.load %arg3[%c0_4, %c0_5] : memref<24x32xf32, #tpu.memory_space<vmem>>, vector<24x32xf32>
    %6 = vector.shape_cast %5 : vector<24x32xf32> to vector<1x24x32xf32>
    %7 = vector.broadcast %6 : vector<1x24x32xf32> to vector<2x24x32xf32>
    %8 = arith.addf %4, %7 : vector<2x24x32xf32>
    %9 = arith.truncf %8 : vector<2x24x32xf32> to vector<2x24x32xbf16>
    %c0_6 = arith.constant 0 : index
    %c0_7 = arith.constant 0 : index
    %c0_8 = arith.constant 0 : index
    %10 = vector.load %arg4[%c0_6, %c0_7, %c0_8] : memref<2x24x32xbf16, #tpu.memory_space<vmem>>, vector<2x24x32xbf16>
    tpu.vector_store %arg4[%c0_6, %c0_7, %c0_8], %9 {strides = array<i32>} : memref<2x24x32xbf16, #tpu.memory_space<vmem>>, vector<2x24x32xbf16>,
    return
  }
  func.func @transform_0(%arg0: i32) -> (i32, i32, i32) {
    %c0_i32 = arith.constant 0 : i32
    %c0_i32_0 = arith.constant 0 : i32
    %c0_i32_1 = arith.constant 0 : i32
    %c0_i32_2 = arith.constant 0 : i32
    return %c0_i32, %c0_i32_0, %c0_i32_1 : i32, i32, i32
  }
  func.func @transform_1(%arg0: i32) -> (i32, i32) {
    %c0_i32 = arith.constant 0 : i32
    %c0_i32_0 = arith.constant 0 : i32
    %c0_i32_1 = arith.constant 0 : i32
    return %c0_i32, %c0_i32_0 : i32, i32
  }
  func.func @transform_2(%arg0: i32) -> (i32, i32) {
    %c0_i32 = arith.constant 0 : i32
    %c0_i32_0 = arith.constant 0 : i32
    %c0_i32_1 = arith.constant 0 : i32
    return %c0_i32, %c0_i32_0 : i32, i32
  }
  func.func @transform_3(%arg0: i32) -> (i32, i32, i32) {
    %c0_i32 = arith.constant 0 : i32
    %c0_i32_0 = arith.constant 0 : i32
    %c0_i32_1 = arith.constant 0 : i32
    %c0_i32_2 = arith.constant 0 : i32
    return %c0_i32, %c0_i32_0, %c0_i32_1 : i32, i32, i32
  }
}

module attributes {stable_mosaic.version = 11 : i64} {
  func.func @_head_linear_kernel(%arg0: i32, %arg1: memref<2x8x32xbf16, #tpu.memory_space<vmem>>, %arg2: memref<1x32xf32, #tpu.memory_space<vmem>>, %arg3: memref<1x32xf32, #tpu.memory_space<vmem>>, %arg4: memref<1x32x4xbf16, #tpu.memory_space<vmem>>, %arg5: memref<1x1x4xf32, #tpu.memory_space<vmem>>, %arg6: memref<1x2x4xf32, #tpu.memory_space<vmem>>) attributes {dimension_semantics = [#tpu.dimension_semantics<parallel>], iteration_bounds = array<i64: 8>, scalar_prefetch = 0 : i64, scratch_operands = 0 : i64, tpu.core_type = #tpu.core_type<tc>, window_params = [{transform_indices = @transform_0, window_bounds = array<i64: 2, 8, 32>}, {pipeline_mode = #tpu.pipeline_mode<synchronous>, transform_indices = @transform_1, window_bounds = array<i64: 1, 32>}, {pipeline_mode = #tpu.pipeline_mode<synchronous>, transform_indices = @transform_2, window_bounds = array<i64: 1, 32>}, {transform_indices = @transform_3, window_bounds = array<i64: 1, 32, 4>}, {transform_indices = @transform_4, window_bounds = array<i64: 1, 1, 4>}, {transform_indices = @transform_5, window_bounds = array<i64: 1, 2, 4>}]} {
    %c0 = arith.constant 0 : index
    %c0_0 = arith.constant 0 : index
    %c0_1 = arith.constant 0 : index
    %0 = vector.load %arg1[%c0, %c0_0, %c0_1] : memref<2x8x32xbf16, #tpu.memory_space<vmem>>, vector<2x8x32xbf16>
    %1 = vector.extract_strided_slice %0 {offsets = [0, 0, 0], sizes = [2, 1, 32], strides = [1, 1, 1]} : vector<2x8x32xbf16> to vector<2x1x32xbf16>
    %2 = vector.shape_cast %1 : vector<2x1x32xbf16> to vector<2x32xbf16>
    %3 = arith.extf %2 : vector<2x32xbf16> to vector<2x32xf32>
    %cst = arith.constant dense<0.000000e+00> : vector<2xf32>
    %4 = vector.multi_reduction <add>, %3, %cst [1] : vector<2x32xf32> to vector<2xf32>
    %5 = vector.shape_cast %4 : vector<2xf32> to vector<2x1xf32>
    %cst_2 = arith.constant 3.200000e+01 : f32
    %6 = vector.broadcast %cst_2 : f32 to vector<2x1xf32>
    %7 = arith.divf %5, %6 : vector<2x1xf32>
    %8 = arith.mulf %3, %3 : vector<2x32xf32>
    %cst_3 = arith.constant dense<0.000000e+00> : vector<2xf32>
    %9 = vector.multi_reduction <add>, %8, %cst_3 [1] : vector<2x32xf32> to vector<2xf32>
    %10 = vector.shape_cast %9 : vector<2xf32> to vector<2x1xf32>
    %cst_4 = arith.constant 3.200000e+01 : f32
    %11 = vector.broadcast %cst_4 : f32 to vector<2x1xf32>
    %12 = arith.divf %10, %11 : vector<2x1xf32>
    %13 = vector.broadcast %7 : vector<2x1xf32> to vector<2x32xf32>
    %14 = arith.subf %3, %13 : vector<2x32xf32>
    %15 = arith.mulf %7, %7 : vector<2x1xf32>
    %16 = arith.subf %12, %15 : vector<2x1xf32>
    %cst_5 = arith.constant 9.99999997E-7 : f32
    %17 = vector.broadcast %cst_5 : f32 to vector<2x1xf32>
    %18 = arith.addf %16, %17 : vector<2x1xf32>
    %19 = math.rsqrt %18 : vector<2x1xf32>
    %20 = vector.broadcast %19 : vector<2x1xf32> to vector<2x32xf32>
    %21 = arith.mulf %14, %20 : vector<2x32xf32>
    %c0_6 = arith.constant 0 : index
    %c0_7 = arith.constant 0 : index
    %22 = vector.load %arg2[%c0_6, %c0_7] : memref<1x32xf32, #tpu.memory_space<vmem>>, vector<1x32xf32>
    %23 = vector.broadcast %22 : vector<1x32xf32> to vector<2x32xf32>
    %24 = arith.mulf %21, %23 : vector<2x32xf32>
    %c0_8 = arith.constant 0 : index
    %c0_9 = arith.constant 0 : index
    %25 = vector.load %arg3[%c0_8, %c0_9] : memref<1x32xf32, #tpu.memory_space<vmem>>, vector<1x32xf32>
    %26 = vector.broadcast %25 : vector<1x32xf32> to vector<2x32xf32>
    %27 = arith.addf %24, %26 : vector<2x32xf32>
    %28 = arith.truncf %27 : vector<2x32xf32> to vector<2x32xbf16>
    %c0_10 = arith.constant 0 : index
    %c0_11 = arith.constant 0 : index
    %c0_12 = arith.constant 0 : index
    %29 = vector.load %arg4[%c0_10, %c0_11, %c0_12] : memref<1x32x4xbf16, #tpu.memory_space<vmem>>, vector<1x32x4xbf16>
    %30 = vector.shape_cast %29 : vector<1x32x4xbf16> to vector<32x4xbf16>
    %cst_13 = arith.constant dense<0.000000e+00> : vector<2x4xf32>
    %31 = tpu.matmul %28, %30, %cst_13 {dimension_numbers = #tpu.dot_dimension_numbers<[1], [0], [0], [1], [0, 0, 1, 1], [], []>} : vector<2x32xbf16>, vector<32x4xbf16>, vector<2x4xf32> -> vector<2x4xf32>
    %c0_14 = arith.constant 0 : index
    %c0_15 = arith.constant 0 : index
    %c0_16 = arith.constant 0 : index
    %32 = vector.load %arg5[%c0_14, %c0_15, %c0_16] : memref<1x1x4xf32, #tpu.memory_space<vmem>>, vector<1x1x4xf32>
    %33 = vector.shape_cast %32 : vector<1x1x4xf32> to vector<1x4xf32>
    %34 = vector.broadcast %33 : vector<1x4xf32> to vector<2x4xf32>
    %35 = arith.addf %31, %34 : vector<2x4xf32>
    %c0_17 = arith.constant 0 : index
    %c0_18 = arith.constant 0 : index
    %c0_19 = arith.constant 0 : index
    %36 = vector.load %arg6[%c0_17, %c0_18, %c0_19] : memref<1x2x4xf32, #tpu.memory_space<vmem>>, vector<1x2x4xf32>
    %37 = vector.shape_cast %36 : vector<1x2x4xf32> to vector<2x4xf32>
    %38 = vector.shape_cast %35 : vector<2x4xf32> to vector<1x2x4xf32>
    tpu.vector_store %arg6[%c0_17, %c0_18, %c0_19], %38 {strides = array<i32>} : memref<1x2x4xf32, #tpu.memory_space<vmem>>, vector<1x2x4xf32>,
    return
  }
  func.func @transform_0(%arg0: i32) -> (i32, i32, i32) {
    %c0_i32 = arith.constant 0 : i32
    %c0_i32_0 = arith.constant 0 : i32
    %c0_i32_1 = arith.constant 0 : i32
    %c0_i32_2 = arith.constant 0 : i32
    return %c0_i32, %c0_i32_0, %c0_i32_1 : i32, i32, i32
  }
  func.func @transform_1(%arg0: i32) -> (i32, i32) {
    %c0_i32 = arith.constant 0 : i32
    %c0_i32_0 = arith.constant 0 : i32
    %c0_i32_1 = arith.constant 0 : i32
    return %c0_i32, %c0_i32_0 : i32, i32
  }
  func.func @transform_2(%arg0: i32) -> (i32, i32) {
    %c0_i32 = arith.constant 0 : i32
    %c0_i32_0 = arith.constant 0 : i32
    %c0_i32_1 = arith.constant 0 : i32
    return %c0_i32, %c0_i32_0 : i32, i32
  }
  func.func @transform_3(%arg0: i32) -> (i32, i32, i32) {
    %c0_i32 = arith.constant 0 : i32
    %c0_i32_0 = arith.constant 0 : i32
    %c0_i32_1 = arith.constant 0 : i32
    return %arg0, %c0_i32, %c0_i32_0 : i32, i32, i32
  }
  func.func @transform_4(%arg0: i32) -> (i32, i32, i32) {
    %c0_i32 = arith.constant 0 : i32
    %c0_i32_0 = arith.constant 0 : i32
    %c0_i32_1 = arith.constant 0 : i32
    return %arg0, %c0_i32, %c0_i32_0 : i32, i32, i32
  }
  func.func @transform_5(%arg0: i32) -> (i32, i32, i32) {
    %c0_i32 = arith.constant 0 : i32
    %c0_i32_0 = arith.constant 0 : i32
    %c0_i32_1 = arith.constant 0 : i32
    return %arg0, %c0_i32, %c0_i32_0 : i32, i32, i32
  }
}

module attributes {stable_mosaic.version = 11 : i64} {
  func.func @_block_kernel(%arg0: i32, %arg1: memref<2x24x32xbf16, #tpu.memory_space<vmem>>, %arg2: memref<1x1x32xf32, #tpu.memory_space<vmem>>, %arg3: memref<1x1x32xf32, #tpu.memory_space<vmem>>, %arg4: memref<1x32x96xbf16, #tpu.memory_space<vmem>>, %arg5: memref<1x1x96xf32, #tpu.memory_space<vmem>>, %arg6: memref<1x32x32xbf16, #tpu.memory_space<vmem>>, %arg7: memref<1x1x32xf32, #tpu.memory_space<vmem>>, %arg8: memref<1x1x32xf32, #tpu.memory_space<vmem>>, %arg9: memref<1x1x32xf32, #tpu.memory_space<vmem>>, %arg10: memref<1x32x64xbf16, #tpu.memory_space<vmem>>, %arg11: memref<1x1x64xf32, #tpu.memory_space<vmem>>, %arg12: memref<1x64x32xbf16, #tpu.memory_space<vmem>>, %arg13: memref<1x1x32xf32, #tpu.memory_space<vmem>>, %arg14: memref<2x24x32xbf16, #tpu.memory_space<vmem>>, %arg15: memref<48x32xf32, #tpu.memory_space<vmem>>) attributes {dimension_semantics = [#tpu.dimension_semantics<arbitrary>], iteration_bounds = array<i64: 2>, scalar_prefetch = 0 : i64, scratch_operands = 1 : i64, tpu.core_type = #tpu.core_type<tc>, window_params = [{pipeline_mode = #tpu.pipeline_mode<synchronous>, transform_indices = @transform_0, window_bounds = array<i64: 2, 24, 32>}, {transform_indices = @transform_1, window_bounds = array<i64: 1, 1, 32>}, {transform_indices = @transform_2, window_bounds = array<i64: 1, 1, 32>}, {transform_indices = @transform_3, window_bounds = array<i64: 1, 32, 96>}, {transform_indices = @transform_4, window_bounds = array<i64: 1, 1, 96>}, {transform_indices = @transform_5, window_bounds = array<i64: 1, 32, 32>}, {transform_indices = @transform_6, window_bounds = array<i64: 1, 1, 32>}, {transform_indices = @transform_7, window_bounds = array<i64: 1, 1, 32>}, {transform_indices = @transform_8, window_bounds = array<i64: 1, 1, 32>}, {transform_indices = @transform_9, window_bounds = array<i64: 1, 32, 64>}, {transform_indices = @transform_10, window_bounds = array<i64: 1, 1, 64>}, {transform_indices = @transform_11, window_bounds = array<i64: 1, 64, 32>}, {transform_indices = @transform_12, window_bounds = array<i64: 1, 1, 32>}, {pipeline_mode = #tpu.pipeline_mode<synchronous>, transform_indices = @transform_13, window_bounds = array<i64: 2, 24, 32>}]} {
    %c0_i32 = arith.constant 0 : i32
    %0 = arith.cmpi eq, %arg0, %c0_i32 : i32
    %1 = arith.extui %0 : i1 to i32
    %c0_i32_0 = arith.constant 0 : i32
    %2 = arith.cmpi ne, %1, %c0_i32_0 : i32
    scf.if %2 {
      %c0_87 = arith.constant 0 : index
      %c0_88 = arith.constant 0 : index
      %c0_89 = arith.constant 0 : index
      %218 = vector.load %arg1[%c0_87, %c0_88, %c0_89] : memref<2x24x32xbf16, #tpu.memory_space<vmem>>, vector<2x24x32xbf16>
      %c0_90 = arith.constant 0 : index
      %c0_91 = arith.constant 0 : index
      %c0_92 = arith.constant 0 : index
      %219 = vector.load %arg14[%c0_90, %c0_91, %c0_92] : memref<2x24x32xbf16, #tpu.memory_space<vmem>>, vector<2x24x32xbf16>
      tpu.vector_store %arg14[%c0_90, %c0_91, %c0_92], %218 {strides = array<i32>} : memref<2x24x32xbf16, #tpu.memory_space<vmem>>, vector<2x24x32xbf16>,
    } else {
    }
    %c0 = arith.constant 0 : index
    %c0_1 = arith.constant 0 : index
    %c0_2 = arith.constant 0 : index
    %3 = vector.load %arg14[%c0, %c0_1, %c0_2] : memref<2x24x32xbf16, #tpu.memory_space<vmem>>, vector<2x24x32xbf16>
    %4 = vector.shape_cast %3 : vector<2x24x32xbf16> to vector<48x32xbf16>
    %5 = arith.extf %4 : vector<48x32xbf16> to vector<48x32xf32>
    %c0_3 = arith.constant 0 : index
    %c0_4 = arith.constant 0 : index
    %c0_5 = arith.constant 0 : index
    %6 = vector.load %arg2[%c0_3, %c0_4, %c0_5] : memref<1x1x32xf32, #tpu.memory_space<vmem>>, vector<1x1x32xf32>
    %7 = vector.shape_cast %6 : vector<1x1x32xf32> to vector<1x32xf32>
    %c0_6 = arith.constant 0 : index
    %c0_7 = arith.constant 0 : index
    %c0_8 = arith.constant 0 : index
    %8 = vector.load %arg3[%c0_6, %c0_7, %c0_8] : memref<1x1x32xf32, #tpu.memory_space<vmem>>, vector<1x1x32xf32>
    %9 = vector.shape_cast %8 : vector<1x1x32xf32> to vector<1x32xf32>
    %cst = arith.constant dense<0.000000e+00> : vector<48xf32>
    %10 = vector.multi_reduction <add>, %5, %cst [1] : vector<48x32xf32> to vector<48xf32>
    %11 = vector.shape_cast %10 : vector<48xf32> to vector<48x1xf32>
    %cst_9 = arith.constant 3.200000e+01 : f32
    %12 = vector.broadcast %cst_9 : f32 to vector<48x1xf32>
    %13 = arith.divf %11, %12 : vector<48x1xf32>
    %14 = arith.mulf %5, %5 : vector<48x32xf32>
    %cst_10 = arith.constant dense<0.000000e+00> : vector<48xf32>
    %15 = vector.multi_reduction <add>, %14, %cst_10 [1] : vector<48x32xf32> to vector<48xf32>
    %16 = vector.shape_cast %15 : vector<48xf32> to vector<48x1xf32>
    %cst_11 = arith.constant 3.200000e+01 : f32
    %17 = vector.broadcast %cst_11 : f32 to vector<48x1xf32>
    %18 = arith.divf %16, %17 : vector<48x1xf32>
    %19 = arith.mulf %13, %13 : vector<48x1xf32>
    %20 = arith.subf %18, %19 : vector<48x1xf32>
    %21 = vector.broadcast %13 : vector<48x1xf32> to vector<48x32xf32>
    %22 = arith.subf %5, %21 : vector<48x32xf32>
    %cst_12 = arith.constant 9.99999997E-7 : f32
    %23 = vector.broadcast %cst_12 : f32 to vector<48x1xf32>
    %24 = arith.addf %20, %23 : vector<48x1xf32>
    %25 = math.rsqrt %24 : vector<48x1xf32>
    %26 = vector.broadcast %25 : vector<48x1xf32> to vector<48x32xf32>
    %27 = arith.mulf %22, %26 : vector<48x32xf32>
    %28 = vector.broadcast %7 : vector<1x32xf32> to vector<48x32xf32>
    %29 = arith.mulf %27, %28 : vector<48x32xf32>
    %30 = vector.broadcast %9 : vector<1x32xf32> to vector<48x32xf32>
    %31 = arith.addf %29, %30 : vector<48x32xf32>
    %32 = arith.truncf %31 : vector<48x32xf32> to vector<48x32xbf16>
    %c0_13 = arith.constant 0 : index
    %c0_14 = arith.constant 0 : index
    %c0_15 = arith.constant 0 : index
    %33 = vector.load %arg4[%c0_13, %c0_14, %c0_15] : memref<1x32x96xbf16, #tpu.memory_space<vmem>>, vector<1x32x96xbf16>
    %34 = vector.shape_cast %33 : vector<1x32x96xbf16> to vector<32x96xbf16>
    %cst_16 = arith.constant dense<0.000000e+00> : vector<48x96xf32>
    %35 = tpu.matmul %32, %34, %cst_16 {dimension_numbers = #tpu.dot_dimension_numbers<[1], [0], [0], [1], [0, 0, 1, 1], [], []>} : vector<48x32xbf16>, vector<32x96xbf16>, vector<48x96xf32> -> vector<48x96xf32>
    %c0_17 = arith.constant 0 : index
    %c0_18 = arith.constant 0 : index
    %c0_19 = arith.constant 0 : index
    %36 = vector.load %arg5[%c0_17, %c0_18, %c0_19] : memref<1x1x96xf32, #tpu.memory_space<vmem>>, vector<1x1x96xf32>
    %37 = vector.shape_cast %36 : vector<1x1x96xf32> to vector<1x96xf32>
    %38 = vector.broadcast %37 : vector<1x96xf32> to vector<48x96xf32>
    %39 = arith.addf %35, %38 : vector<48x96xf32>
    %40 = tpu.iota {dimensions = array<i32: 2>} : vector<1x1x24xi32>
    %c17_i32 = arith.constant 17 : i32
    %41 = vector.broadcast %c17_i32 : i32 to vector<1x1x24xi32>
    %42 = arith.cmpi slt, %40, %41 : vector<1x1x24xi32>
    %cst_20 = arith.constant 0.000000e+00 : f32
    %cst_21 = arith.constant -1.000000e+09 : f32
    %43 = vector.broadcast %cst_20 : f32 to vector<1x1x24xf32>
    %44 = vector.broadcast %cst_21 : f32 to vector<1x1x24xf32>
    %45 = arith.select %42, %43, %44 : vector<1x1x24xi1>, vector<1x1x24xf32>
    %46 = vector.extract_strided_slice %39 {offsets = [0, 0], sizes = [48, 8], strides = [1, 1]} : vector<48x96xf32> to vector<48x8xf32>
    %47 = vector.shape_cast %46 : vector<48x8xf32> to vector<2x24x8xf32>
    %48 = arith.truncf %47 : vector<2x24x8xf32> to vector<2x24x8xbf16>
    %49 = vector.extract_strided_slice %39 {offsets = [0, 32], sizes = [48, 8], strides = [1, 1]} : vector<48x96xf32> to vector<48x8xf32>
    %50 = vector.shape_cast %49 : vector<48x8xf32> to vector<2x24x8xf32>
    %51 = arith.truncf %50 : vector<2x24x8xf32> to vector<2x24x8xbf16>
    %52 = vector.extract_strided_slice %39 {offsets = [0, 64], sizes = [48, 8], strides = [1, 1]} : vector<48x96xf32> to vector<48x8xf32>
    %53 = vector.shape_cast %52 : vector<48x8xf32> to vector<2x24x8xf32>
    %54 = arith.truncf %53 : vector<2x24x8xf32> to vector<2x24x8xbf16>
    "tpu.trace_start"() <{level = 10 : i32, message = "btd,bsd->bts"}> : () -> ()
    %cst_22 = arith.constant dense<0.000000e+00> : vector<2x24x24xf32>
    %55 = tpu.matmul %48, %51, %cst_22 {dimension_numbers = #tpu.dot_dimension_numbers<[2], [2], [1], [1], [0, 0, 0, 1, 1, 1], [0], [0]>} : vector<2x24x8xbf16>, vector<2x24x8xbf16>, vector<2x24x24xf32> -> vector<2x24x24xf32>
    "tpu.trace_stop"() : () -> ()
    %cst_23 = arith.constant 0.353553385 : f32
    %56 = vector.broadcast %cst_23 : f32 to vector<2x24x24xf32>
    %57 = arith.mulf %55, %56 : vector<2x24x24xf32>
    %58 = vector.broadcast %45 : vector<1x1x24xf32> to vector<2x24x24xf32>
    %59 = arith.addf %57, %58 : vector<2x24x24xf32>
    %cst_24 = arith.constant dense<0xFF800000> : vector<2x24xf32>
    %60 = vector.multi_reduction <maximumf>, %59, %cst_24 [2] : vector<2x24x24xf32> to vector<2x24xf32>
    %61 = vector.shape_cast %60 : vector<2x24xf32> to vector<2x24x1xf32>
    %62 = vector.broadcast %61 : vector<2x24x1xf32> to vector<2x24x24xf32>
    %63 = arith.subf %59, %62 : vector<2x24x24xf32>
    %64 = math.exp %63 : vector<2x24x24xf32>
    %cst_25 = arith.constant dense<0.000000e+00> : vector<2x24xf32>
    %65 = vector.multi_reduction <add>, %64, %cst_25 [2] : vector<2x24x24xf32> to vector<2x24xf32>
    %66 = vector.shape_cast %65 : vector<2x24xf32> to vector<2x24x1xf32>
    %67 = vector.broadcast %66 : vector<2x24x1xf32> to vector<2x24x24xf32>
    %68 = arith.divf %64, %67 : vector<2x24x24xf32>
    %69 = arith.truncf %68 : vector<2x24x24xf32> to vector<2x24x24xbf16>
    "tpu.trace_start"() <{level = 10 : i32, message = "bts,bsd->btd"}> : () -> ()
    %cst_26 = arith.constant dense<0.000000e+00> : vector<2x24x8xf32>
    %70 = tpu.matmul %69, %54, %cst_26 {dimension_numbers = #tpu.dot_dimension_numbers<[2], [1], [1], [2], [0, 0, 0, 1, 1, 2], [0], [0]>} : vector<2x24x24xbf16>, vector<2x24x8xbf16>, vector<2x24x8xf32> -> vector<2x24x8xf32>
    "tpu.trace_stop"() : () -> ()
    %71 = vector.shape_cast %70 : vector<2x24x8xf32> to vector<48x8xf32>
    %c0_27 = arith.constant 0 : index
    %c0_28 = arith.constant 0 : index
    %72 = vector.load %arg15[%c0_27, %c0_28] : memref<48x32xf32, #tpu.memory_space<vmem>>, vector<48x8xf32>
    tpu.vector_store %arg15[%c0_27, %c0_28], %71 {strides = array<i32>} : memref<48x32xf32, #tpu.memory_space<vmem>>, vector<48x8xf32>,
    %73 = vector.extract_strided_slice %39 {offsets = [0, 8], sizes = [48, 8], strides = [1, 1]} : vector<48x96xf32> to vector<48x8xf32>
    %74 = vector.shape_cast %73 : vector<48x8xf32> to vector<2x24x8xf32>
    %75 = arith.truncf %74 : vector<2x24x8xf32> to vector<2x24x8xbf16>
    %76 = vector.extract_strided_slice %39 {offsets = [0, 40], sizes = [48, 8], strides = [1, 1]} : vector<48x96xf32> to vector<48x8xf32>
    %77 = vector.shape_cast %76 : vector<48x8xf32> to vector<2x24x8xf32>
    %78 = arith.truncf %77 : vector<2x24x8xf32> to vector<2x24x8xbf16>
    %79 = vector.extract_strided_slice %39 {offsets = [0, 72], sizes = [48, 8], strides = [1, 1]} : vector<48x96xf32> to vector<48x8xf32>
    %80 = vector.shape_cast %79 : vector<48x8xf32> to vector<2x24x8xf32>
    %81 = arith.truncf %80 : vector<2x24x8xf32> to vector<2x24x8xbf16>
    "tpu.trace_start"() <{level = 10 : i32, message = "btd,bsd->bts"}> : () -> ()
    %cst_29 = arith.constant dense<0.000000e+00> : vector<2x24x24xf32>
    %82 = tpu.matmul %75, %78, %cst_29 {dimension_numbers = #tpu.dot_dimension_numbers<[2], [2], [1], [1], [0, 0, 0, 1, 1, 1], [0], [0]>} : vector<2x24x8xbf16>, vector<2x24x8xbf16>, vector<2x24x24xf32> -> vector<2x24x24xf32>
    "tpu.trace_stop"() : () -> ()
    %cst_30 = arith.constant 0.353553385 : f32
    %83 = vector.broadcast %cst_30 : f32 to vector<2x24x24xf32>
    %84 = arith.mulf %82, %83 : vector<2x24x24xf32>
    %85 = vector.broadcast %45 : vector<1x1x24xf32> to vector<2x24x24xf32>
    %86 = arith.addf %84, %85 : vector<2x24x24xf32>
    %cst_31 = arith.constant dense<0xFF800000> : vector<2x24xf32>
    %87 = vector.multi_reduction <maximumf>, %86, %cst_31 [2] : vector<2x24x24xf32> to vector<2x24xf32>
    %88 = vector.shape_cast %87 : vector<2x24xf32> to vector<2x24x1xf32>
    %89 = vector.broadcast %88 : vector<2x24x1xf32> to vector<2x24x24xf32>
    %90 = arith.subf %86, %89 : vector<2x24x24xf32>
    %91 = math.exp %90 : vector<2x24x24xf32>
    %cst_32 = arith.constant dense<0.000000e+00> : vector<2x24xf32>
    %92 = vector.multi_reduction <add>, %91, %cst_32 [2] : vector<2x24x24xf32> to vector<2x24xf32>
    %93 = vector.shape_cast %92 : vector<2x24xf32> to vector<2x24x1xf32>
    %94 = vector.broadcast %93 : vector<2x24x1xf32> to vector<2x24x24xf32>
    %95 = arith.divf %91, %94 : vector<2x24x24xf32>
    %96 = arith.truncf %95 : vector<2x24x24xf32> to vector<2x24x24xbf16>
    "tpu.trace_start"() <{level = 10 : i32, message = "bts,bsd->btd"}> : () -> ()
    %cst_33 = arith.constant dense<0.000000e+00> : vector<2x24x8xf32>
    %97 = tpu.matmul %96, %81, %cst_33 {dimension_numbers = #tpu.dot_dimension_numbers<[2], [1], [1], [2], [0, 0, 0, 1, 1, 2], [0], [0]>} : vector<2x24x24xbf16>, vector<2x24x8xbf16>, vector<2x24x8xf32> -> vector<2x24x8xf32>
    "tpu.trace_stop"() : () -> ()
    %98 = vector.shape_cast %97 : vector<2x24x8xf32> to vector<48x8xf32>
    %c0_34 = arith.constant 0 : index
    %c8 = arith.constant 8 : index
    %99 = vector.load %arg15[%c0_34, %c8] : memref<48x32xf32, #tpu.memory_space<vmem>>, vector<48x8xf32>
    tpu.vector_store %arg15[%c0_34, %c8], %98 {strides = array<i32>} : memref<48x32xf32, #tpu.memory_space<vmem>>, vector<48x8xf32>,
    %100 = vector.extract_strided_slice %39 {offsets = [0, 16], sizes = [48, 8], strides = [1, 1]} : vector<48x96xf32> to vector<48x8xf32>
    %101 = vector.shape_cast %100 : vector<48x8xf32> to vector<2x24x8xf32>
    %102 = arith.truncf %101 : vector<2x24x8xf32> to vector<2x24x8xbf16>
    %103 = vector.extract_strided_slice %39 {offsets = [0, 48], sizes = [48, 8], strides = [1, 1]} : vector<48x96xf32> to vector<48x8xf32>
    %104 = vector.shape_cast %103 : vector<48x8xf32> to vector<2x24x8xf32>
    %105 = arith.truncf %104 : vector<2x24x8xf32> to vector<2x24x8xbf16>
    %106 = vector.extract_strided_slice %39 {offsets = [0, 80], sizes = [48, 8], strides = [1, 1]} : vector<48x96xf32> to vector<48x8xf32>
    %107 = vector.shape_cast %106 : vector<48x8xf32> to vector<2x24x8xf32>
    %108 = arith.truncf %107 : vector<2x24x8xf32> to vector<2x24x8xbf16>
    "tpu.trace_start"() <{level = 10 : i32, message = "btd,bsd->bts"}> : () -> ()
    %cst_35 = arith.constant dense<0.000000e+00> : vector<2x24x24xf32>
    %109 = tpu.matmul %102, %105, %cst_35 {dimension_numbers = #tpu.dot_dimension_numbers<[2], [2], [1], [1], [0, 0, 0, 1, 1, 1], [0], [0]>} : vector<2x24x8xbf16>, vector<2x24x8xbf16>, vector<2x24x24xf32> -> vector<2x24x24xf32>
    "tpu.trace_stop"() : () -> ()
    %cst_36 = arith.constant 0.353553385 : f32
    %110 = vector.broadcast %cst_36 : f32 to vector<2x24x24xf32>
    %111 = arith.mulf %109, %110 : vector<2x24x24xf32>
    %112 = vector.broadcast %45 : vector<1x1x24xf32> to vector<2x24x24xf32>
    %113 = arith.addf %111, %112 : vector<2x24x24xf32>
    %cst_37 = arith.constant dense<0xFF800000> : vector<2x24xf32>
    %114 = vector.multi_reduction <maximumf>, %113, %cst_37 [2] : vector<2x24x24xf32> to vector<2x24xf32>
    %115 = vector.shape_cast %114 : vector<2x24xf32> to vector<2x24x1xf32>
    %116 = vector.broadcast %115 : vector<2x24x1xf32> to vector<2x24x24xf32>
    %117 = arith.subf %113, %116 : vector<2x24x24xf32>
    %118 = math.exp %117 : vector<2x24x24xf32>
    %cst_38 = arith.constant dense<0.000000e+00> : vector<2x24xf32>
    %119 = vector.multi_reduction <add>, %118, %cst_38 [2] : vector<2x24x24xf32> to vector<2x24xf32>
    %120 = vector.shape_cast %119 : vector<2x24xf32> to vector<2x24x1xf32>
    %121 = vector.broadcast %120 : vector<2x24x1xf32> to vector<2x24x24xf32>
    %122 = arith.divf %118, %121 : vector<2x24x24xf32>
    %123 = arith.truncf %122 : vector<2x24x24xf32> to vector<2x24x24xbf16>
    "tpu.trace_start"() <{level = 10 : i32, message = "bts,bsd->btd"}> : () -> ()
    %cst_39 = arith.constant dense<0.000000e+00> : vector<2x24x8xf32>
    %124 = tpu.matmul %123, %108, %cst_39 {dimension_numbers = #tpu.dot_dimension_numbers<[2], [1], [1], [2], [0, 0, 0, 1, 1, 2], [0], [0]>} : vector<2x24x24xbf16>, vector<2x24x8xbf16>, vector<2x24x8xf32> -> vector<2x24x8xf32>
    "tpu.trace_stop"() : () -> ()
    %125 = vector.shape_cast %124 : vector<2x24x8xf32> to vector<48x8xf32>
    %c0_40 = arith.constant 0 : index
    %c16 = arith.constant 16 : index
    %126 = vector.load %arg15[%c0_40, %c16] : memref<48x32xf32, #tpu.memory_space<vmem>>, vector<48x8xf32>
    tpu.vector_store %arg15[%c0_40, %c16], %125 {strides = array<i32>} : memref<48x32xf32, #tpu.memory_space<vmem>>, vector<48x8xf32>,
    %127 = vector.extract_strided_slice %39 {offsets = [0, 24], sizes = [48, 8], strides = [1, 1]} : vector<48x96xf32> to vector<48x8xf32>
    %128 = vector.shape_cast %127 : vector<48x8xf32> to vector<2x24x8xf32>
    %129 = arith.truncf %128 : vector<2x24x8xf32> to vector<2x24x8xbf16>
    %130 = vector.extract_strided_slice %39 {offsets = [0, 56], sizes = [48, 8], strides = [1, 1]} : vector<48x96xf32> to vector<48x8xf32>
    %131 = vector.shape_cast %130 : vector<48x8xf32> to vector<2x24x8xf32>
    %132 = arith.truncf %131 : vector<2x24x8xf32> to vector<2x24x8xbf16>
    %133 = vector.extract_strided_slice %39 {offsets = [0, 88], sizes = [48, 8], strides = [1, 1]} : vector<48x96xf32> to vector<48x8xf32>
    %134 = vector.shape_cast %133 : vector<48x8xf32> to vector<2x24x8xf32>
    %135 = arith.truncf %134 : vector<2x24x8xf32> to vector<2x24x8xbf16>
    "tpu.trace_start"() <{level = 10 : i32, message = "btd,bsd->bts"}> : () -> ()
    %cst_41 = arith.constant dense<0.000000e+00> : vector<2x24x24xf32>
    %136 = tpu.matmul %129, %132, %cst_41 {dimension_numbers = #tpu.dot_dimension_numbers<[2], [2], [1], [1], [0, 0, 0, 1, 1, 1], [0], [0]>} : vector<2x24x8xbf16>, vector<2x24x8xbf16>, vector<2x24x24xf32> -> vector<2x24x24xf32>
    "tpu.trace_stop"() : () -> ()
    %cst_42 = arith.constant 0.353553385 : f32
    %137 = vector.broadcast %cst_42 : f32 to vector<2x24x24xf32>
    %138 = arith.mulf %136, %137 : vector<2x24x24xf32>
    %139 = vector.broadcast %45 : vector<1x1x24xf32> to vector<2x24x24xf32>
    %140 = arith.addf %138, %139 : vector<2x24x24xf32>
    %cst_43 = arith.constant dense<0xFF800000> : vector<2x24xf32>
    %141 = vector.multi_reduction <maximumf>, %140, %cst_43 [2] : vector<2x24x24xf32> to vector<2x24xf32>
    %142 = vector.shape_cast %141 : vector<2x24xf32> to vector<2x24x1xf32>
    %143 = vector.broadcast %142 : vector<2x24x1xf32> to vector<2x24x24xf32>
    %144 = arith.subf %140, %143 : vector<2x24x24xf32>
    %145 = math.exp %144 : vector<2x24x24xf32>
    %cst_44 = arith.constant dense<0.000000e+00> : vector<2x24xf32>
    %146 = vector.multi_reduction <add>, %145, %cst_44 [2] : vector<2x24x24xf32> to vector<2x24xf32>
    %147 = vector.shape_cast %146 : vector<2x24xf32> to vector<2x24x1xf32>
    %148 = vector.broadcast %147 : vector<2x24x1xf32> to vector<2x24x24xf32>
    %149 = arith.divf %145, %148 : vector<2x24x24xf32>
    %150 = arith.truncf %149 : vector<2x24x24xf32> to vector<2x24x24xbf16>
    "tpu.trace_start"() <{level = 10 : i32, message = "bts,bsd->btd"}> : () -> ()
    %cst_45 = arith.constant dense<0.000000e+00> : vector<2x24x8xf32>
    %151 = tpu.matmul %150, %135, %cst_45 {dimension_numbers = #tpu.dot_dimension_numbers<[2], [1], [1], [2], [0, 0, 0, 1, 1, 2], [0], [0]>} : vector<2x24x24xbf16>, vector<2x24x8xbf16>, vector<2x24x8xf32> -> vector<2x24x8xf32>
    "tpu.trace_stop"() : () -> ()
    %152 = vector.shape_cast %151 : vector<2x24x8xf32> to vector<48x8xf32>
    %c0_46 = arith.constant 0 : index
    %c24 = arith.constant 24 : index
    %153 = vector.load %arg15[%c0_46, %c24] : memref<48x32xf32, #tpu.memory_space<vmem>>, vector<48x8xf32>
    tpu.vector_store %arg15[%c0_46, %c24], %152 {strides = array<i32>} : memref<48x32xf32, #tpu.memory_space<vmem>>, vector<48x8xf32>,
    %c0_47 = arith.constant 0 : index
    %c0_48 = arith.constant 0 : index
    %154 = vector.load %arg15[%c0_47, %c0_48] : memref<48x32xf32, #tpu.memory_space<vmem>>, vector<48x32xf32>
    %155 = arith.truncf %154 : vector<48x32xf32> to vector<48x32xbf16>
    %c0_49 = arith.constant 0 : index
    %c0_50 = arith.constant 0 : index
    %c0_51 = arith.constant 0 : index
    %156 = vector.load %arg6[%c0_49, %c0_50, %c0_51] : memref<1x32x32xbf16, #tpu.memory_space<vmem>>, vector<1x32x32xbf16>
    %157 = vector.shape_cast %156 : vector<1x32x32xbf16> to vector<32x32xbf16>
    %cst_52 = arith.constant dense<0.000000e+00> : vector<48x32xf32>
    %158 = tpu.matmul %155, %157, %cst_52 {dimension_numbers = #tpu.dot_dimension_numbers<[1], [0], [0], [1], [0, 0, 1, 1], [], []>} : vector<48x32xbf16>, vector<32x32xbf16>, vector<48x32xf32> -> vector<48x32xf32>
    %c0_53 = arith.constant 0 : index
    %c0_54 = arith.constant 0 : index
    %c0_55 = arith.constant 0 : index
    %159 = vector.load %arg7[%c0_53, %c0_54, %c0_55] : memref<1x1x32xf32, #tpu.memory_space<vmem>>, vector<1x1x32xf32>
    %160 = vector.shape_cast %159 : vector<1x1x32xf32> to vector<1x32xf32>
    %161 = vector.broadcast %160 : vector<1x32xf32> to vector<48x32xf32>
    %162 = arith.addf %158, %161 : vector<48x32xf32>
    %163 = arith.addf %5, %162 : vector<48x32xf32>
    %c0_56 = arith.constant 0 : index
    %c0_57 = arith.constant 0 : index
    %c0_58 = arith.constant 0 : index
    %164 = vector.load %arg8[%c0_56, %c0_57, %c0_58] : memref<1x1x32xf32, #tpu.memory_space<vmem>>, vector<1x1x32xf32>
    %165 = vector.shape_cast %164 : vector<1x1x32xf32> to vector<1x32xf32>
    %c0_59 = arith.constant 0 : index
    %c0_60 = arith.constant 0 : index
    %c0_61 = arith.constant 0 : index
    %166 = vector.load %arg9[%c0_59, %c0_60, %c0_61] : memref<1x1x32xf32, #tpu.memory_space<vmem>>, vector<1x1x32xf32>
    %167 = vector.shape_cast %166 : vector<1x1x32xf32> to vector<1x32xf32>
    %cst_62 = arith.constant dense<0.000000e+00> : vector<48xf32>
    %168 = vector.multi_reduction <add>, %163, %cst_62 [1] : vector<48x32xf32> to vector<48xf32>
    %169 = vector.shape_cast %168 : vector<48xf32> to vector<48x1xf32>
    %cst_63 = arith.constant 3.200000e+01 : f32
    %170 = vector.broadcast %cst_63 : f32 to vector<48x1xf32>
    %171 = arith.divf %169, %170 : vector<48x1xf32>
    %172 = arith.mulf %163, %163 : vector<48x32xf32>
    %cst_64 = arith.constant dense<0.000000e+00> : vector<48xf32>
    %173 = vector.multi_reduction <add>, %172, %cst_64 [1] : vector<48x32xf32> to vector<48xf32>
    %174 = vector.shape_cast %173 : vector<48xf32> to vector<48x1xf32>
    %cst_65 = arith.constant 3.200000e+01 : f32
    %175 = vector.broadcast %cst_65 : f32 to vector<48x1xf32>
    %176 = arith.divf %174, %175 : vector<48x1xf32>
    %177 = arith.mulf %171, %171 : vector<48x1xf32>
    %178 = arith.subf %176, %177 : vector<48x1xf32>
    %179 = vector.broadcast %171 : vector<48x1xf32> to vector<48x32xf32>
    %180 = arith.subf %163, %179 : vector<48x32xf32>
    %cst_66 = arith.constant 9.99999997E-7 : f32
    %181 = vector.broadcast %cst_66 : f32 to vector<48x1xf32>
    %182 = arith.addf %178, %181 : vector<48x1xf32>
    %183 = math.rsqrt %182 : vector<48x1xf32>
    %184 = vector.broadcast %183 : vector<48x1xf32> to vector<48x32xf32>
    %185 = arith.mulf %180, %184 : vector<48x32xf32>
    %186 = vector.broadcast %165 : vector<1x32xf32> to vector<48x32xf32>
    %187 = arith.mulf %185, %186 : vector<48x32xf32>
    %188 = vector.broadcast %167 : vector<1x32xf32> to vector<48x32xf32>
    %189 = arith.addf %187, %188 : vector<48x32xf32>
    %190 = arith.truncf %189 : vector<48x32xf32> to vector<48x32xbf16>
    %c0_67 = arith.constant 0 : index
    %c0_68 = arith.constant 0 : index
    %c0_69 = arith.constant 0 : index
    %191 = vector.load %arg10[%c0_67, %c0_68, %c0_69] : memref<1x32x64xbf16, #tpu.memory_space<vmem>>, vector<1x32x64xbf16>
    %192 = vector.shape_cast %191 : vector<1x32x64xbf16> to vector<32x64xbf16>
    %cst_70 = arith.constant dense<0.000000e+00> : vector<48x64xf32>
    %193 = tpu.matmul %190, %192, %cst_70 {dimension_numbers = #tpu.dot_dimension_numbers<[1], [0], [0], [1], [0, 0, 1, 1], [], []>} : vector<48x32xbf16>, vector<32x64xbf16>, vector<48x64xf32> -> vector<48x64xf32>
    %c0_71 = arith.constant 0 : index
    %c0_72 = arith.constant 0 : index
    %c0_73 = arith.constant 0 : index
    %194 = vector.load %arg11[%c0_71, %c0_72, %c0_73] : memref<1x1x64xf32, #tpu.memory_space<vmem>>, vector<1x1x64xf32>
    %195 = vector.shape_cast %194 : vector<1x1x64xf32> to vector<1x64xf32>
    %196 = vector.broadcast %195 : vector<1x64xf32> to vector<48x64xf32>
    %197 = arith.addf %193, %196 : vector<48x64xf32>
    %cst_74 = arith.constant 5.000000e-01 : f32
    %198 = vector.broadcast %cst_74 : f32 to vector<48x64xf32>
    %199 = arith.mulf %198, %197 : vector<48x64xf32>
    %cst_75 = arith.constant 0.707106769 : f32
    %200 = vector.broadcast %cst_75 : f32 to vector<48x64xf32>
    %201 = arith.mulf %197, %200 : vector<48x64xf32>
    %202 = math.erf %201 : vector<48x64xf32>
    %cst_76 = arith.constant 1.000000e+00 : f32
    %203 = vector.broadcast %cst_76 : f32 to vector<48x64xf32>
    %204 = arith.addf %203, %202 : vector<48x64xf32>
    %205 = arith.mulf %199, %204 : vector<48x64xf32>
    %206 = arith.truncf %205 : vector<48x64xf32> to vector<48x64xbf16>
    %c0_77 = arith.constant 0 : index
    %c0_78 = arith.constant 0 : index
    %c0_79 = arith.constant 0 : index
    %207 = vector.load %arg12[%c0_77, %c0_78, %c0_79] : memref<1x64x32xbf16, #tpu.memory_space<vmem>>, vector<1x64x32xbf16>
    %208 = vector.shape_cast %207 : vector<1x64x32xbf16> to vector<64x32xbf16>
    %cst_80 = arith.constant dense<0.000000e+00> : vector<48x32xf32>
    %209 = tpu.matmul %206, %208, %cst_80 {dimension_numbers = #tpu.dot_dimension_numbers<[1], [0], [0], [1], [0, 0, 1, 1], [], []>} : vector<48x64xbf16>, vector<64x32xbf16>, vector<48x32xf32> -> vector<48x32xf32>
    %c0_81 = arith.constant 0 : index
    %c0_82 = arith.constant 0 : index
    %c0_83 = arith.constant 0 : index
    %210 = vector.load %arg13[%c0_81, %c0_82, %c0_83] : memref<1x1x32xf32, #tpu.memory_space<vmem>>, vector<1x1x32xf32>
    %211 = vector.shape_cast %210 : vector<1x1x32xf32> to vector<1x32xf32>
    %212 = vector.broadcast %211 : vector<1x32xf32> to vector<48x32xf32>
    %213 = arith.addf %209, %212 : vector<48x32xf32>
    %214 = arith.addf %163, %213 : vector<48x32xf32>
    %215 = vector.shape_cast %214 : vector<48x32xf32> to vector<2x24x32xf32>
    %216 = arith.truncf %215 : vector<2x24x32xf32> to vector<2x24x32xbf16>
    %c0_84 = arith.constant 0 : index
    %c0_85 = arith.constant 0 : index
    %c0_86 = arith.constant 0 : index
    %217 = vector.load %arg14[%c0_84, %c0_85, %c0_86] : memref<2x24x32xbf16, #tpu.memory_space<vmem>>, vector<2x24x32xbf16>
    tpu.vector_store %arg14[%c0_84, %c0_85, %c0_86], %216 {strides = array<i32>} : memref<2x24x32xbf16, #tpu.memory_space<vmem>>, vector<2x24x32xbf16>,
    return
  }
  func.func @transform_0(%arg0: i32) -> (i32, i32, i32) {
    %c0_i32 = arith.constant 0 : i32
    %c0_i32_0 = arith.constant 0 : i32
    %c0_i32_1 = arith.constant 0 : i32
    %c0_i32_2 = arith.constant 0 : i32
    return %c0_i32, %c0_i32_0, %c0_i32_1 : i32, i32, i32
  }
  func.func @transform_1(%arg0: i32) -> (i32, i32, i32) {
    %c0_i32 = arith.constant 0 : i32
    %c0_i32_0 = arith.constant 0 : i32
    %c0_i32_1 = arith.constant 0 : i32
    return %arg0, %c0_i32, %c0_i32_0 : i32, i32, i32
  }
  func.func @transform_2(%arg0: i32) -> (i32, i32, i32) {
    %c0_i32 = arith.constant 0 : i32
    %c0_i32_0 = arith.constant 0 : i32
    %c0_i32_1 = arith.constant 0 : i32
    return %arg0, %c0_i32, %c0_i32_0 : i32, i32, i32
  }
  func.func @transform_3(%arg0: i32) -> (i32, i32, i32) {
    %c0_i32 = arith.constant 0 : i32
    %c0_i32_0 = arith.constant 0 : i32
    %c0_i32_1 = arith.constant 0 : i32
    return %arg0, %c0_i32, %c0_i32_0 : i32, i32, i32
  }
  func.func @transform_4(%arg0: i32) -> (i32, i32, i32) {
    %c0_i32 = arith.constant 0 : i32
    %c0_i32_0 = arith.constant 0 : i32
    %c0_i32_1 = arith.constant 0 : i32
    return %arg0, %c0_i32, %c0_i32_0 : i32, i32, i32
  }
  func.func @transform_5(%arg0: i32) -> (i32, i32, i32) {
    %c0_i32 = arith.constant 0 : i32
    %c0_i32_0 = arith.constant 0 : i32
    %c0_i32_1 = arith.constant 0 : i32
    return %arg0, %c0_i32, %c0_i32_0 : i32, i32, i32
  }
  func.func @transform_6(%arg0: i32) -> (i32, i32, i32) {
    %c0_i32 = arith.constant 0 : i32
    %c0_i32_0 = arith.constant 0 : i32
    %c0_i32_1 = arith.constant 0 : i32
    return %arg0, %c0_i32, %c0_i32_0 : i32, i32, i32
  }
  func.func @transform_7(%arg0: i32) -> (i32, i32, i32) {
    %c0_i32 = arith.constant 0 : i32
    %c0_i32_0 = arith.constant 0 : i32
    %c0_i32_1 = arith.constant 0 : i32
    return %arg0, %c0_i32, %c0_i32_0 : i32, i32, i32
  }
  func.func @transform_8(%arg0: i32) -> (i32, i32, i32) {
    %c0_i32 = arith.constant 0 : i32
    %c0_i32_0 = arith.constant 0 : i32
    %c0_i32_1 = arith.constant 0 : i32
    return %arg0, %c0_i32, %c0_i32_0 : i32, i32, i32
  }
  func.func @transform_9(%arg0: i32) -> (i32, i32, i32) {
    %c0_i32 = arith.constant 0 : i32
    %c0_i32_0 = arith.constant 0 : i32
    %c0_i32_1 = arith.constant 0 : i32
    return %arg0, %c0_i32, %c0_i32_0 : i32, i32, i32
  }
  func.func @transform_10(%arg0: i32) -> (i32, i32, i32) {
    %c0_i32 = arith.constant 0 : i32
    %c0_i32_0 = arith.constant 0 : i32
    %c0_i32_1 = arith.constant 0 : i32
    return %arg0, %c0_i32, %c0_i32_0 : i32, i32, i32
  }
  func.func @transform_11(%arg0: i32) -> (i32, i32, i32) {
    %c0_i32 = arith.constant 0 : i32
    %c0_i32_0 = arith.constant 0 : i32
    %c0_i32_1 = arith.constant 0 : i32
    return %arg0, %c0_i32, %c0_i32_0 : i32, i32, i32
  }
  func.func @transform_12(%arg0: i32) -> (i32, i32, i32) {
    %c0_i32 = arith.constant 0 : i32
    %c0_i32_0 = arith.constant 0 : i32
    %c0_i32_1 = arith.constant 0 : i32
    return %arg0, %c0_i32, %c0_i32_0 : i32, i32, i32
  }
  func.func @transform_13(%arg0: i32) -> (i32, i32, i32) {
    %c0_i32 = arith.constant 0 : i32
    %c0_i32_0 = arith.constant 0 : i32
    %c0_i32_1 = arith.constant 0 : i32
    %c0_i32_2 = arith.constant 0 : i32
    return %c0_i32, %c0_i32_0, %c0_i32_1 : i32, i32, i32
  }
}

module attributes {stable_mosaic.version = 11 : i64} {
  func.func @_upsample_kernel(%arg0: i32, %arg1: memref<1x2x2xf32, #tpu.memory_space<vmem>>, %arg2: memref<16x2xf32, #tpu.memory_space<vmem>>, %arg3: memref<2x16xf32, #tpu.memory_space<vmem>>, %arg4: memref<1x16x16xf32, #tpu.memory_space<vmem>>) attributes {dimension_semantics = [#tpu.dimension_semantics<parallel>], iteration_bounds = array<i64: 16>, scalar_prefetch = 0 : i64, scratch_operands = 0 : i64, tpu.core_type = #tpu.core_type<tc>, window_params = [{transform_indices = @transform_0, window_bounds = array<i64: 1, 2, 2>}, {pipeline_mode = #tpu.pipeline_mode<synchronous>, transform_indices = @transform_1, window_bounds = array<i64: 16, 2>}, {pipeline_mode = #tpu.pipeline_mode<synchronous>, transform_indices = @transform_2, window_bounds = array<i64: 2, 16>}, {transform_indices = @transform_3, window_bounds = array<i64: 1, 16, 16>}]} {
    %c0 = arith.constant 0 : index
    %c0_0 = arith.constant 0 : index
    %0 = vector.load %arg2[%c0, %c0_0] : memref<16x2xf32, #tpu.memory_space<vmem>>, vector<16x2xf32>
    %c0_1 = arith.constant 0 : index
    %c0_2 = arith.constant 0 : index
    %c0_3 = arith.constant 0 : index
    %1 = vector.load %arg1[%c0_1, %c0_2, %c0_3] : memref<1x2x2xf32, #tpu.memory_space<vmem>>, vector<1x2x2xf32>
    %2 = vector.shape_cast %1 : vector<1x2x2xf32> to vector<2x2xf32>
    %cst = arith.constant dense<0.000000e+00> : vector<16x2xf32>
    %3 = tpu.matmul %0, %2, %cst {dimension_numbers = #tpu.dot_dimension_numbers<[1], [0], [0], [1], [0, 0, 1, 1], [], []>} : vector<16x2xf32>, vector<2x2xf32>, vector<16x2xf32> -> vector<16x2xf32>
    %c0_4 = arith.constant 0 : index
    %c0_5 = arith.constant 0 : index
    %4 = vector.load %arg3[%c0_4, %c0_5] : memref<2x16xf32, #tpu.memory_space<vmem>>, vector<2x16xf32>
    %cst_6 = arith.constant dense<0.000000e+00> : vector<16x16xf32>
    %5 = tpu.matmul %3, %4, %cst_6 {dimension_numbers = #tpu.dot_dimension_numbers<[1], [0], [0], [1], [0, 0, 1, 1], [], []>} : vector<16x2xf32>, vector<2x16xf32>, vector<16x16xf32> -> vector<16x16xf32>
    %cst_7 = arith.constant 0.000000e+00 : f32
    %6 = vector.broadcast %cst_7 : f32 to vector<16x16xf32>
    %7 = arith.subf %6, %5 : vector<16x16xf32>
    %8 = math.exp %7 : vector<16x16xf32>
    %cst_8 = arith.constant 1.000000e+00 : f32
    %9 = vector.broadcast %cst_8 : f32 to vector<16x16xf32>
    %10 = arith.addf %9, %8 : vector<16x16xf32>
    %cst_9 = arith.constant 1.000000e+00 : f32
    %11 = vector.broadcast %cst_9 : f32 to vector<16x16xf32>
    %12 = arith.divf %11, %10 : vector<16x16xf32>
    %c0_10 = arith.constant 0 : index
    %c0_11 = arith.constant 0 : index
    %c0_12 = arith.constant 0 : index
    %13 = vector.load %arg4[%c0_10, %c0_11, %c0_12] : memref<1x16x16xf32, #tpu.memory_space<vmem>>, vector<1x16x16xf32>
    %14 = vector.shape_cast %13 : vector<1x16x16xf32> to vector<16x16xf32>
    %15 = vector.shape_cast %12 : vector<16x16xf32> to vector<1x16x16xf32>
    tpu.vector_store %arg4[%c0_10, %c0_11, %c0_12], %15 {strides = array<i32>} : memref<1x16x16xf32, #tpu.memory_space<vmem>>, vector<1x16x16xf32>,
    return
  }
  func.func @transform_0(%arg0: i32) -> (i32, i32, i32) {
    %c0_i32 = arith.constant 0 : i32
    %c0_i32_0 = arith.constant 0 : i32
    %c0_i32_1 = arith.constant 0 : i32
    return %arg0, %c0_i32, %c0_i32_0 : i32, i32, i32
  }
  func.func @transform_1(%arg0: i32) -> (i32, i32) {
    %c0_i32 = arith.constant 0 : i32
    %c0_i32_0 = arith.constant 0 : i32
    %c0_i32_1 = arith.constant 0 : i32
    return %c0_i32, %c0_i32_0 : i32, i32
  }
  func.func @transform_2(%arg0: i32) -> (i32, i32) {
    %c0_i32 = arith.constant 0 : i32
    %c0_i32_0 = arith.constant 0 : i32
    %c0_i32_1 = arith.constant 0 : i32
    return %c0_i32, %c0_i32_0 : i32, i32
  }
  func.func @transform_3(%arg0: i32) -> (i32, i32, i32) {
    %c0_i32 = arith.constant 0 : i32
    %c0_i32_0 = arith.constant 0 : i32
    %c0_i32_1 = arith.constant 0 : i32
    return %arg0, %c0_i32, %c0_i32_0 : i32, i32, i32
  }
}

</mosaic_0001>

<bundles_post_ra>
// kernel: model_forward.4
= control target key start
LH: loop header
LB: loop body
LE: loop exit
PB: predicated region body
PF: predicated region fallthrough
CT: control target
= control target key end

     0   :  { %v232_v0 = vmov 0.0   ;;  %vm233_vm0 = vmmov 0   ;;  %vm60_vm1 = vcmask 392192   ;;  %vm162_vm2 = vcmask 257024   ;;  %s308_s1 = inlined_call_operand.vmem [shape: bf16[48,32], index: 1, kind: input, shape index: {}]   ;;  %s309_s0 = inlined_call_operand.vmem [shape: bf16[2,24,48], index: 0, kind: input, shape index: {}]   ;;  %s310_s2 = inlined_call_operand.vmem [shape: f32[24,32], index: 2, kind: input, shape index: {}]   ;;  %s311_s3 = inlined_call_operand.vmem [shape: bf16[2,24,32], index: 3, kind: output, shape index: {}]  }
   0x1   :  { %218 = vmatprep.subr.bf16.mxu1 %v232_v0  ;;  %v226_v1 = vld [vmem:[%s308_s1 + $0x10] sm:$0xff]   ;;  %200 = vmatprep.subr.bf16.mxu0 %v232_v0  ;;  %v227_v2 = vld [vmem:[%s308_s1 + $0x8] sm:$0xff]   ;;  %v228_v3 = vld [vmem:[%s308_s1] sm:$0xff]  }
   0x2   :  { %210 = vmatprep.mubr.msk.bf16.mxu1 %vm233_vm0, %v232_v0  ;;  %206 = vmatprep.mubr.msk.bf16.mxu0 %vm233_vm0, %v232_v0  ;;  %v229_v4 = vld [vmem:[%s309_s0 + $0x8] sm:$0xff]   ;;  %v230_v5 = vld [vmem:[%s309_s0] sm:$0xff]   ;;  %v231_v6 = vld [vmem:[%s309_s0 + $0x10] sm:$0xff]  }
   0x3   :  { %221 = vmatpush3.bf16.msra.mxu1 %v226_v1  ;;  %201 = vmatpush3.bf16.msra.mxu0 %v226_v1  ;;  %v129_v7 = vld [vmem:[%s310_s2 + $0x10] sm:$0xff]  ;;  %v127_v10 = vld [vmem:[%s310_s2] sm:$0xff]  ;;  %v128_v15 = vld [vmem:[%s310_s2 + $0x8] sm:$0xff] }
   0x4   :  { %219 = vmatprep.subr.bf16.mxu1 %v232_v0  ;;  %202 = vmatprep.subr.bf16.mxu0 %v232_v0 }
   0x7   :  { %222 = vmatpush3.bf16.msra.mxu1 %v227_v2  ;;  %203 = vmatpush3.bf16.msra.mxu0 %v227_v2 }
   0x8   :  { %220 = vmatprep.subr.bf16.mxu1 %v232_v0  ;;  %204 = vmatprep.subr.bf16.mxu0 %v232_v0 }
   0xb   :  { %223 = vmatpush3.bf16.msra.mxu1 %v228_v3  ;;  %205 = vmatpush3.bf16.msra.mxu0 %v228_v3 }
   0xe   :  { %211 = vmatmul.mubr.msk.bf16.vlgmr.msra.gmra.mxu1 %vm60_vm1, %v229_v4  ;;  %207 = vmatmul.mubr.msk.bf16.vlgmr.msra.gmra.mxu0 %vm60_vm1, %v230_v5 }
   0xf   :  { %214 = vmatprep.mubr.msk.bf16.mxu1 %vm233_vm0, %v232_v0 }
  0x16   :  { %215 = vmatmul.mubr.msk.bf16.gmra.mxu1 %vm60_vm1, %v231_v6 }
  0xce   :  { %v112_v8 = vpop.f32.mrf.mxu1  ;;  %v104_v9 = vpop.f32.mrf.mxu0 }
  0xcf   :  { %v132_v11 = vadd.f32 %v129_v7, %v112_v8  ;;  %v130_v12 = vadd.f32 %v127_v10, %v104_v9 }
  0xd0   :  { %v212_v13 = vpop.f32.mrf.mxu1  ;;  %v208_v14 = vpop.f32.mrf.mxu0 }
  0xd1   :  { %v190_v16 = vpack.c.bf16 %v132_v11, %v132_v11  ;;  %v188_v17 = vpack.c.bf16 %v130_v12, %v130_v12 }
  0xd2   :  { %v115_v18 = vpop.f32.mrf.mxu1  ;;  %v107_v19 = vpop.f32.mrf.mxu0 }
  0xd3   :  { %165 = vst.msk [vmem:[%s311_s3 + $0x8] sm:$0xf] %vm162_vm2, %v190_v16  ;;  %163 = vst.msk [vmem:[%s311_s3] sm:$0xf] %vm162_vm2, %v188_v17  ;;  %v133_v20 = vadd.f32 %v127_v10, %v115_v18  ;;  %v131_v21 = vadd.f32 %v128_v15, %v107_v19 }
  0xd4   :  { %v213_v22 = vpop.f32.mrf.mxu1  ;;  %v209_v23 = vpop.f32.mrf.mxu0 }
  0xd5   :  { %v191_v24 = vpack.c.bf16 %v133_v20, %v133_v20  ;;  %v189_v25 = vpack.c.bf16 %v131_v21, %v131_v21 }
  0xd6   :  { %v120_v26 = vpop.f32.mrf.mxu1 }
  0xd7   :  { %166 = vst.msk [vmem:[%s311_s3 + $0xc] sm:$0xf] %vm162_vm2, %v191_v24  ;;  %164 = vst.msk [vmem:[%s311_s3 + $0x4] sm:$0xf] %vm162_vm2, %v189_v25  ;;  %v134_v27 = vadd.f32 %v128_v15, %v120_v26 }
  0xd8   :  { %v216_v28 = vpop.f32.mrf.mxu1 }
  0xd9   :  { %v192_v29 = vpack.c.bf16 %v134_v27, %v134_v27 }
  0xda   :  { %v123_v30 = vpop.f32.mrf.mxu1 }
  0xdb   :  { %167 = vst.msk [vmem:[%s311_s3 + $0x10] sm:$0xf] %vm162_vm2, %v192_v29  ;;  %v135_v31 = vadd.f32 %v129_v7, %v123_v30 }
  0xdc   :  { %v217_v32 = vpop.f32.mrf.mxu1 }
  0xdd   :  { %v193_v33 = vpack.c.bf16 %v135_v31, %v135_v31 }
  0xdf   :  { %168 = vst.msk [vmem:[%s311_s3 + $0x14] sm:$0xf] %vm162_vm2, %v193_v33 }

// kernel: model_forward.6
= control target key start
LH: loop header
LB: loop body
LE: loop exit
PB: predicated region body
PF: predicated region fallthrough
CT: control target
= control target key end

     0   :  { %s587_s18 = smov 0   ;;  %s632_s0 = inlined_call_operand.vmem [shape: bf16[2,24,32], index: 0, kind: input, shape index: {}]   ;;  %s633_s1 = inlined_call_operand.vmem [shape: f32[1,32], index: 1, kind: input, shape index: {}]   ;;  %s634_s2 = inlined_call_operand.vmem [shape: f32[1,32], index: 2, kind: input, shape index: {}]   ;;  %s635_s3 = inlined_call_operand.vmem [shape: bf16[8,32,4], index: 3, kind: input, shape index: {}]   ;;  %s636_s4 = inlined_call_operand.vmem [shape: f32[8,1,4], index: 4, kind: input, shape index: {}]   ;;  %s637_s5 = inlined_call_operand.vmem [shape: f32[8,2,4], index: 5, kind: output, shape index: {}]  }
   0x1 LB: > { %s593_s19 = sadd.s32 4294967295, %s553_s18   ;;  %p502_p0 = scmp.ge.s32.totalorder %s553_s18, 1  ;;  %s553_s18 = sphi %s587_s18, %s15_s18  }
   0x2   : > { %p161_p1 = scmp.lt.s32.totalorder %s553_s18, 9 }
   0x4   : > { %p162_p2 = pnand %p502_p0, %p161_p1 }
   0x5   : > { %p503_p3 = scmp.ne.s32.totalorder (!%p162_p2), %s593_s19, 0 }
   0x6   : > { %165 = sbr.rel (%p162_p2) target bundleno = 18 (0x12), region = 12 }
   0xb   : > { %169 = sbr.rel (%p503_p3) target bundleno = 18 (0x12), region = 16 }
  0x10   : > { %v186_v0 = vld [vmem:[%s632_s0] sm:$0xf]  ;;  %v188_v1 = vld [vmem:[%s632_s0 + $0xc] sm:$0xf] }
  0x11   : > { %187 = vst [vmem:[#allocation2] sm:$0xf] %v186_v0  ;;  %189 = vst [vmem:[#allocation2 + $0x4] sm:$0xf] %v188_v1 }
  0x12 PF: > { %244 = sbr.rel (%p162_p2) target bundleno = 409 (0x199), region = 77  ;;  %p273_p4 = scmp.lt.s32.totalorder (!%p162_p2), %s593_s19, 7 }
  0x17   : > { %vm293_vm0 = vcmask 1041409   ;;  %vm296_vm1 = vcmask 254976   ;;  %v555_v13 = vmov 0.0   ;;  %vm556_vm2 = vmmov 0   ;;  %s639_s19 = smov (!%p273_p4, %s593_s19), 7 }
  0x18   : > { %v519_v2 = vld [vmem:[#allocation2] sm:$0xff]   ;;  %525 = vmatprep.subr.bf16.mxu0 %v555_v13  ;;  %529 = vmatprep.mubr.msk.bf16.mxu0 %vm556_vm2, %v555_v13  ;;  %s517_s24 = sshll.u32 %s639_s19, 4  ;;  %vm379_vm3 = vcmask 261120   ;;  %s280_s9 = scalar_lea.vmem %s636_s4, %s639_s19  ;;  %vm423_vm4 = vcmask 25600  }
  0x19   : > { %v520_v3 = vunpack.c.l.bf16 %v519_v2  ;;  %v521_v4 = vunpack.c.h.bf16 %v519_v2  ;;  %s277_s27 = scalar_lea.vmem %s635_s3, %s517_s24  ;;  %v509_v26 = vld [vmem:[%s633_s1] ss:$0 sm:$0xff]  ;;  %s508_s10 = sshll.u32 %s639_s19, 1 }
  0x1a   : > { %v543_v14 = vld [vmem:[%s277_s27 + $0x8] sm:$0xff]   ;;  %v544_v15 = vld [vmem:[%s277_s27] sm:$0xff]   ;;  %s284_s13 = scalar_lea.vmem %s637_s5, %s508_s10 }
  0x1b   : > { %v292_v5 = vrot.slane %v521_v4, 7  ;;  %v302_v6 = vmul.f32 %v520_v3, %v520_v3  ;;  %v303_v7 = vmul.f32 %v521_v4, %v521_v4  ;;  %526 = vmatpush3.bf16.msra.mxu0 %v543_v14  ;;  %v510_v30 = vld [vmem:[%s634_s2] ss:$0 sm:$0xff] }
  0x1c   : > { %527 = vmatprep.subr.bf16.mxu0 %v555_v13  ;;  %v511_v43 = vld [vmem:[%s280_s9] ss:$0 sm:$0xff] }
  0x1d   : > { %v294_v8 = vsel %vm293_vm0, %v292_v5, %v520_v3  ;;  %v306_v9 = vrot.slane %v303_v7, 7 }
  0x1e   : > { %v297_v10 = vsel %vm296_vm1, %v294_v8, 0.0 }
  0x1f   : > { %298 = vadd.xlane.f32.xlu0 %v297_v10  ;;  %v307_v11 = vsel %vm293_vm0, %v306_v9, %v302_v6  ;;  %528 = vmatpush3.bf16.msra.mxu0 %v544_v15 }
  0x20   : > { %v309_v12 = vsel %vm296_vm1, %v307_v11, 0.0 }
  0x23   : > { %310 = vadd.xlane.f32.xlu0 %v309_v12 }
  0xa8   : > { %v299_v16 = vpop.xlane.xlu0 %298 }
  0xa9   : > { %v301_v17 = vmul.f32 0.03125, %v299_v16 }
  0xab   : > { %v319_v19 = vmul.f32 %v301_v17, %v301_v17  ;;  %v314_v23 = vrot.slane %v301_v17, 1  ;;  %v317_v24 = vsub.f32 %v520_v3, %v301_v17 }
  0xac   : > { %v311_v18 = vpop.xlane.xlu0 %310 }
  0xad   : > { %v312_v20 = vmul.f32 0.03125, %v311_v18  ;;  %v318_v27 = vsub.f32 %v521_v4, %v314_v23 }
  0xaf   : > { %v320_v21 = vsub.f32 %v312_v20, %v319_v19 }
  0xb1   : > { %v321_v22 = vadd.f32 1e-06, %v320_v21 }
  0xb3   : > { %545 = vrsqrt.f32 %v321_v22 }
  0xc0   : > { %v546_v25 = vpop.eup %545 }
  0xc1   : > { %v324_v28 = vrot.slane %v546_v25, 1  ;;  %v327_v29 = vmul.f32 %v546_v25, %v317_v24 }
  0xc3   : > { %v328_v31 = vmul.f32 %v324_v28, %v318_v27  ;;  %v336_v32 = vmul.f32 %v509_v26, %v327_v29 }
  0xc5   : > { %v337_v33 = vmul.f32 %v509_v26, %v328_v31  ;;  %v345_v34 = vadd.f32 %v510_v30, %v336_v32 }
  0xc7   : > { %v346_v35 = vadd.f32 %v510_v30, %v337_v33  ;;  %v347_v36 = vpack.c.bf16 %v345_v34, %v345_v34 }
  0xc9   : > { %v348_v37 = vpack.c.bf16 %v346_v35, %v346_v35  ;;  %v362_v39 = vunpack.c.l.b16 %v347_v36 }
  0xcb   : > { %v363_v38 = vunpack.c.l.b16 %v348_v37 }
  0xcd   : > { %v364_v40 = vrot.slane %v363_v38, 7 }
  0xcf   : > { %v365_v41 = vsel %vm293_vm0, %v364_v40, %v362_v39 }
  0xd0   : > { %v366_v42 = vpack.c.b16 %v365_v41, %v365_v41 }
  0xd2   : > { %530 = vmatmul.mubr.msk.bf16.vlgmr.msra.gmra.mxu0 %vm379_vm3, %v366_v42 }
 0x192   : > { %v417_v44 = vpop.f32.mrf.mxu0 }
 0x193   : > { %v418_v45 = vadd.f32 %v511_v43, %v417_v44 }
 0x194   : > { %v531_v46 = vpop.f32.mrf.mxu0 }
 0x195   : > { %424 = vst.msk [vmem:[%s284_s13] sm:$0x3] %vm423_vm4, %v418_v45 }
 0x196   : > { %v420_v47 = vpop.f32.mrf.mxu0 }
 0x198   : > { %v532_v48 = vpop.f32.mrf.mxu0 }
 0x199 PF: > { %s15_s18 = sadd.s32 1, %s553_s18  }
 0x19a   : > { %p12_p5 = scmp.ge.s32.totalorder %s15_s18, 10  }
 0x19c   :  { %14 = sbr.rel (!%p12_p5) target bundleno = 1 (0x1), region = 118 }

// kernel: model_forward.7
= control target key start
LH: loop header
LB: loop body
LE: loop exit
PB: predicated region body
PF: predicated region fallthrough
CT: control target
= control target key end

     0   :  { %s489_s12 = smov 0   ;;  %s523_s0 = inlined_call_operand.vmem [shape: f32[16,2,2], index: 0, kind: input, shape index: {}]   ;;  %s524_s1 = inlined_call_operand.vmem [shape: f32[16,2], index: 1, kind: input, shape index: {}]   ;;  %s525_s2 = inlined_call_operand.vmem [shape: f32[2,16], index: 2, kind: input, shape index: {}]   ;;  %s526_s3 = inlined_call_operand.vmem [shape: f32[16,16,16], index: 3, kind: output, shape index: {}]  }
   0x1 LB: > { %s412_s13 = sadd.s32 4294967295, %s467_s12   ;;  %p416_p0 = scmp.ge.s32.totalorder %s467_s12, 1  ;;  %s467_s12 = sphi %s489_s12, %s13_s12  }
   0x2   : > { %p136_p1 = scmp.lt.s32.totalorder %s467_s12, 17 }
   0x4   : > { %p137_p2 = pnand %p416_p0, %p136_p1 }
   0x5   : > { %p159_p3 = scmp.lt.s32.totalorder (!%p137_p2), %s412_s13, 15 }
   0x6   : > { %140 = sbr.rel (%p137_p2) target bundleno = 443 (0x1bb), region = 32 }
   0xb   : > { %v168_v0 = vld [vmem:[%s524_s1] sm:$0xff]  ;;  %vm171_vm0 = vcmask 15360   ;;  %s528_s13 = smov (!%p159_p3, %s412_s13), 15  ;;  %vm178_vm1 = vcmask 1041408   ;;  %v169_v2 = vld [vmem:[%s524_s1 + $0x8] sm:$0xff]  ;;  %vm354_vm2 = vcmask 130048  }
   0xc   : > { %437 = vmatprep.mubr.msk.f32.mxu0 %vm171_vm0, %v168_v0  ;;  %s417_s16 = sshll.u32 %s528_s13, 1  ;;  %v257_v3 = vld [vmem:[%s525_s2] sm:$0x3]  ;;  %s428_s24 = sshll.u32 %s528_s13, 4 }
   0xd   : > { %s162_s19 = scalar_lea.vmem %s523_s0, %s417_s16  ;;  %440 = vmatprep.subr.msk.mxu1 %vm178_vm1, %v257_v3  ;;  %s167_s27 = scalar_lea.vmem %s526_s3, %s428_s24 }
   0xe   : > { %v170_v1 = vld [vmem:[%s162_s19] sm:$0x3]  ;;  %441 = vmatpush3.msk.msra.mxu1 %vm178_vm1, %v257_v3 }
   0xf   : > { %435 = vmatprep.subr.msk.mxu0 %vm178_vm1, %v170_v1 }
  0x10   : > { %436 = vmatpush3.msk.msra.mxu0 %vm178_vm1, %v170_v1 }
  0x11   : > { %438 = vmatmul.mubr.msk.f32.vlgmr.msra.gmra.mxu0 %vm171_vm0, %v169_v2 }
  0xd1   : > { %v439_v4 = vpop.f32.mrf.mxu0 }
  0xd3   : > { %v248_v5 = vpop.f32.mrf.mxu0 }
  0xd4   : > { %442 = vmatprep.mubr.msk.f32.mxu1 %vm171_vm0, %v248_v5 }
  0xd5   : > { %443 = vmatmul.mubr.msk.f32.vlgmr.msra.gmra.mxu1 %vm171_vm0, %v439_v4 }
 0x195   : > { %v444_v6 = vpop.f32.mrf.mxu1 }
 0x196   : > { %v343_v7 = vsub.f32 0.0, %v444_v6 }
 0x197   : > { %v333_v8 = vpop.f32.mrf.mxu1 }
 0x198   : > { %v346_v9 = vmul.f32 1.442695, %v343_v7  ;;  %v342_v10 = vsub.f32 0.0, %v333_v8 }
 0x19a   : > { %453 = vpow2.f32 %v346_v9  ;;  %v344_v11 = vmul.f32 1.442695, %v342_v10 }
 0x19c   : > { %455 = vpow2.f32 %v344_v11 }
 0x1a7   : > { %v454_v12 = vpop.eup %453 }
 0x1a8   : > { %v349_v13 = vadd.f32 1.0, %v454_v12 }
 0x1a9   : > { %v456_v14 = vpop.eup %455 }
 0x1aa   : > { %457 = vrcp.f32 %v349_v13  ;;  %v348_v15 = vadd.f32 1.0, %v456_v14 }
 0x1ac   : > { %459 = vrcp.f32 %v348_v15 }
 0x1b7   : > { %v458_v16 = vpop.eup %457 }
 0x1b8   : > { %356 = vst.msk [vmem:[%s167_s27 + $0x8] sm:$0xff] %vm354_vm2, %v458_v16 }
 0x1b9   : > { %v460_v17 = vpop.eup %459 }
 0x1ba   : > { %355 = vst.msk [vmem:[%s167_s27] sm:$0xff] %vm354_vm2, %v460_v17 }
 0x1bb PF: > { %s13_s12 = sadd.s32 1, %s467_s12  }
 0x1bc   : > { %p10_p4 = scmp.ge.s32.totalorder %s13_s12, 18  }
 0x1be   :  { %12 = sbr.rel (!%p10_p4) target bundleno = 1 (0x1), region = 62 }

// kernel: model_forward.5
= control target key start
LH: loop header
LB: loop body
LE: loop exit
PB: predicated region body
PF: predicated region fallthrough
CT: control target
= control target key end

     0   :  { %s3613_s25 = smov 0   ;;  %s4319_s0 = inlined_call_operand.vmem [shape: bf16[2,24,32], index: 0, kind: input, shape index: {}]   ;;  %s4320_s1 = inlined_call_operand.vmem [shape: f32[2,1,32], index: 1, kind: input, shape index: {}]   ;;  %s4321_s2 = inlined_call_operand.vmem [shape: f32[2,1,32], index: 2, kind: input, shape index: {}]   ;;  %s4322_s3 = inlined_call_operand.vmem [shape: bf16[2,32,96], index: 3, kind: input, shape index: {}]   ;;  %s4323_s4 = inlined_call_operand.vmem [shape: f32[2,1,96], index: 4, kind: input, shape index: {}]   ;;  %s4324_s5 = inlined_call_operand.vmem [shape: bf16[2,32,32], index: 5, kind: input, shape index: {}]   ;;  %s4325_s6 = inlined_call_operand.vmem [shape: f32[2,1,32], index: 6, kind: input, shape index: {}]   ;;  %s4326_s7 = inlined_call_operand.vmem [shape: f32[2,1,32], index: 7, kind: input, shape index: {}]   ;;  %s4327_s8 = inlined_call_operand.vmem [shape: f32[2,1,32], index: 8, kind: input, shape index: {}]   ;;  %s4328_s9 = inlined_call_operand.vmem [shape: bf16[2,32,64], index: 9, kind: input, shape index: {}]   ;;  %s4329_s10 = inlined_call_operand.vmem [shape: f32[2,1,64], index: 10, kind: input, shape index: {}]   ;;  %s4330_s11 = inlined_call_operand.vmem [shape: bf16[2,64,32], index: 11, kind: input, shape index: {}]   ;;  %s4331_s12 = inlined_call_operand.vmem [shape: f32[2,1,32], index: 12, kind: input, shape index: {}]   ;;  %s4332_s13 = inlined_call_operand.vmem [shape: bf16[2,24,32], index: 13, kind: output, shape index: {}]  }
   0x1   :  { %4335 = sst [smem:[#allocation5_spill]] %s4321_s2 }
   0x2   :  { %4336 = sst [smem:[#allocation6_spill]] %s4322_s3 }
   0x3   :  { %4337 = sst [smem:[#allocation7_spill]] %s4324_s5 }
   0x4 LB: > { %4338 = sst [smem:[#allocation3_spill]] %s3524_s25  ;;  %s2938_s26 = sadd.s32 4294967295, %s3524_s25   ;;  %s3524_s25 = sphi %s3613_s25, %s23_s25  }
   0x5   : > { %p2941_p0 = scmp.ge.s32.totalorder %s3524_s25, 1  ;;  %p476_p1 = scmp.lt.s32.totalorder %s3524_s25, 3 }
   0x7   : > { %p477_p2 = pnand %p2941_p0, %p476_p1 }
   0x9   : > { %480 = sbr.rel (%p477_p2) target bundleno = 3948 (0xf6c), region = 72 }
   0xe   : > { %p554_p3 = scmp.lt.s32.totalorder %s2938_s26, 1  ;;  %s4340_s3 = sld [smem:[#allocation6_spill]] }
   0xf   : > { %s4341_s5 = sld [smem:[#allocation7_spill]]  ;;  %p2950_p4 = scmp.ne.s32.totalorder %s2938_s26, 0 }
  0x10   : > { %s3621_s27 = scalar_select %p554_p3, %s2938_s26, 1 }
  0x12   : > { %s3021_s17 = sshll.u32 %s3621_s27, 4  ;;  %s578_s2 = scalar_lea.vmem %s4326_s7, %s3621_s27 }
  0x13   : > { %s581_s20 = scalar_lea.vmem %s4327_s8, %s3621_s27  ;;  %s597_s18 = scalar_lea.vmem %s4331_s12, %s3621_s27 }
  0x14   : > { %s3639_s23 = scalar_lea.vmem %s4340_s3, %s3021_s17  ;;  %s3661_s3 = scalar_lea.vmem %s4328_s9, %s3021_s17 }
  0x15   : > { %s3644_s29 = scalar_lea.vmem %s4341_s5, %s3021_s17  ;;  %s589_s5 = scalar_lea.vmem %s4329_s10, %s3621_s27 }
  0x16   : > { %4342 = sst [smem:[#allocation4_spill]] %s3644_s29  ;;  %s3024_s29 = sshll.u32 %s3621_s27, 5 }
  0x17   : > { %s3671_s14 = scalar_lea.vmem %s4330_s11, %s3024_s29  ;;  %602 = sbr.rel (%p2950_p4) target bundleno = 33 (0x21), region = 76 }
  0x1c   : > { %v603_v0 = vld [vmem:[%s4319_s0] sm:$0xf]  ;;  %vm609_vm0 = vcmask 257024   ;;  %v604_v1 = vld [vmem:[%s4319_s0 + $0x4] sm:$0xf] }
  0x1d   : > { %610 = vst.msk [vmem:[%s4332_s13] sm:$0xf] %vm609_vm0, %v603_v0  ;;  %611 = vst.msk [vmem:[%s4332_s13 + $0x4] sm:$0xf] %vm609_vm0, %v604_v1  ;;  %v605_v2 = vld [vmem:[%s4319_s0 + $0x8] sm:$0xf] }
  0x1e   : > { %v606_v3 = vld [vmem:[%s4319_s0 + $0xc] sm:$0xf]  ;;  %v607_v4 = vld [vmem:[%s4319_s0 + $0x10] sm:$0xf]  ;;  %612 = vst.msk [vmem:[%s4332_s13 + $0x8] sm:$0xf] %vm609_vm0, %v605_v2 }
  0x1f   : > { %613 = vst.msk [vmem:[%s4332_s13 + $0xc] sm:$0xf] %vm609_vm0, %v606_v3  ;;  %614 = vst.msk [vmem:[%s4332_s13 + $0x10] sm:$0xf] %vm609_vm0, %v607_v4  ;;  %v608_v5 = vld [vmem:[%s4319_s0 + $0x14] sm:$0xf] }
  0x20   : > { %615 = vst.msk [vmem:[%s4332_s13 + $0x14] sm:$0xf] %vm609_vm0, %v608_v5 }
  0x21 PF: > { %vm630_vm1 = vcmask 261120   ;;  %v3376_v33 = vld [vmem:[%s3639_s23 + $0x8] sm:$0xff]   ;;  %v3526_v34 = vmov 0.0   ;;  %v3377_v35 = vld [vmem:[%s3639_s23] sm:$0xff]   ;;  %vm3527_vm2 = vmmov 0   ;;  %s4343_s25 = scalar_lea.vmem %s4320_s1, %s3621_s27  ;;  %s4344_s16 = sld [smem:[#allocation5_spill]] }
  0x22   : > { %3131 = vmatprep.subr.bf16.mxu1 %v3526_v34  ;;  %3135 = vmatprep.mubr.msk.bf16.mxu1 %vm3527_vm2, %v3526_v34  ;;  %s4346_s17 = scalar_lea.vmem %s4323_s4, %s3621_s27  ;;  %vm852_vm3 = vcmask 64512   ;;  %s3528_s22 = smov 96   ;;  %vm991_vm5 = vcmask 195584   ;;  %vm1073_vm6 = vcmask 1043456   ;;  %vm1559_vm7 = vcmask 130112  }
  0x23   : > { %3132 = vmatpush3.bf16.msra.mxu1 %v3376_v33  ;;  %s3530_s24 = smov 64   ;;  %s3531_s28 = smov 88   ;;  %vm1932_vm8 = vcmask 195712   ;;  %vm2305_vm9 = vcmask 261312   ;;  %vm2696_vm10 = vcmask 523264   ;;  %vm2795_vm11 = vcmask 257024  }
  0x24   : > { %v3032_v6 = vld [vmem:[%s4332_s13] sm:$0xff]   ;;  %3133 = vmatprep.subr.bf16.mxu1 %v3526_v34  ;;  %s3532_s23 = smov 120   ;;  %s3533_s29 = smov 56  }
  0x25   : > { %v3719_v8 = vunpack.c.l.bf16 %v3032_v6  ;;  %v3721_v9 = vunpack.c.h.bf16 %v3032_v6  ;;  %s3535_s30 = smov 112   ;;  %s3536_s26 = smov 48  }
  0x26   : > { %v3043_v7 = vld [vmem:[%s4332_s13 + $0x8] sm:$0xff]   ;;  %s3539_s19 = smov 40   ;;  %s3540_s21 = smov 8  }
  0x27   : > { %v631_v10 = vsel %vm630_vm1, %v3719_v8, 0.0  ;;  %v656_v11 = vmul.f32 %v3719_v8, %v3719_v8  ;;  %v657_v12 = vmul.f32 %v3721_v9, %v3721_v9  ;;  %v634_v14 = vsel %vm630_vm1, %v3721_v9, 0.0  ;;  %v3044_v20 = vld [vmem:[%s4332_s13 + $0x10] sm:$0xff]   ;;  %3134 = vmatpush3.bf16.msra.mxu1 %v3377_v35  ;;  %s4345_s15 = scalar_lea.vmem %s4344_s16, %s3621_s27  ;;  %s3537_s16 = smov 72  }
  0x28   : > { %632 = vadd.xlane.f32.xlu0 %v631_v10  ;;  %v3732_v15 = vunpack.c.l.bf16 %v3043_v7  ;;  %v3735_v17 = vunpack.c.h.bf16 %v3043_v7  ;;  %v3749_v24 = vunpack.c.l.bf16 %v3044_v20  ;;  %v3752_v26 = vunpack.c.h.bf16 %v3044_v20 }
  0x29   : > { %v662_v13 = vsel %vm630_vm1, %v656_v11, 0.0  ;;  %v665_v16 = vsel %vm630_vm1, %v657_v12, 0.0 }
  0x2a   : > { %663 = vadd.xlane.f32.xlu1 %v662_v13  ;;  %v637_v18 = vsel %vm630_vm1, %v3732_v15, 0.0  ;;  %v658_v19 = vmul.f32 %v3732_v15, %v3732_v15  ;;  %v640_v21 = vsel %vm630_vm1, %v3735_v17, 0.0  ;;  %v659_v22 = vmul.f32 %v3735_v17, %v3735_v17 }
  0x2b   : > { %v643_v27 = vsel %vm630_vm1, %v3749_v24, 0.0  ;;  %v660_v28 = vmul.f32 %v3749_v24, %v3749_v24  ;;  %v646_v29 = vsel %vm630_vm1, %v3752_v26, 0.0  ;;  %v661_v30 = vmul.f32 %v3752_v26, %v3752_v26 }
  0x2c   : > { %635 = vadd.xlane.f32.xlu0 %v634_v14  ;;  %v668_v23 = vsel %vm630_vm1, %v658_v19, 0.0  ;;  %v671_v25 = vsel %vm630_vm1, %v659_v22, 0.0 }
  0x2d   : > { %v674_v31 = vsel %vm630_vm1, %v660_v28, 0.0  ;;  %v677_v32 = vsel %vm630_vm1, %v661_v30, 0.0  ;;  %v2952_v28 = vld [vmem:[%s4345_s15] ss:$0 sm:$0xff]  ;;  %s3538_s15 = smov 104  }
  0x2e   : > { %666 = vadd.xlane.f32.xlu1 %v665_v16 }
  0x30   : > { %638 = vadd.xlane.f32.xlu0 %v637_v18  ;;  %v2951_v18 = vld [vmem:[%s4343_s25] ss:$0 sm:$0xff]  ;;  %s3534_s25 = smov 80  }
  0x32   : > { %641 = vadd.xlane.f32.xlu1 %v640_v21 }
  0x34   : > { %669 = vadd.xlane.f32.xlu0 %v668_v23 }
  0x36   : > { %672 = vadd.xlane.f32.xlu1 %v671_v25 }
  0x38   : > { %644 = vadd.xlane.f32.xlu0 %v643_v27 }
  0x3a   : > { %647 = vadd.xlane.f32.xlu1 %v646_v29 }
  0x3c   : > { %675 = vadd.xlane.f32.xlu0 %v674_v31 }
  0x3e   : > { %678 = vadd.xlane.f32.xlu1 %v677_v32 }
  0xb1   : > { %v633_v36 = vpop.xlane.xlu0 %632 }
  0xb2   : > { %v650_v37 = vmul.f32 0.03125, %v633_v36 }
  0xb3   : > { %v664_v38 = vpop.xlane.xlu1 %663 }
  0xb4   : > { %v686_v39 = vmul.f32 %v650_v37, %v650_v37  ;;  %v680_v40 = vmul.f32 0.03125, %v664_v38  ;;  %v698_v6 = vsub.f32 %v3719_v8, %v650_v37 }
  0xb5   : > { %v636_v41 = vpop.xlane.xlu0 %635 }
  0xb6   : > { %v692_v42 = vsub.f32 %v680_v40, %v686_v39  ;;  %v651_v43 = vmul.f32 0.03125, %v636_v41 }
  0xb7   : > { %v667_v44 = vpop.xlane.xlu1 %666 }
  0xb8   : > { %v704_v45 = vadd.f32 1e-06, %v692_v42  ;;  %v687_v46 = vmul.f32 %v651_v43, %v651_v43  ;;  %v681_v47 = vmul.f32 0.03125, %v667_v44  ;;  %v699_v19 = vsub.f32 %v3721_v9, %v651_v43 }
  0xb9   : > { %v639_v48 = vpop.xlane.xlu0 %638 }
  0xba   : > { %3386 = vrsqrt.f32 %v704_v45  ;;  %v693_v49 = vsub.f32 %v681_v47, %v687_v46  ;;  %v652_v50 = vmul.f32 0.03125, %v639_v48 }
  0xbb   : > { %v642_v51 = vpop.xlane.xlu1 %641 }
  0xbc   : > { %v705_v52 = vadd.f32 1e-06, %v693_v49  ;;  %v688_v53 = vmul.f32 %v652_v50, %v652_v50  ;;  %v653_v54 = vmul.f32 0.03125, %v642_v51  ;;  %v700_v30 = vsub.f32 %v3732_v15, %v652_v50 }
  0xbd   : > { %v670_v55 = vpop.xlane.xlu0 %669 }
  0xbe   : > { %3388 = vrsqrt.f32 %v705_v52  ;;  %v682_v56 = vmul.f32 0.03125, %v670_v55  ;;  %v689_v58 = vmul.f32 %v653_v54, %v653_v54  ;;  %v701_v35 = vsub.f32 %v3735_v17, %v653_v54 }
  0xbf   : > { %v673_v57 = vpop.xlane.xlu1 %672 }
  0xc0   : > { %v694_v59 = vsub.f32 %v682_v56, %v688_v53  ;;  %v683_v60 = vmul.f32 0.03125, %v673_v57  ;;  %v2953_v57 = vld [vmem:[%s4346_s17] ss:$0 sm:$0xff]  ;;  %s3541_s17 = smov 16  }
  0xc1   : > { %v645_v61 = vpop.xlane.xlu0 %644 }
  0xc2   : > { %v706_v62 = vadd.f32 1e-06, %v694_v59  ;;  %v695_v63 = vsub.f32 %v683_v60, %v689_v58  ;;  %v654_v0 = vmul.f32 0.03125, %v645_v61 }
  0xc3   : > { %v648_v1 = vpop.xlane.xlu1 %647 }
  0xc4   : > { %3390 = vrsqrt.f32 %v706_v62  ;;  %v707_v2 = vadd.f32 1e-06, %v695_v63  ;;  %v655_v3 = vmul.f32 0.03125, %v648_v1  ;;  %v690_v4 = vmul.f32 %v654_v0, %v654_v0 }
  0xc5   : > { %v676_v5 = vpop.xlane.xlu0 %675  ;;  %v702_v41 = vsub.f32 %v3749_v24, %v654_v0 }
  0xc6   : > { %3392 = vrsqrt.f32 %v707_v2  ;;  %v691_v7 = vmul.f32 %v655_v3, %v655_v3  ;;  %v684_v10 = vmul.f32 0.03125, %v676_v5  ;;  %v703_v43 = vsub.f32 %v3752_v26, %v655_v3 }
  0xc7   : > { %v3387_v11 = vpop.eup %3386  ;;  %v679_v12 = vpop.xlane.xlu1 %678 }
  0xc8   : > { %v685_v13 = vmul.f32 0.03125, %v679_v12  ;;  %v696_v14 = vsub.f32 %v684_v10, %v690_v4  ;;  %v716_v16 = vmul.f32 %v3387_v11, %v698_v6 }
  0xca   : > { %v697_v20 = vsub.f32 %v685_v13, %v691_v7  ;;  %v708_v21 = vadd.f32 1e-06, %v696_v14  ;;  %v728_v27 = vmul.f32 %v2951_v18, %v716_v16 }
  0xcb   : > { %v3389_v22 = vpop.eup %3388 }
  0xcc   : > { %v709_v23 = vadd.f32 1e-06, %v697_v20  ;;  %3394 = vrsqrt.f32 %v708_v21  ;;  %v717_v25 = vmul.f32 %v3389_v22, %v699_v19  ;;  %v740_v31 = vadd.f32 %v2952_v28, %v728_v27 }
  0xce   : > { %3396 = vrsqrt.f32 %v709_v23  ;;  %v729_v29 = vmul.f32 %v2951_v18, %v717_v25 }
  0xd0   : > { %v741_v32 = vadd.f32 %v2952_v28, %v729_v29  ;;  %v838_v29 = vlaneseq }
  0xd1   : > { %v3391_v33 = vpop.eup %3390 }
  0xd2   : > { %v746_v36 = vpack.c.bf16 %v741_v32, %v740_v31  ;;  %v718_v37 = vmul.f32 %v3391_v33, %v700_v30  ;;  %v839_v30 = vand.u32 127, %v838_v29 }
  0xd3   : > { %v3393_v38 = vpop.eup %3392 }
  0xd4   : > { %3136 = vmatmul.mubr.msk.bf16.vlgmr.msra.gmra.mxu1 %vm630_vm1, %v746_v36  ;;  %v719_v39 = vmul.f32 %v3393_v38, %v701_v35  ;;  %v730_v40 = vmul.f32 %v2951_v18, %v718_v37  ;;  %vm840_vm4 = vcmp.lt.s32.totalorder %v839_v30, 17  ;;  %v3529_v37 = vmov -1e+09  }
  0xd5   : > { %3139 = vmatprep.mubr.msk.bf16.mxu1 %vm3527_vm2, %v3526_v34  ;;  %v3826_v38 = vsel %vm840_vm4, 0.0, %v3529_v37 }
  0xd6   : > { %v731_v42 = vmul.f32 %v2951_v18, %v719_v39  ;;  %v742_v44 = vadd.f32 %v2952_v28, %v730_v40 }
  0xd8   : > { %v743_v45 = vadd.f32 %v2952_v28, %v731_v42 }
  0xd9   : > { %v3395_v46 = vpop.eup %3394 }
  0xda   : > { %v747_v47 = vpack.c.bf16 %v743_v45, %v742_v44  ;;  %v720_v48 = vmul.f32 %v3395_v46, %v702_v41 }
  0xdb   : > { %v3397_v49 = vpop.eup %3396 }
  0xdc   : > { %3140 = vmatmul.mubr.msk.bf16.gmra.mxu1 %vm630_vm1, %v747_v47  ;;  %v721_v50 = vmul.f32 %v3397_v49, %v703_v43  ;;  %v732_v51 = vmul.f32 %v2951_v18, %v720_v48 }
  0xdd   : > { %3143 = vmatprep.mubr.msk.bf16.mxu1 %vm3527_vm2, %v3526_v34 }
  0xde   : > { %v733_v52 = vmul.f32 %v2951_v18, %v721_v50  ;;  %v744_v53 = vadd.f32 %v2952_v28, %v732_v51 }
  0xe0   : > { %v745_v54 = vadd.f32 %v2952_v28, %v733_v52 }
  0xe2   : > { %v748_v55 = vpack.c.bf16 %v745_v54, %v744_v53 }
  0xe4   : > { %3144 = vmatmul.mubr.msk.bf16.gmra.mxu1 %vm630_vm1, %v748_v55 }
 0x194   : > { %v815_v56 = vpop.f32.mrf.mxu1 }
 0x195   : > { %v816_v60 = vadd.f32 %v2953_v57, %v815_v56 }
 0x196   : > { %v3137_v58 = vpop.f32.mrf.mxu1 }
 0x198   : > { %v818_v59 = vpop.f32.mrf.mxu1 }
 0x199   : > { %v819_v61 = vadd.f32 %v2953_v57, %v818_v59 }
 0x19a   : > { %v3138_v62 = vpop.f32.mrf.mxu1 }
 0x19b   : > { %v3798_v63 = vpack.c.bf16 %v819_v61, %v816_v60 }
 0x19c   : > { %v823_v0 = vpop.f32.mrf.mxu1 }
 0x19d   : > { %v824_v1 = vadd.f32 %v2953_v57, %v823_v0  ;;  %848 = vrot.lane.b32.xlu1 %v3798_v63, %s3528_s22  ;;  %3151 = vmatprep.mubr.msk.bf16.mxu1 %vm852_vm3, %v3798_v63 }
 0x19e   : > { %v3141_v2 = vpop.f32.mrf.mxu1 }
 0x19f   : > { %v3803_v3 = vpack.c.bf16 %v824_v1, %v824_v1 }
 0x1a0   : > { %v826_v4 = vpop.f32.mrf.mxu1 }
 0x1a1   : > { %850 = vrot.lane.b32.xlu0 %v3803_v3, %s3528_s22  ;;  %v827_v7 = vadd.f32 %v2953_v57, %v826_v4 }
 0x1a2   : > { %v3142_v5 = vpop.f32.mrf.mxu1 }
 0x1a4   : > { %v831_v6 = vpop.f32.mrf.mxu1 }
 0x1a5   : > { %v832_v10 = vadd.f32 %v2953_v57, %v831_v6 }
 0x1a6   : > { %v3145_v11 = vpop.f32.mrf.mxu1 }
 0x1a7   : > { %v3806_v12 = vpack.c.bf16 %v832_v10, %v827_v7 }
 0x1a8   : > { %v834_v13 = vpop.f32.mrf.mxu1 }
 0x1a9   : > { %v835_v14 = vadd.f32 %v2953_v57, %v834_v13  ;;  %3159 = vmatprep.mubr.msk.bf16.mxu0 %vm852_vm3, %v3806_v12 }
 0x1aa   : > { %v3146_v16 = vpop.f32.mrf.mxu1 }
 0x1ab   : > { %v3810_v18 = vpack.c.bf16 %v835_v14, %v835_v14 }
 0x1ad   : > { %917 = vrot.lane.b32.xlu1 %v3810_v18, %s3528_s22 }
 0x1b1   : > { %915 = vrot.lane.b32.xlu1 %v3806_v12, %s3528_s22  ;;  %s4347_s22 = sld [smem:[#allocation4_spill]] }
 0x20f   : > { %v849_v21 = vpop.permute.xlu1 %848 }
 0x210   : > { %v860_v22 = vsel %vm852_vm3, %v849_v21, 0 }
 0x213   : > { %v851_v19 = vpop.permute.xlu0 %850 }
 0x214   : > { %3327 = vmatprep.subr.msk.bf16.mxu1 %vm852_vm3, %v851_v19  ;;  %v863_v20 = vsel %vm852_vm3, %v851_v19, 0 }
 0x215   : > { %3148 = vmatpush3.bf16.xpose.msra.mxu1 %v863_v20 }
 0x216   : > { %3328 = vmatprep.subr.msk.bf16.mxu1 %vm852_vm3, %v849_v21 }
 0x21d   : > { %3150 = vmatpush3.bf16.xpose.msra.mxu1 %v860_v22 }
 0x21f   : > { %v918_v23 = vpop.permute.xlu1 %917 }
 0x220   : > { %3329 = vmatprep.subr.msk.bf16.mxu0 %vm852_vm3, %v918_v23  ;;  %v929_v25 = vsel %vm852_vm3, %v918_v23, 0 }
 0x221   : > { %3156 = vmatpush3.bf16.xpose.msra.mxu0 %v929_v25 }
 0x223   : > { %v916_v27 = vpop.permute.xlu1 %915 }
 0x224   : > { %3152 = vmatmul.mubr.msk.bf16.vlgmr.msra.gmra.mxu1 %vm852_vm3, %v3803_v3  ;;  %3330 = vmatprep.subr.msk.bf16.mxu0 %vm852_vm3, %v916_v27  ;;  %v926_v28 = vsel %vm852_vm3, %v916_v27, 0 }
 0x229   : > { %3158 = vmatpush3.bf16.xpose.msra.mxu0 %v926_v28 }
 0x230   : > { %3160 = vmatmul.mubr.msk.bf16.vlgmr.msra.gmra.mxu0 %vm852_vm3, %v3810_v18 }
 0x2e4   : > { %v3153_v31 = vpop.f32.mrf.mxu1 }
 0x2e5   : > { %v981_v33 = vmul.f32 0.35355338, %v3153_v31 }
 0x2e6   : > { %v899_v32 = vpop.f32.mrf.mxu1 }
 0x2e7   : > { %v979_v35 = vmul.f32 0.35355338, %v899_v32  ;;  %v987_v43 = vadd.f32 %v981_v33, %v3826_v38 }
 0x2e8   : > { %v3154_v36 = vpop.f32.mrf.mxu1 }
 0x2e9   : > { %v985_v39 = vadd.f32 %v979_v35, %v3826_v38  ;;  %v998_v45 = vsel %vm991_vm5, %v987_v43, -inf }
 0x2ea   : > { %v902_v40 = vpop.f32.mrf.mxu1 }
 0x2eb   : > { %v980_v41 = vmul.f32 0.35355338, %v902_v40  ;;  %v992_v42 = vsel %vm991_vm5, %v985_v39, -inf }
 0x2ec   : > { %993 = vmax.xlane.f32.xlu0 %v992_v42 }
 0x2ed   : > { %v986_v44 = vadd.f32 %v980_v41, %v3826_v38 }
 0x2ef   : > { %v995_v46 = vsel %vm991_vm5, %v986_v44, -inf }
 0x2f0   : > { %v3161_v47 = vpop.f32.mrf.mxu0  ;;  %999 = vmax.xlane.f32.xlu0 %v998_v45  ;;  %996 = vmax.xlane.f32.xlu1 %v995_v46 }
 0x2f1   : > { %v984_v48 = vmul.f32 0.35355338, %v3161_v47 }
 0x2f2   : > { %v965_v49 = vpop.f32.mrf.mxu0 }
 0x2f3   : > { %v982_v50 = vmul.f32 0.35355338, %v965_v49  ;;  %v990_v51 = vadd.f32 %v984_v48, %v3826_v38 }
 0x2f4   : > { %v3162_v52 = vpop.f32.mrf.mxu0 }
 0x2f5   : > { %v1007_v53 = vsel %vm991_vm5, %v990_v51, -inf  ;;  %v988_v54 = vadd.f32 %v982_v50, %v3826_v38 }
 0x2f6   : > { %v968_v55 = vpop.f32.mrf.mxu0  ;;  %1008 = vmax.xlane.f32.xlu1 %v1007_v53 }
 0x2f7   : > { %v983_v56 = vmul.f32 0.35355338, %v968_v55  ;;  %v1001_v57 = vsel %vm991_vm5, %v988_v54, -inf }
 0x2f8   : > { %1002 = vmax.xlane.f32.xlu0 %v1001_v57 }
 0x2f9   : > { %v3839_v58 = vadd.f32 %v983_v56, %v3826_v38 }
 0x2fb   : > { %v1004_v59 = vsel %vm991_vm5, %v3839_v58, -inf }
 0x2fc   : > { %1005 = vmax.xlane.f32.xlu0 %v1004_v59 }
 0x307   : > { %1062 = vrot.lane.b32.xlu1 %v3798_v63, %s3530_s24 }
 0x30b   : > { %1199 = vrot.lane.b32.xlu1 %v3803_v3, %s3531_s28 }
 0x30f   : > { %1127 = vrot.lane.b32.xlu1 %v3810_v18, %s3530_s24 }
 0x312   : > { %1064 = vrot.lane.b32.xlu0 %v3803_v3, %s3530_s24 }
 0x313   : > { %1197 = vrot.lane.b32.xlu1 %v3798_v63, %s3531_s28 }
 0x375   : > { %v994_v60 = vpop.xlane.xlu0 %993 }
 0x376   : > { %v1010_v61 = vsub.f32 %v985_v39, %v994_v60 }
 0x378   : > { %v1016_v4 = vmul.f32 1.442695, %v1010_v61 }
 0x379   : > { %v1000_v62 = vpop.xlane.xlu0 %999  ;;  %v997_v0 = vpop.xlane.xlu1 %996 }
 0x37a   : > { %v1012_v1 = vsub.f32 %v987_v43, %v1000_v62  ;;  %v1011_v2 = vsub.f32 %v986_v44, %v997_v0 }
 0x37c   : > { %v1020_v5 = vmul.f32 1.442695, %v1012_v1  ;;  %v1018_v6 = vmul.f32 1.442695, %v1011_v2 }
 0x37e   : > { %3398 = vpow2.f32 %v1020_v5 }
 0x37f   : > { %3400 = vpow2.f32 %v1018_v6  ;;  %v1009_v7 = vpop.xlane.xlu1 %1008 }
 0x380   : > { %3402 = vpow2.f32 %v1016_v4  ;;  %v1015_v10 = vsub.f32 %v990_v51, %v1009_v7 }
 0x381   : > { %v1003_v11 = vpop.xlane.xlu0 %1002 }
 0x382   : > { %v1026_v13 = vmul.f32 1.442695, %v1015_v10  ;;  %v1013_v14 = vsub.f32 %v988_v54, %v1003_v11 }
 0x383   : > { %v1063_v16 = vpop.permute.xlu1 %1062 }
 0x384   : > { %3404 = vpow2.f32 %v1026_v13  ;;  %v1022_v19 = vmul.f32 1.442695, %v1013_v14 }
 0x385   : > { %v1006_v20 = vpop.xlane.xlu0 %1005 }
 0x386   : > { %3406 = vpow2.f32 %v1022_v19  ;;  %v1014_v42 = vsub.f32 %v3839_v58, %v1006_v20 }
 0x387   : > { %v1200_v21 = vpop.permute.xlu1 %1199 }
 0x388   : > { %3333 = vmatprep.subr.msk.bf16.mxu0 %vm852_vm3, %v1200_v21  ;;  %v1211_v22 = vsel %vm852_vm3, %v1200_v21, 0  ;;  %v1024_v43 = vmul.f32 1.442695, %v1014_v42 }
 0x389   : > { %v1065_v23 = vpop.permute.xlu0 %1064  ;;  %3180 = vmatpush3.bf16.xpose.msra.mxu0 %v1211_v22 }
 0x38a   : > { %3331 = vmatprep.subr.msk.bf16.mxu1 %vm1073_vm6, %v1065_v23  ;;  %v1075_v25 = vsel %vm1073_vm6, %v1065_v23, 0  ;;  %3408 = vpow2.f32 %v1024_v43 }
 0x38b   : > { %v3399_v27 = vpop.eup %3398  ;;  %3164 = vmatpush3.bf16.msra.mxu1 %v1075_v25  ;;  %v1128_v28 = vpop.permute.xlu1 %1127 }
 0x38c   : > { %v3401_v29 = vpop.eup %3400  ;;  %3165 = vmatprep.subr.bf16.mxu1 %v1063_v16  ;;  %v1034_v30 = vsel %vm991_vm5, %v3399_v27, 0.0  ;;  %v1137_v60 = vsel %vm1073_vm6, %v1128_v28, 0 }
 0x38d   : > { %v3403_v31 = vpop.eup %3402  ;;  %1035 = vadd.xlane.f32.xlu0 %v1034_v30  ;;  %v1031_v32 = vsel %vm991_vm5, %v3401_v29, 0.0 }
 0x38e   : > { %1032 = vadd.xlane.f32.xlu1 %v1031_v32  ;;  %v1028_v35 = vsel %vm991_vm5, %v3403_v31, 0.0 }
 0x38f   : > { %3166 = vmatpush3.bf16.msra.mxu1 %v1063_v16  ;;  %v1198_v33 = vpop.permute.xlu1 %1197 }
 0x390   : > { %3332 = vmatprep.subr.msk.bf16.mxu1 %vm1073_vm6, %v1128_v28  ;;  %3334 = vmatprep.subr.msk.bf16.mxu0 %vm852_vm3, %v1198_v33  ;;  %v1208_v36 = vsel %vm852_vm3, %v1198_v33, 0 }
 0x391   : > { %v3405_v37 = vpop.eup %3404  ;;  %1029 = vadd.xlane.f32.xlu0 %v1028_v35  ;;  %3182 = vmatpush3.bf16.xpose.msra.mxu0 %v1208_v36 }
 0x392   : > { %v1043_v39 = vsel %vm991_vm5, %v3405_v37, 0.0 }
 0x393   : > { %v3407_v40 = vpop.eup %3406  ;;  %1044 = vadd.xlane.f32.xlu1 %v1043_v39 }
 0x394   : > { %v1037_v41 = vsel %vm991_vm5, %v3407_v40, 0.0 }
 0x397   : > { %1038 = vadd.xlane.f32.xlu1 %v1037_v41  ;;  %v3409_v44 = vpop.eup %3408 }
 0x398   : > { %v1040_v45 = vsel %vm991_vm5, %v3409_v44, 0.0 }
 0x3a7   : > { %1125 = vrot.lane.b32.xlu0 %v3806_v12, %s3530_s24  ;;  %s3542_s24 = smov 24  }
 0x3a8   : > { %1193 = vrot.lane.b32.xlu1 %v3798_v63, %s3532_s23 }
 0x3ac   : > { %1265 = vrot.lane.b32.xlu1 %v3806_v12, %s3531_s28 }
 0x3b0   : > { %1263 = vrot.lane.b32.xlu1 %v3810_v18, %s3532_s23 }
 0x3c6   : > { %1041 = vadd.xlane.f32.xlu0 %v1040_v45 }
 0x3dc   : > { %1267 = vrot.lane.b32.xlu0 %v3810_v18, %s3531_s28 }
 0x3e0   : > { %1195 = vrot.lane.b32.xlu0 %v3803_v3, %s3532_s23 }
 0x3e4   : > { %1261 = vrot.lane.b32.xlu0 %v3806_v12, %s3532_s23 }
 0x416   : > { %v1036_v46 = vpop.xlane.xlu0 %1035 }
 0x417   : > { %v1033_v47 = vpop.xlane.xlu1 %1032  ;;  %3410 = vrcp.f32 %v1036_v46 }
 0x418   : > { %3412 = vrcp.f32 %v1033_v47 }
 0x41a   : > { %v1030_v48 = vpop.xlane.xlu0 %1029 }
 0x41b   : > { %3414 = vrcp.f32 %v1030_v48 }
 0x41c   : > { %v1045_v49 = vpop.xlane.xlu1 %1044 }
 0x41d   : > { %3416 = vrcp.f32 %v1045_v49 }
 0x41e   : > { %v1126_v61 = vpop.permute.xlu0 %1125 }
 0x420   : > { %v1039_v50 = vpop.xlane.xlu1 %1038 }
 0x421   : > { %3418 = vrcp.f32 %v1039_v50 }
 0x424   : > { %v1194_v51 = vpop.permute.xlu1 %1193  ;;  %v3411_v52 = vpop.eup %3410 }
 0x425   : > { %3183 = vmatprep.mubr.msk.bf16.mxu0 %vm852_vm3, %v1194_v51  ;;  %v3413_v53 = vpop.eup %3412  ;;  %v1051_v55 = vmul.f32 %v3411_v52, %v3399_v27 }
 0x426   : > { %v1049_v57 = vmul.f32 %v3413_v53, %v3401_v29 }
 0x427   : > { %v1059_v59 = vpack.c.bf16 %v1051_v55, %v1051_v55 }
 0x428   : > { %v3415_v54 = vpop.eup %3414  ;;  %v1266_v19 = vpop.permute.xlu1 %1265 }
 0x429   : > { %v1047_v56 = vmul.f32 %v3415_v54, %v3403_v31  ;;  %v1276_v20 = vsel %vm852_vm3, %v1266_v19, 0 }
 0x42a   : > { %v3417_v2 = vpop.eup %3416 }
 0x42b   : > { %v1058_v58 = vpack.c.bf16 %v1049_v57, %v1047_v56  ;;  %v1057_v6 = vmul.f32 %v3417_v2, %v3405_v37 }
 0x42c   : > { %v1264_v21 = vpop.permute.xlu1 %1263 }
 0x42d   : > { %3167 = vmatprep.mubr.msk.bf16.mxu1 %vm991_vm5, %v1058_v58  ;;  %v1061_v13 = vpack.c.bf16 %v1057_v6, %v1057_v6 }
 0x42e   : > { %3168 = vmatmul.mubr.msk.bf16.vlgmr.msra.gmra.mxu1 %vm991_vm5, %v1059_v59  ;;  %v3419_v4 = vpop.eup %3418 }
 0x42f   : > { %3172 = vmatpush3.bf16.msra.mxu1 %v1137_v60  ;;  %v1053_v7 = vmul.f32 %v3419_v4, %v3407_v40 }
 0x430   : > { %3173 = vmatprep.subr.bf16.mxu1 %v1126_v61 }
 0x433   : > { %3174 = vmatpush3.bf16.msra.mxu1 %v1126_v61 }
 0x44f   : > { %v1042_v62 = vpop.xlane.xlu0 %1041 }
 0x450   : > { %3420 = vrcp.f32 %v1042_v62 }
 0x453   : > { %v1268_v0 = vpop.permute.xlu0 %1267 }
 0x454   : > { %3335 = vmatprep.subr.msk.bf16.mxu1 %vm852_vm3, %v1268_v0  ;;  %v1279_v16 = vsel %vm852_vm3, %v1268_v0, 0 }
 0x457   : > { %v1196_v1 = vpop.permute.xlu0 %1195 }
 0x458   : > { %3184 = vmatmul.mubr.msk.bf16.vlgmr.msra.gmra.mxu0 %vm852_vm3, %v1196_v1 }
 0x45b   : > { %v1262_v14 = vpop.permute.xlu0 %1261 }
 0x45d   : > { %v3421_v5 = vpop.eup %3420 }
 0x45e   : > { %v1055_v10 = vmul.f32 %v3421_v5, %v3409_v44 }
 0x460   : > { %v1060_v11 = vpack.c.bf16 %v1055_v10, %v1053_v7 }
 0x462   : > { %3175 = vmatprep.mubr.msk.bf16.mxu1 %vm991_vm5, %v1060_v11 }
 0x463   : > { %3176 = vmatmul.mubr.msk.bf16.vlgmr.msra.gmra.mxu1 %vm991_vm5, %v1061_v13 }
 0x464   : > { %3188 = vmatpush3.bf16.xpose.msra.mxu1 %v1279_v16  ;;  %3191 = vmatprep.mubr.msk.bf16.mxu1 %vm852_vm3, %v1262_v14 }
 0x465   : > { %3336 = vmatprep.subr.msk.bf16.mxu1 %vm852_vm3, %v1266_v19 }
 0x46c   : > { %3190 = vmatpush3.bf16.xpose.msra.mxu1 %v1276_v20 }
 0x473   : > { %3192 = vmatmul.mubr.msk.bf16.vlgmr.msra.gmra.mxu1 %vm852_vm3, %v1264_v21 }
 0x4ee   : > { %v3169_v22 = vpop.f32.mrf.mxu1 }
 0x4ef   : > { %1189 = vst.msk [vmem:[#allocation2 + $0x10] sm:$0xff] %vm852_vm3, %v3169_v22 }
 0x4f0   : > { %v1111_v23 = vpop.f32.mrf.mxu1 }
 0x4f1   : > { %1187 = vst.msk [vmem:[#allocation2] sm:$0xff] %vm852_vm3, %v1111_v23 }
 0x4f2   : > { %v3170_v25 = vpop.f32.mrf.mxu1 }
 0x4f4   : > { %v1114_v27 = vpop.f32.mrf.mxu1 }
 0x4f5   : > { %1188 = vst.msk [vmem:[#allocation2 + $0x8] sm:$0xff] %vm852_vm3, %v1114_v27 }
 0x518   : > { %v3185_v28 = vpop.f32.mrf.mxu0 }
 0x519   : > { %v1331_v30 = vmul.f32 0.35355338, %v3185_v28 }
 0x51a   : > { %v1247_v29 = vpop.f32.mrf.mxu0 }
 0x51b   : > { %v1329_v31 = vmul.f32 0.35355338, %v1247_v29  ;;  %v1337_v39 = vadd.f32 %v1331_v30, %v3826_v38 }
 0x51c   : > { %v3186_v32 = vpop.f32.mrf.mxu0 }
 0x51d   : > { %v1335_v33 = vadd.f32 %v1329_v31, %v3826_v38  ;;  %v1347_v42 = vsel %vm991_vm5, %v1337_v39, -inf }
 0x51e   : > { %v1250_v35 = vpop.f32.mrf.mxu0 }
 0x51f   : > { %v1330_v36 = vmul.f32 0.35355338, %v1250_v35  ;;  %v1341_v37 = vsel %vm991_vm5, %v1335_v33, -inf }
 0x520   : > { %1342 = vmax.xlane.f32.xlu0 %v1341_v37 }
 0x521   : > { %v1336_v40 = vadd.f32 %v1330_v36, %v3826_v38 }
 0x523   : > { %v3177_v41 = vpop.f32.mrf.mxu1  ;;  %v1344_v43 = vsel %vm991_vm5, %v1336_v40, -inf }
 0x524   : > { %1192 = vst.msk [vmem:[#allocation2 + $0x28] sm:$0xff] %vm852_vm3, %v3177_v41  ;;  %1348 = vmax.xlane.f32.xlu0 %v1347_v42  ;;  %1345 = vmax.xlane.f32.xlu1 %v1344_v43 }
 0x525   : > { %v1173_v44 = vpop.f32.mrf.mxu1 }
 0x526   : > { %1190 = vst.msk [vmem:[#allocation2 + $0x18] sm:$0xff] %vm852_vm3, %v1173_v44 }
 0x527   : > { %v3178_v45 = vpop.f32.mrf.mxu1 }
 0x529   : > { %v1176_v46 = vpop.f32.mrf.mxu1 }
 0x52a   : > { %1191 = vst.msk [vmem:[#allocation2 + $0x20] sm:$0xff] %vm852_vm3, %v1176_v46 }
 0x533   : > { %v3193_v47 = vpop.f32.mrf.mxu1 }
 0x534   : > { %v1334_v48 = vmul.f32 0.35355338, %v3193_v47 }
 0x535   : > { %v1315_v49 = vpop.f32.mrf.mxu1 }
 0x536   : > { %v1332_v50 = vmul.f32 0.35355338, %v1315_v49  ;;  %v1340_v51 = vadd.f32 %v1334_v48, %v3826_v38 }
 0x537   : > { %v3194_v52 = vpop.f32.mrf.mxu1 }
 0x538   : > { %v1356_v53 = vsel %vm991_vm5, %v1340_v51, -inf  ;;  %v1338_v54 = vadd.f32 %v1332_v50, %v3826_v38 }
 0x539   : > { %1357 = vmax.xlane.f32.xlu1 %v1356_v53  ;;  %v1318_v55 = vpop.f32.mrf.mxu1 }
 0x53a   : > { %v1333_v56 = vmul.f32 0.35355338, %v1318_v55  ;;  %v1350_v57 = vsel %vm991_vm5, %v1338_v54, -inf }
 0x53b   : > { %1351 = vmax.xlane.f32.xlu0 %v1350_v57 }
 0x53c   : > { %v1339_v58 = vadd.f32 %v1333_v56, %v3826_v38 }
 0x53e   : > { %v1353_v59 = vsel %vm991_vm5, %v1339_v58, -inf }
 0x53f   : > { %1354 = vmax.xlane.f32.xlu0 %v1353_v59 }
 0x5a9   : > { %v1343_v60 = vpop.xlane.xlu0 %1342 }
 0x5aa   : > { %v1359_v61 = vsub.f32 %v1335_v33, %v1343_v60 }
 0x5ac   : > { %v1365_v62 = vmul.f32 1.442695, %v1359_v61 }
 0x5ad   : > { %v1349_v0 = vpop.xlane.xlu0 %1348  ;;  %v1346_v1 = vpop.xlane.xlu1 %1345 }
 0x5ae   : > { %3422 = vpow2.f32 %v1365_v62  ;;  %v1361_v2 = vsub.f32 %v1337_v39, %v1349_v0  ;;  %v1360_v4 = vsub.f32 %v1336_v40, %v1346_v1 }
 0x5b0   : > { %v1369_v5 = vmul.f32 1.442695, %v1361_v2  ;;  %v1367_v6 = vmul.f32 1.442695, %v1360_v4 }
 0x5b2   : > { %3424 = vpow2.f32 %v1369_v5 }
 0x5b3   : > { %3426 = vpow2.f32 %v1367_v6 }
 0x5bb   : > { %v3908_v7 = vpop.eup %3422 }
 0x5bc   : > { %v1377_v10 = vsel %vm991_vm5, %v3908_v7, 0.0 }
 0x5bd   : > { %1378 = vadd.xlane.f32.xlu0 %v1377_v10 }
 0x5bf   : > { %v3912_v11 = vpop.eup %3424 }
 0x5c0   : > { %v3914_v13 = vpop.eup %3426  ;;  %v1383_v14 = vsel %vm991_vm5, %v3912_v11, 0.0 }
 0x5c1   : > { %1384 = vadd.xlane.f32.xlu0 %v1383_v14  ;;  %v1380_v16 = vsel %vm991_vm5, %v3914_v13, 0.0 }
 0x5c2   : > { %1381 = vadd.xlane.f32.xlu1 %v1380_v16  ;;  %v1358_v23 = vpop.xlane.xlu1 %1357 }
 0x5c3   : > { %v1364_v25 = vsub.f32 %v1340_v51, %v1358_v23 }
 0x5c4   : > { %v1352_v19 = vpop.xlane.xlu0 %1351 }
 0x5c5   : > { %v1375_v27 = vmul.f32 1.442695, %v1364_v25  ;;  %v1362_v28 = vsub.f32 %v1338_v54, %v1352_v19 }
 0x5c7   : > { %v1371_v29 = vmul.f32 1.442695, %v1362_v28 }
 0x5c8   : > { %v1355_v20 = vpop.xlane.xlu0 %1354 }
 0x5c9   : > { %v1363_v21 = vsub.f32 %v1339_v58, %v1355_v20 }
 0x5cb   : > { %v1373_v22 = vmul.f32 1.442695, %v1363_v21 }
 0x5cd   : > { %3428 = vpow2.f32 %v1373_v22 }
 0x5ce   : > { %3430 = vpow2.f32 %v1375_v27 }
 0x5cf   : > { %3432 = vpow2.f32 %v1371_v29 }
 0x5d3   : > { %1411 = vrot.lane.b32.xlu1 %v3798_v63, %s3533_s29 }
 0x5d7   : > { %1572 = vrot.lane.b32.xlu1 %v3803_v3, %s3534_s25  ;;  %1413 = vrot.lane.b32.xlu0 %v3803_v3, %s3533_s29 }
 0x5da   : > { %v3928_v30 = vpop.eup %3428 }
 0x5db   : > { %1475 = vrot.lane.b32.xlu1 %v3810_v18, %s3533_s29  ;;  %1473 = vrot.lane.b32.xlu0 %v3806_v12, %s3533_s29  ;;  %v1389_v31 = vsel %vm991_vm5, %v3928_v30, 0.0  ;;  %v3932_v32 = vpop.eup %3430  ;;  %s4348_s29 = scalar_lea.vmem %s4325_s6, %s3621_s27 }
 0x5dc   : > { %v1392_v33 = vsel %vm991_vm5, %v3932_v32, 0.0  ;;  %v3936_v35 = vpop.eup %3432 }
 0x5dd   : > { %v1386_v36 = vsel %vm991_vm5, %v3936_v35, 0.0 }
 0x5df   : > { %1570 = vrot.lane.b32.xlu1 %v3798_v63, %s3534_s25 }
 0x5fa   : > { %1390 = vadd.xlane.f32.xlu0 %v1389_v31 }
 0x603   : > { %1393 = vadd.xlane.f32.xlu1 %v1392_v33 }
 0x607   : > { %1387 = vadd.xlane.f32.xlu1 %v1386_v36 }
 0x610   : > { %1640 = vrot.lane.b32.xlu0 %v3810_v18, %s3534_s25 }
 0x614   : > { %1568 = vrot.lane.b32.xlu0 %v3803_v3, %s3535_s30 }
 0x618   : > { %1566 = vrot.lane.b32.xlu1 %v3798_v63, %s3535_s30  ;;  %1634 = vrot.lane.b32.xlu0 %v3806_v12, %s3535_s30 }
 0x61c   : > { %1638 = vrot.lane.b32.xlu1 %v3806_v12, %s3534_s25 }
 0x620   : > { %1636 = vrot.lane.b32.xlu1 %v3810_v18, %s3535_s30 }
 0x646   : > { %v1379_v37 = vpop.xlane.xlu0 %1378 }
 0x647   : > { %3434 = vrcp.f32 %v1379_v37 }
 0x64a   : > { %v1385_v39 = vpop.xlane.xlu0 %1384 }
 0x64b   : > { %3436 = vrcp.f32 %v1385_v39  ;;  %v1382_v40 = vpop.xlane.xlu1 %1381 }
 0x64c   : > { %3438 = vrcp.f32 %v1382_v40 }
 0x64e   : > { %v1414_v41 = vpop.permute.xlu0 %1413 }
 0x64f   : > { %v1423_v42 = vsel %vm1073_vm6, %v1414_v41, 0  ;;  %v1412_v43 = vpop.permute.xlu1 %1411  ;;  %3337 = vmatprep.subr.msk.bf16.mxu0 %vm1073_vm6, %v1414_v41 }
 0x650   : > { %3196 = vmatpush3.bf16.msra.mxu0 %v1423_v42 }
 0x651   : > { %3197 = vmatprep.subr.bf16.mxu0 %v1412_v43 }
 0x652   : > { %v1474_v50 = vpop.permute.xlu0 %1473 }
 0x653   : > { %v1573_v44 = vpop.permute.xlu1 %1572 }
 0x654   : > { %3198 = vmatpush3.bf16.msra.mxu0 %v1412_v43  ;;  %v3435_v45 = vpop.eup %3434  ;;  %v1584_v56 = vsel %vm852_vm3, %v1573_v44, 0 }
 0x655   : > { %3339 = vmatprep.subr.msk.bf16.mxu0 %vm852_vm3, %v1573_v44  ;;  %v1396_v52 = vmul.f32 %v3435_v45, %v3908_v7 }
 0x657   : > { %v1476_v46 = vpop.permute.xlu1 %1475 }
 0x658   : > { %v3437_v47 = vpop.eup %3436  ;;  %v1485_v48 = vsel %vm1073_vm6, %v1476_v46, 0  ;;  %3338 = vmatprep.subr.msk.bf16.mxu1 %vm1073_vm6, %v1476_v46 }
 0x659   : > { %v3439_v49 = vpop.eup %3438  ;;  %3204 = vmatpush3.bf16.msra.mxu1 %v1485_v48  ;;  %v1400_v51 = vmul.f32 %v3437_v47, %v3912_v11 }
 0x65a   : > { %3205 = vmatprep.subr.bf16.mxu1 %v1474_v50  ;;  %v1398_v53 = vmul.f32 %v3439_v49, %v3914_v13 }
 0x65b   : > { %v1408_v54 = vpack.c.bf16 %v1400_v51, %v1400_v51  ;;  %v1571_v57 = vpop.permute.xlu1 %1570 }
 0x65c   : > { %v1407_v55 = vpack.c.bf16 %v1398_v53, %v1396_v52  ;;  %v1581_v58 = vsel %vm852_vm3, %v1571_v57, 0 }
 0x65d   : > { %3206 = vmatpush3.bf16.msra.mxu1 %v1474_v50 }
 0x65e   : > { %3199 = vmatprep.mubr.msk.bf16.mxu0 %vm991_vm5, %v1407_v55 }
 0x65f   : > { %3200 = vmatmul.mubr.msk.bf16.vlgmr.msra.gmra.mxu0 %vm991_vm5, %v1408_v54 }
 0x660   : > { %3212 = vmatpush3.bf16.xpose.msra.mxu0 %v1584_v56 }
 0x661   : > { %3340 = vmatprep.subr.msk.bf16.mxu0 %vm852_vm3, %v1571_v57 }
 0x668   : > { %3214 = vmatpush3.bf16.xpose.msra.mxu0 %v1581_v58 }
 0x683   : > { %v1391_v59 = vpop.xlane.xlu0 %1390 }
 0x687   : > { %v1641_v60 = vpop.permute.xlu0 %1640 }
 0x688   : > { %3341 = vmatprep.subr.msk.bf16.mxu1 %vm852_vm3, %v1641_v60  ;;  %v1652_v14 = vsel %vm852_vm3, %v1641_v60, 0 }
 0x68b   : > { %v1569_v1 = vpop.permute.xlu0 %1568 }
 0x68c   : > { %v1394_v61 = vpop.xlane.xlu1 %1393 }
 0x68d   : > { %3440 = vrcp.f32 %v1394_v61 }
 0x68e   : > { %3442 = vrcp.f32 %v1391_v59 }
 0x68f   : > { %v1635_v16 = vpop.permute.xlu0 %1634 }
 0x690   : > { %v1388_v62 = vpop.xlane.xlu1 %1387 }
 0x691   : > { %3444 = vrcp.f32 %v1388_v62 }
 0x694   : > { %v1567_v0 = vpop.permute.xlu1 %1566 }
 0x695   : > { %3215 = vmatprep.mubr.msk.bf16.mxu0 %vm852_vm3, %v1567_v0 }
 0x696   : > { %3216 = vmatmul.mubr.msk.bf16.vlgmr.msra.gmra.mxu0 %vm852_vm3, %v1569_v1 }
 0x698   : > { %v1639_v19 = vpop.permute.xlu1 %1638 }
 0x699   : > { %v1649_v20 = vsel %vm852_vm3, %v1639_v19, 0 }
 0x69a   : > { %v3441_v2 = vpop.eup %3440 }
 0x69b   : > { %v3443_v4 = vpop.eup %3442  ;;  %v1406_v6 = vmul.f32 %v3441_v2, %v3932_v32 }
 0x69c   : > { %v1404_v10 = vmul.f32 %v3443_v4, %v3928_v30  ;;  %v1637_v21 = vpop.permute.xlu1 %1636 }
 0x69d   : > { %v1410_v13 = vpack.c.bf16 %v1406_v6, %v1406_v6 }
 0x69e   : > { %v3445_v5 = vpop.eup %3444 }
 0x69f   : > { %v1402_v7 = vmul.f32 %v3445_v5, %v3936_v35 }
 0x6a1   : > { %v1409_v11 = vpack.c.bf16 %v1404_v10, %v1402_v7 }
 0x6a3   : > { %3207 = vmatprep.mubr.msk.bf16.mxu1 %vm991_vm5, %v1409_v11 }
 0x6a4   : > { %3208 = vmatmul.mubr.msk.bf16.vlgmr.msra.gmra.mxu1 %vm991_vm5, %v1410_v13 }
 0x6a5   : > { %3220 = vmatpush3.bf16.xpose.msra.mxu1 %v1652_v14  ;;  %3223 = vmatprep.mubr.msk.bf16.mxu1 %vm852_vm3, %v1635_v16 }
 0x6a6   : > { %3342 = vmatprep.subr.msk.bf16.mxu1 %vm852_vm3, %v1639_v19 }
 0x6ad   : > { %3222 = vmatpush3.bf16.xpose.msra.mxu1 %v1649_v20 }
 0x6b4   : > { %3224 = vmatmul.mubr.msk.bf16.vlgmr.msra.gmra.mxu1 %vm852_vm3, %v1637_v21 }
 0x71f   : > { %v3974_v22 = vpop.f32.mrf.mxu0 }
 0x721   : > { %v3976_v23 = vpop.f32.mrf.mxu0 }
 0x723   : > { %v3202_v25 = vpop.f32.mrf.mxu0 }
 0x725   : > { %v3978_v27 = vpop.f32.mrf.mxu0 }
 0x756   : > { %v3217_v28 = vpop.f32.mrf.mxu0 }
 0x757   : > { %v1704_v30 = vmul.f32 0.35355338, %v3217_v28 }
 0x758   : > { %v1620_v29 = vpop.f32.mrf.mxu0 }
 0x759   : > { %v1702_v31 = vmul.f32 0.35355338, %v1620_v29  ;;  %v1710_v39 = vadd.f32 %v1704_v30, %v3826_v38 }
 0x75a   : > { %v3218_v32 = vpop.f32.mrf.mxu0 }
 0x75b   : > { %v1708_v33 = vadd.f32 %v1702_v31, %v3826_v38  ;;  %v1720_v41 = vsel %vm991_vm5, %v1710_v39, -inf }
 0x75c   : > { %v1623_v35 = vpop.f32.mrf.mxu0 }
 0x75d   : > { %v1703_v36 = vmul.f32 0.35355338, %v1623_v35  ;;  %v1714_v37 = vsel %vm991_vm5, %v1708_v33, -inf }
 0x75e   : > { %1715 = vmax.xlane.f32.xlu0 %v1714_v37 }
 0x75f   : > { %v1709_v40 = vadd.f32 %v1703_v36, %v3826_v38 }
 0x761   : > { %v1717_v42 = vsel %vm991_vm5, %v1709_v40, -inf }
 0x762   : > { %1721 = vmax.xlane.f32.xlu0 %v1720_v41  ;;  %1718 = vmax.xlane.f32.xlu1 %v1717_v42 }
 0x764   : > { %v3986_v43 = vpop.f32.mrf.mxu1 }
 0x766   : > { %v3988_v44 = vpop.f32.mrf.mxu1 }
 0x768   : > { %v3210_v45 = vpop.f32.mrf.mxu1 }
 0x76a   : > { %v3990_v46 = vpop.f32.mrf.mxu1 }
 0x774   : > { %v3225_v47 = vpop.f32.mrf.mxu1 }
 0x775   : > { %v1707_v48 = vmul.f32 0.35355338, %v3225_v47 }
 0x776   : > { %v1688_v49 = vpop.f32.mrf.mxu1 }
 0x777   : > { %v1705_v50 = vmul.f32 0.35355338, %v1688_v49  ;;  %v1713_v51 = vadd.f32 %v1707_v48, %v3826_v38 }
 0x778   : > { %v3226_v52 = vpop.f32.mrf.mxu1 }
 0x779   : > { %v1729_v53 = vsel %vm991_vm5, %v1713_v51, -inf  ;;  %v1711_v54 = vadd.f32 %v1705_v50, %v3826_v38 }
 0x77a   : > { %1730 = vmax.xlane.f32.xlu1 %v1729_v53  ;;  %v1691_v55 = vpop.f32.mrf.mxu1 }
 0x77b   : > { %v1706_v56 = vmul.f32 0.35355338, %v1691_v55  ;;  %v1723_v57 = vsel %vm991_vm5, %v1711_v54, -inf }
 0x77c   : > { %1724 = vmax.xlane.f32.xlu0 %v1723_v57 }
 0x77d   : > { %v1712_v58 = vadd.f32 %v1706_v56, %v3826_v38 }
 0x77f   : > { %v1726_v59 = vsel %vm991_vm5, %v1712_v58, -inf }
 0x780   : > { %1727 = vmax.xlane.f32.xlu0 %v1726_v59 }
 0x7e7   : > { %v1716_v60 = vpop.xlane.xlu0 %1715 }
 0x7e8   : > { %v1732_v61 = vsub.f32 %v1708_v33, %v1716_v60 }
 0x7ea   : > { %v1738_v62 = vmul.f32 1.442695, %v1732_v61 }
 0x7eb   : > { %v1722_v0 = vpop.xlane.xlu0 %1721  ;;  %v1719_v1 = vpop.xlane.xlu1 %1718 }
 0x7ec   : > { %3446 = vpow2.f32 %v1738_v62  ;;  %v1734_v2 = vsub.f32 %v1710_v39, %v1722_v0  ;;  %v1733_v4 = vsub.f32 %v1709_v40, %v1719_v1 }
 0x7ee   : > { %v1742_v5 = vmul.f32 1.442695, %v1734_v2  ;;  %v1740_v6 = vmul.f32 1.442695, %v1733_v4 }
 0x7f0   : > { %3448 = vpow2.f32 %v1742_v5 }
 0x7f1   : > { %3450 = vpow2.f32 %v1740_v6 }
 0x7f9   : > { %v3998_v7 = vpop.eup %3446 }
 0x7fa   : > { %v1750_v10 = vsel %vm991_vm5, %v3998_v7, 0.0 }
 0x7fb   : > { %1751 = vadd.xlane.f32.xlu0 %v1750_v10 }
 0x7fd   : > { %v4002_v11 = vpop.eup %3448 }
 0x7fe   : > { %v4004_v13 = vpop.eup %3450  ;;  %v1756_v14 = vsel %vm991_vm5, %v4002_v11, 0.0 }
 0x7ff   : > { %1757 = vadd.xlane.f32.xlu0 %v1756_v14  ;;  %v1753_v16 = vsel %vm991_vm5, %v4004_v13, 0.0 }
 0x800   : > { %1754 = vadd.xlane.f32.xlu1 %v1753_v16 }
 0x803   : > { %v1731_v28 = vpop.xlane.xlu1 %1730 }
 0x804   : > { %v1737_v29 = vsub.f32 %v1713_v51, %v1731_v28 }
 0x805   : > { %v1725_v19 = vpop.xlane.xlu0 %1724 }
 0x806   : > { %v1748_v30 = vmul.f32 1.442695, %v1737_v29  ;;  %v1735_v31 = vsub.f32 %v1711_v54, %v1725_v19 }
 0x808   : > { %v1744_v32 = vmul.f32 1.442695, %v1735_v31 }
 0x809   : > { %v1728_v20 = vpop.xlane.xlu0 %1727 }
 0x80a   : > { %v1736_v21 = vsub.f32 %v1712_v58, %v1728_v20 }
 0x80c   : > { %v1746_v25 = vmul.f32 1.442695, %v1736_v21 }
 0x80e   : > { %3452 = vpow2.f32 %v1746_v25 }
 0x80f   : > { %3454 = vpow2.f32 %v1748_v30 }
 0x810   : > { %3456 = vpow2.f32 %v1744_v32 }
 0x811   : > { %1784 = vrot.lane.b32.xlu1 %v3798_v63, %s3536_s26 }
 0x815   : > { %1945 = vrot.lane.b32.xlu1 %v3803_v3, %s3537_s16  ;;  %1786 = vrot.lane.b32.xlu0 %v3803_v3, %s3536_s26 }
 0x819   : > { %1848 = vrot.lane.b32.xlu1 %v3810_v18, %s3536_s26  ;;  %1846 = vrot.lane.b32.xlu0 %v3806_v12, %s3536_s26 }
 0x81b   : > { %v4018_v33 = vpop.eup %3452 }
 0x81c   : > { %v1762_v35 = vsel %vm991_vm5, %v4018_v33, 0.0  ;;  %v4022_v36 = vpop.eup %3454 }
 0x81d   : > { %1943 = vrot.lane.b32.xlu1 %v3798_v63, %s3537_s16  ;;  %v1765_v37 = vsel %vm991_vm5, %v4022_v36, 0.0  ;;  %v4026_v39 = vpop.eup %3456 }
 0x81e   : > { %v1759_v40 = vsel %vm991_vm5, %v4026_v39, 0.0 }
 0x838   : > { %1763 = vadd.xlane.f32.xlu0 %v1762_v35 }
 0x841   : > { %1766 = vadd.xlane.f32.xlu1 %v1765_v37 }
 0x845   : > { %1760 = vadd.xlane.f32.xlu1 %v1759_v40 }
 0x84e   : > { %2013 = vrot.lane.b32.xlu0 %v3810_v18, %s3537_s16 }
 0x852   : > { %1941 = vrot.lane.b32.xlu0 %v3803_v3, %s3538_s15 }
 0x856   : > { %1939 = vrot.lane.b32.xlu1 %v3798_v63, %s3538_s15  ;;  %2007 = vrot.lane.b32.xlu0 %v3806_v12, %s3538_s15 }
 0x85a   : > { %2011 = vrot.lane.b32.xlu1 %v3806_v12, %s3537_s16 }
 0x85e   : > { %2009 = vrot.lane.b32.xlu1 %v3810_v18, %s3538_s15 }
 0x884   : > { %v1752_v41 = vpop.xlane.xlu0 %1751 }
 0x885   : > { %3458 = vrcp.f32 %v1752_v41 }
 0x888   : > { %v1758_v42 = vpop.xlane.xlu0 %1757 }
 0x889   : > { %3460 = vrcp.f32 %v1758_v42  ;;  %v1755_v45 = vpop.xlane.xlu1 %1754 }
 0x88a   : > { %3462 = vrcp.f32 %v1755_v45 }
 0x88c   : > { %v1787_v47 = vpop.permute.xlu0 %1786 }
 0x88d   : > { %v1796_v48 = vsel %vm1073_vm6, %v1787_v47, 0  ;;  %v1785_v49 = vpop.permute.xlu1 %1784  ;;  %3343 = vmatprep.subr.msk.bf16.mxu0 %vm1073_vm6, %v1787_v47 }
 0x88e   : > { %3228 = vmatpush3.bf16.msra.mxu0 %v1796_v48 }
 0x88f   : > { %3229 = vmatprep.subr.bf16.mxu0 %v1785_v49 }
 0x890   : > { %v1847_v56 = vpop.permute.xlu0 %1846 }
 0x891   : > { %v1946_v50 = vpop.permute.xlu1 %1945 }
 0x892   : > { %3230 = vmatpush3.bf16.msra.mxu0 %v1785_v49  ;;  %v3459_v51 = vpop.eup %3458  ;;  %v1957_v62 = vsel %vm852_vm3, %v1946_v50, 0 }
 0x893   : > { %3345 = vmatprep.subr.msk.bf16.mxu0 %vm852_vm3, %v1946_v50  ;;  %v1769_v58 = vmul.f32 %v3459_v51, %v3998_v7 }
 0x895   : > { %v1849_v52 = vpop.permute.xlu1 %1848 }
 0x896   : > { %v3461_v53 = vpop.eup %3460  ;;  %v1858_v54 = vsel %vm1073_vm6, %v1849_v52, 0  ;;  %3344 = vmatprep.subr.msk.bf16.mxu1 %vm1073_vm6, %v1849_v52 }
 0x897   : > { %v3463_v55 = vpop.eup %3462  ;;  %3236 = vmatpush3.bf16.msra.mxu1 %v1858_v54  ;;  %v1773_v57 = vmul.f32 %v3461_v53, %v4002_v11 }
 0x898   : > { %3237 = vmatprep.subr.bf16.mxu1 %v1847_v56  ;;  %v1771_v59 = vmul.f32 %v3463_v55, %v4004_v13 }
 0x899   : > { %v1781_v60 = vpack.c.bf16 %v1773_v57, %v1773_v57  ;;  %v1944_v0 = vpop.permute.xlu1 %1943 }
 0x89a   : > { %v1780_v61 = vpack.c.bf16 %v1771_v59, %v1769_v58  ;;  %v1954_v1 = vsel %vm852_vm3, %v1944_v0, 0 }
 0x89b   : > { %3238 = vmatpush3.bf16.msra.mxu1 %v1847_v56 }
 0x89c   : > { %3231 = vmatprep.mubr.msk.bf16.mxu0 %vm991_vm5, %v1780_v61 }
 0x89d   : > { %3232 = vmatmul.mubr.msk.bf16.vlgmr.msra.gmra.mxu0 %vm991_vm5, %v1781_v60 }
 0x89e   : > { %3244 = vmatpush3.bf16.xpose.msra.mxu0 %v1957_v62 }
 0x89f   : > { %3346 = vmatprep.subr.msk.bf16.mxu0 %vm852_vm3, %v1944_v0 }
 0x8a6   : > { %3246 = vmatpush3.bf16.xpose.msra.mxu0 %v1954_v1 }
 0x8c1   : > { %v1764_v2 = vpop.xlane.xlu0 %1763 }
 0x8c5   : > { %v2014_v4 = vpop.permute.xlu0 %2013 }
 0x8c6   : > { %3347 = vmatprep.subr.msk.bf16.mxu1 %vm852_vm3, %v2014_v4  ;;  %v2025_v28 = vsel %vm852_vm3, %v2014_v4, 0 }
 0x8c9   : > { %v1942_v10 = vpop.permute.xlu0 %1941 }
 0x8ca   : > { %v1767_v5 = vpop.xlane.xlu1 %1766 }
 0x8cb   : > { %3464 = vrcp.f32 %v1767_v5 }
 0x8cc   : > { %3466 = vrcp.f32 %v1764_v2 }
 0x8cd   : > { %v2008_v29 = vpop.permute.xlu0 %2007 }
 0x8ce   : > { %v1761_v6 = vpop.xlane.xlu1 %1760 }
 0x8cf   : > { %3468 = vrcp.f32 %v1761_v6 }
 0x8d2   : > { %v1940_v7 = vpop.permute.xlu1 %1939 }
 0x8d3   : > { %3247 = vmatprep.mubr.msk.bf16.mxu0 %vm852_vm3, %v1940_v7 }
 0x8d4   : > { %3248 = vmatmul.mubr.msk.bf16.vlgmr.msra.gmra.mxu0 %vm852_vm3, %v1942_v10 }
 0x8d6   : > { %v2012_v30 = vpop.permute.xlu1 %2011 }
 0x8d7   : > { %v2022_v31 = vsel %vm852_vm3, %v2012_v30, 0 }
 0x8d8   : > { %v3465_v11 = vpop.eup %3464 }
 0x8d9   : > { %v3467_v13 = vpop.eup %3466  ;;  %v1779_v16 = vmul.f32 %v3465_v11, %v4022_v36 }
 0x8da   : > { %v1777_v20 = vmul.f32 %v3467_v13, %v4018_v33  ;;  %v2010_v32 = vpop.permute.xlu1 %2009 }
 0x8db   : > { %v1783_v25 = vpack.c.bf16 %v1779_v16, %v1779_v16 }
 0x8dc   : > { %v3469_v14 = vpop.eup %3468 }
 0x8dd   : > { %v1775_v19 = vmul.f32 %v3469_v14, %v4026_v39 }
 0x8df   : > { %v1782_v21 = vpack.c.bf16 %v1777_v20, %v1775_v19 }
 0x8e1   : > { %3239 = vmatprep.mubr.msk.bf16.mxu1 %vm991_vm5, %v1782_v21 }
 0x8e2   : > { %3240 = vmatmul.mubr.msk.bf16.vlgmr.msra.gmra.mxu1 %vm991_vm5, %v1783_v25 }
 0x8e3   : > { %3252 = vmatpush3.bf16.xpose.msra.mxu1 %v2025_v28  ;;  %3255 = vmatprep.mubr.msk.bf16.mxu1 %vm852_vm3, %v2008_v29 }
 0x8e4   : > { %3348 = vmatprep.subr.msk.bf16.mxu1 %vm852_vm3, %v2012_v30 }
 0x8eb   : > { %3254 = vmatpush3.bf16.xpose.msra.mxu1 %v2022_v31 }
 0x8f2   : > { %3256 = vmatmul.mubr.msk.bf16.vlgmr.msra.gmra.mxu1 %vm852_vm3, %v2010_v32 }
 0x95d   : > { %v4064_v33 = vpop.f32.mrf.mxu0 }
 0x95f   : > { %v4066_v35 = vpop.f32.mrf.mxu0 }
 0x961   : > { %v3234_v36 = vpop.f32.mrf.mxu0 }
 0x963   : > { %v4068_v37 = vpop.f32.mrf.mxu0 }
 0x994   : > { %v3249_v39 = vpop.f32.mrf.mxu0 }
 0x995   : > { %v2077_v41 = vmul.f32 0.35355338, %v3249_v39 }
 0x996   : > { %v1993_v40 = vpop.f32.mrf.mxu0 }
 0x997   : > { %v2075_v42 = vmul.f32 0.35355338, %v1993_v40  ;;  %v2083_v51 = vadd.f32 %v2077_v41, %v3826_v38 }
 0x998   : > { %v3250_v45 = vpop.f32.mrf.mxu0 }
 0x999   : > { %v2081_v47 = vadd.f32 %v2075_v42, %v3826_v38  ;;  %v2093_v53 = vsel %vm991_vm5, %v2083_v51, -inf }
 0x99a   : > { %v1996_v48 = vpop.f32.mrf.mxu0 }
 0x99b   : > { %v2076_v49 = vmul.f32 0.35355338, %v1996_v48  ;;  %v2087_v50 = vsel %vm991_vm5, %v2081_v47, -inf }
 0x99c   : > { %2088 = vmax.xlane.f32.xlu0 %v2087_v50 }
 0x99d   : > { %v2082_v52 = vadd.f32 %v2076_v49, %v3826_v38 }
 0x99f   : > { %v2090_v54 = vsel %vm991_vm5, %v2082_v52, -inf }
 0x9a0   : > { %2094 = vmax.xlane.f32.xlu0 %v2093_v53  ;;  %2091 = vmax.xlane.f32.xlu1 %v2090_v54 }
 0x9a2   : > { %v4076_v55 = vpop.f32.mrf.mxu1 }
 0x9a4   : > { %v4078_v56 = vpop.f32.mrf.mxu1 }
 0x9a6   : > { %v3242_v57 = vpop.f32.mrf.mxu1 }
 0x9a8   : > { %v4080_v58 = vpop.f32.mrf.mxu1 }
 0x9b2   : > { %v3257_v59 = vpop.f32.mrf.mxu1 }
 0x9b3   : > { %v2080_v60 = vmul.f32 0.35355338, %v3257_v59 }
 0x9b4   : > { %v2061_v61 = vpop.f32.mrf.mxu1 }
 0x9b5   : > { %v2078_v62 = vmul.f32 0.35355338, %v2061_v61  ;;  %v2086_v0 = vadd.f32 %v2080_v60, %v3826_v38 }
 0x9b6   : > { %v3258_v1 = vpop.f32.mrf.mxu1 }
 0x9b7   : > { %v2102_v2 = vsel %vm991_vm5, %v2086_v0, -inf  ;;  %v2084_v4 = vadd.f32 %v2078_v62, %v3826_v38 }
 0x9b8   : > { %2103 = vmax.xlane.f32.xlu1 %v2102_v2  ;;  %v2064_v5 = vpop.f32.mrf.mxu1 }
 0x9b9   : > { %v2079_v6 = vmul.f32 0.35355338, %v2064_v5  ;;  %v2096_v7 = vsel %vm991_vm5, %v2084_v4, -inf }
 0x9ba   : > { %2097 = vmax.xlane.f32.xlu0 %v2096_v7 }
 0x9bb   : > { %v2085_v10 = vadd.f32 %v2079_v6, %v3826_v38 }
 0x9bd   : > { %v2099_v11 = vsel %vm991_vm5, %v2085_v10, -inf }
 0x9be   : > { %2100 = vmax.xlane.f32.xlu0 %v2099_v11 }
 0xa25   : > { %v2089_v13 = vpop.xlane.xlu0 %2088 }
 0xa26   : > { %v2105_v14 = vsub.f32 %v2081_v47, %v2089_v13 }
 0xa28   : > { %v2111_v16 = vmul.f32 1.442695, %v2105_v14 }
 0xa29   : > { %v2095_v19 = vpop.xlane.xlu0 %2094  ;;  %v2092_v20 = vpop.xlane.xlu1 %2091 }
 0xa2a   : > { %3470 = vpow2.f32 %v2111_v16  ;;  %v2107_v21 = vsub.f32 %v2083_v51, %v2095_v19  ;;  %v2106_v25 = vsub.f32 %v2082_v52, %v2092_v20 }
 0xa2c   : > { %v2115_v28 = vmul.f32 1.442695, %v2107_v21  ;;  %v2113_v29 = vmul.f32 1.442695, %v2106_v25 }
 0xa2e   : > { %3472 = vpow2.f32 %v2115_v28 }
 0xa2f   : > { %3474 = vpow2.f32 %v2113_v29 }
 0xa37   : > { %v3471_v30 = vpop.eup %3470 }
 0xa38   : > { %v2123_v31 = vsel %vm991_vm5, %v3471_v30, 0.0 }
 0xa39   : > { %2124 = vadd.xlane.f32.xlu0 %v2123_v31 }
 0xa3b   : > { %v4089_v38 = vpop.eup %3472 }
 0xa3c   : > { %v3475_v32 = vpop.eup %3474  ;;  %v2129_v36 = vsel %vm991_vm5, %v4089_v38, 0.0 }
 0xa3d   : > { %2130 = vadd.xlane.f32.xlu0 %v2129_v36  ;;  %v2126_v39 = vsel %vm991_vm5, %v3475_v32, 0.0  ;;  %v3378_v36 = vld [vmem:[%s4347_s22 + $0x8] sm:$0xff]  }
 0xa3e   : > { %2127 = vadd.xlane.f32.xlu1 %v2126_v39  ;;  %v3379_v39 = vld [vmem:[%s4347_s22] sm:$0xff]  }
 0xa41   : > { %v2104_v40 = vpop.xlane.xlu1 %2103 }
 0xa42   : > { %v2110_v41 = vsub.f32 %v2086_v0, %v2104_v40 }
 0xa43   : > { %v2098_v42 = vpop.xlane.xlu0 %2097 }
 0xa44   : > { %v2121_v45 = vmul.f32 1.442695, %v2110_v41  ;;  %v2108_v47 = vsub.f32 %v2084_v4, %v2098_v42 }
 0xa46   : > { %3476 = vpow2.f32 %v2121_v45  ;;  %v2117_v48 = vmul.f32 1.442695, %v2108_v47 }
 0xa47   : > { %v2101_v49 = vpop.xlane.xlu0 %2100 }
 0xa48   : > { %3478 = vpow2.f32 %v2117_v48  ;;  %v2109_v50 = vsub.f32 %v2085_v10, %v2101_v49 }
 0xa4a   : > { %v2119_v51 = vmul.f32 1.442695, %v2109_v50 }
 0xa4c   : > { %3480 = vpow2.f32 %v2119_v51 }
 0xa53   : > { %v4094_v52 = vpop.eup %3476 }
 0xa54   : > { %v2138_v53 = vsel %vm991_vm5, %v4094_v52, 0.0 }
 0xa55   : > { %v4098_v54 = vpop.eup %3478  ;;  %2139 = vadd.xlane.f32.xlu1 %v2138_v53 }
 0xa56   : > { %v2132_v57 = vsel %vm991_vm5, %v4098_v54, 0.0 }
 0xa59   : > { %v4102_v59 = vpop.eup %3480  ;;  %2133 = vadd.xlane.f32.xlu1 %v2132_v57 }
 0xa5a   : > { %v2135_v60 = vsel %vm991_vm5, %v4102_v59, 0.0 }
 0xa5b   : > { %2136 = vadd.xlane.f32.xlu0 %v2135_v60 }
 0xa6a   : > { %2157 = vrot.lane.b32.xlu1 %v3798_v63, %s3539_s19 }
 0xa6e   : > { %2221 = vrot.lane.b32.xlu1 %v3810_v18, %s3539_s19 }
 0xa71   : > { %2159 = vrot.lane.b32.xlu0 %v3803_v3, %s3539_s19 }
 0xa72   : > { %2219 = vrot.lane.b32.xlu1 %v3806_v12, %s3539_s19 }
 0xa75   : > { %1541 = vrot.lane.b32.xlu0 %v3976_v23, %s3540_s21 }
 0xa76   : > { %1543 = vrot.lane.b32.xlu1 %v3978_v27, %s3540_s21 }
 0xa79   : > { %1914 = vrot.lane.b32.xlu0 %v4066_v35, %s3541_s17 }
 0xa7a   : > { %1916 = vrot.lane.b32.xlu1 %v4068_v37, %s3541_s17 }
 0xac2   : > { %v2125_v63 = vpop.xlane.xlu0 %2124 }
 0xac3   : > { %3482 = vrcp.f32 %v2125_v63 }
 0xac6   : > { %v2131_v0 = vpop.xlane.xlu0 %2130 }
 0xac7   : > { %v2128_v18 = vpop.xlane.xlu1 %2127 }
 0xac8   : > { %3484 = vrcp.f32 %v2128_v18 }
 0xac9   : > { %3486 = vrcp.f32 %v2131_v0 }
 0xad0   : > { %v3483_v3 = vpop.eup %3482 }
 0xad1   : > { %v2142_v61 = vmul.f32 %v3483_v3, %v3471_v30 }
 0xad5   : > { %v3485_v12 = vpop.eup %3484 }
 0xad6   : > { %v2144_v62 = vmul.f32 %v3485_v12, %v3475_v32  ;;  %v3487_v2 = vpop.eup %3486 }
 0xad7   : > { %v2146_v10 = vmul.f32 %v3487_v2, %v4089_v38 }
 0xad8   : > { %v2153_v23 = vpack.c.bf16 %v2144_v62, %v2142_v61 }
 0xad9   : > { %v2154_v16 = vpack.c.bf16 %v2146_v10, %v2146_v10 }
 0xada   : > { %3263 = vmatprep.mubr.msk.bf16.mxu0 %vm991_vm5, %v2153_v23 }
 0xade   : > { %v2140_v27 = vpop.xlane.xlu1 %2139 }
 0xadf   : > { %3488 = vrcp.f32 %v2140_v27  ;;  %v2991_v27 = vld [vmem:[%s4348_s29] ss:$0 sm:$0xff] }
 0xae2   : > { %v2134_v1 = vpop.xlane.xlu1 %2133 }
 0xae3   : > { %3490 = vrcp.f32 %v2134_v1 }
 0xae4   : > { %v2137_v35 = vpop.xlane.xlu0 %2136 }
 0xae5   : > { %3492 = vrcp.f32 %v2137_v35 }
 0xae6   : > { %v2158_v37 = vpop.permute.xlu1 %2157 }
 0xae8   : > { %v2160_v4 = vpop.permute.xlu0 %2159 }
 0xae9   : > { %v2169_v5 = vsel %vm1073_vm6, %v2160_v4, 0  ;;  %3349 = vmatprep.subr.msk.bf16.mxu0 %vm1073_vm6, %v2160_v4 }
 0xaea   : > { %3260 = vmatpush3.bf16.msra.mxu0 %v2169_v5  ;;  %v2222_v6 = vpop.permute.xlu1 %2221 }
 0xaeb   : > { %v2231_v7 = vsel %vm1073_vm6, %v2222_v6, 0  ;;  %3261 = vmatprep.subr.bf16.mxu0 %v2158_v37  ;;  %3350 = vmatprep.subr.msk.bf16.mxu1 %vm1073_vm6, %v2222_v6 }
 0xaec   : > { %v1542_v11 = vpop.permute.xlu0 %1541  ;;  %3268 = vmatpush3.bf16.msra.mxu1 %v2231_v7  ;;  %v3489_v14 = vpop.eup %3488 }
 0xaed   : > { %1560 = vst.msk [vmem:[#allocation2] sm:$0xff] %vm1559_vm7, %v1542_v11  ;;  %v2152_v28 = vmul.f32 %v3489_v14, %v4094_v52 }
 0xaee   : > { %3262 = vmatpush3.bf16.msra.mxu0 %v2158_v37  ;;  %v2220_v13 = vpop.permute.xlu1 %2219 }
 0xaef   : > { %3269 = vmatprep.subr.bf16.mxu1 %v2220_v13  ;;  %3275 = vmatprep.subr.bf16.mxu0 %v3526_v34  ;;  %v2156_v32 = vpack.c.bf16 %v2152_v28, %v2152_v28 }
 0xaf0   : > { %v3491_v19 = vpop.eup %3490  ;;  %v1915_v20 = vpop.permute.xlu0 %1914  ;;  %3270 = vmatpush3.bf16.msra.mxu1 %v2220_v13 }
 0xaf1   : > { %1933 = vst.msk [vmem:[#allocation2] sm:$0xff] %vm1932_vm8, %v1915_v20  ;;  %3264 = vmatmul.mubr.msk.bf16.vlgmr.msra.gmra.mxu0 %vm991_vm5, %v2154_v16  ;;  %3291 = vmatprep.subr.bf16.mxu1 %v3526_v34  ;;  %v2148_v29 = vmul.f32 %v3491_v19, %v4098_v54 }
 0xaf2   : > { %v3493_v21 = vpop.eup %3492  ;;  %v1544_v25 = vpop.permute.xlu1 %1543  ;;  %3279 = vmatprep.mubr.msk.bf16.mxu0 %vm3527_vm2, %v3526_v34  ;;  %3276 = vmatpush3.bf16.msra.mxu0 %v3378_v36 }
 0xaf3   : > { %1561 = vst.msk [vmem:[#allocation2 + $0x8] sm:$0xff] %vm1559_vm7, %v1544_v25  ;;  %v2150_v30 = vmul.f32 %v3493_v21, %v4102_v59  ;;  %3277 = vmatprep.subr.bf16.mxu0 %v3526_v34 }
 0xaf5   : > { %v2155_v31 = vpack.c.bf16 %v2150_v30, %v2148_v29 }
 0xaf6   : > { %v1917_v38 = vpop.permute.xlu1 %1916  ;;  %3278 = vmatpush3.bf16.msra.mxu0 %v3379_v39 }
 0xaf7   : > { %1934 = vst.msk [vmem:[#allocation2 + $0x8] sm:$0xff] %vm1932_vm8, %v1917_v38  ;;  %3271 = vmatprep.mubr.msk.bf16.mxu1 %vm991_vm5, %v2155_v31  ;;  %3307 = vmatprep.subr.bf16.mxu0 %v3526_v34 }
 0xaf8   : > { %3272 = vmatmul.mubr.msk.bf16.vlgmr.msra.gmra.mxu1 %vm991_vm5, %v2156_v32 }
 0xaf9   : > { %3295 = vmatprep.mubr.msk.bf16.mxu1 %vm3527_vm2, %v3526_v34 }
 0xbb1   : > { %v3265_v40 = vpop.f32.mrf.mxu0 }
 0xbb3   : > { %v2205_v41 = vpop.f32.mrf.mxu0 }
 0xbb4   : > { %2287 = vrot.lane.b32.xlu0 %v2205_v41, %s3542_s24 }
 0xbb5   : > { %v3266_v42 = vpop.f32.mrf.mxu0 }
 0xbb7   : > { %v2208_v45 = vpop.f32.mrf.mxu0 }
 0xbb8   : > { %1545 = vrot.lane.b32.xlu0 %v3974_v22, %s3540_s21  ;;  %2289 = vrot.lane.b32.xlu1 %v2208_v45, %s3542_s24  ;;  %v3273_v47 = vpop.f32.mrf.mxu1 }
 0xbba   : > { %v2267_v48 = vpop.f32.mrf.mxu1 }
 0xbbc   : > { %1918 = vrot.lane.b32.xlu0 %v4064_v33, %s3541_s17  ;;  %1547 = vrot.lane.b32.xlu1 %v3988_v44, %s3540_s21  ;;  %v3274_v49 = vpop.f32.mrf.mxu1 }
 0xbbe   : > { %v2270_v22 = vpop.f32.mrf.mxu1 }
 0xbc0   : > { %2291 = vrot.lane.b32.xlu0 %v3265_v40, %s3542_s24  ;;  %1920 = vrot.lane.b32.xlu1 %v4078_v56, %s3541_s17 }
 0xbc4   : > { %1549 = vrot.lane.b32.xlu0 %v3990_v46, %s3540_s21  ;;  %1551 = vrot.lane.b32.xlu1 %v3986_v43, %s3540_s21 }
 0xbc8   : > { %1922 = vrot.lane.b32.xlu0 %v4080_v58, %s3541_s17  ;;  %2293 = vrot.lane.b32.xlu1 %v2267_v48, %s3542_s24 }
 0xbcc   : > { %1924 = vrot.lane.b32.xlu1 %v4076_v55, %s3541_s17  ;;  %2295 = vrot.lane.b32.xlu0 %v2270_v22, %s3542_s24 }
 0xbd0   : > { %2297 = vrot.lane.b32.xlu1 %v3273_v47, %s3542_s24 }
 0xc26   : > { %v2288_v44 = vpop.permute.xlu0 %2287 }
 0xc27   : > { %2306 = vst.msk [vmem:[#allocation2] sm:$0xff] %vm2305_vm9, %v2288_v44 }
 0xc2a   : > { %v1546_v33 = vpop.permute.xlu0 %1545  ;;  %v2290_v56 = vpop.permute.xlu1 %2289 }
 0xc2b   : > { %1562 = vst.msk [vmem:[#allocation2 + $0x10] sm:$0xff] %vm1559_vm7, %v1546_v33 }
 0xc2c   : > { %2307 = vst.msk [vmem:[#allocation2 + $0x8] sm:$0xff] %vm2305_vm9, %v2290_v56 }
 0xc2e   : > { %v1919_v43 = vpop.permute.xlu0 %1918  ;;  %v1548_v46 = vpop.permute.xlu1 %1547  ;;  %v2312_v50 = vld [vmem:[#allocation2] sm:$0xff] }
 0xc2f   : > { %1935 = vst.msk [vmem:[#allocation2 + $0x10] sm:$0xff] %vm1932_vm8, %v1919_v43 }
 0xc30   : > { %1563 = vst.msk [vmem:[#allocation2 + $0x18] sm:$0xff] %vm1559_vm7, %v1548_v46  ;;  %v3380_v46 = vld [vmem:[%s3661_s3 + $0x8] sm:$0xff]  }
 0xc31   : > { %3292 = vmatpush3.bf16.msra.mxu1 %v3380_v46 }
 0xc32   : > { %v2292_v58 = vpop.permute.xlu0 %2291  ;;  %v1921_v55 = vpop.permute.xlu1 %1920  ;;  %3293 = vmatprep.subr.bf16.mxu1 %v3526_v34 }
 0xc33   : > { %v2313_v51 = vld [vmem:[#allocation2 + $0x8] sm:$0xff]  ;;  %2308 = vst.msk [vmem:[#allocation2 + $0x10] sm:$0xff] %vm2305_vm9, %v2292_v58  ;;  %v3381_v58 = vld [vmem:[%s3661_s3] sm:$0xff]  }
 0xc34   : > { %1936 = vst.msk [vmem:[#allocation2 + $0x18] sm:$0xff] %vm1932_vm8, %v1921_v55  ;;  %v2318_v52 = vpack.c.bf16 %v2313_v51, %v2312_v50 }
 0xc35   : > { %3294 = vmatpush3.bf16.msra.mxu1 %v3381_v58 }
 0xc36   : > { %3280 = vmatmul.mubr.msk.bf16.vlgmr.msra.gmra.mxu0 %vm630_vm1, %v2318_v52  ;;  %v1550_v53 = vpop.permute.xlu0 %1549  ;;  %v1552_v54 = vpop.permute.xlu1 %1551 }
 0xc37   : > { %3283 = vmatprep.mubr.msk.bf16.mxu0 %vm3527_vm2, %v3526_v34  ;;  %1564 = vst.msk [vmem:[#allocation2 + $0x20] sm:$0xff] %vm1559_vm7, %v1550_v53  ;;  %1565 = vst.msk [vmem:[#allocation2 + $0x28] sm:$0xff] %vm1559_vm7, %v1552_v54 }
 0xc3a   : > { %v1923_v57 = vpop.permute.xlu0 %1922  ;;  %v2294_v59 = vpop.permute.xlu1 %2293  ;;  %v2314_v3 = vld [vmem:[#allocation2 + $0x10] sm:$0xff] }
 0xc3b   : > { %1937 = vst.msk [vmem:[#allocation2 + $0x20] sm:$0xff] %vm1932_vm8, %v1923_v57 }
 0xc3c   : > { %2309 = vst.msk [vmem:[#allocation2 + $0x18] sm:$0xff] %vm2305_vm9, %v2294_v59 }
 0xc3e   : > { %v2296_v60 = vpop.permute.xlu0 %2295  ;;  %v1925_v63 = vpop.permute.xlu1 %1924 }
 0xc3f   : > { %2310 = vst.msk [vmem:[#allocation2 + $0x20] sm:$0xff] %vm2305_vm9, %v2296_v60 }
 0xc40   : > { %1938 = vst.msk [vmem:[#allocation2 + $0x28] sm:$0xff] %vm1932_vm8, %v1925_v63 }
 0xc42   : > { %v2298_v18 = vpop.permute.xlu1 %2297 }
 0xc43   : > { %v2315_v12 = vld [vmem:[#allocation2 + $0x18] sm:$0xff]  ;;  %2311 = vst.msk [vmem:[#allocation2 + $0x28] sm:$0xff] %vm2305_vm9, %v2298_v18 }
 0xc44   : > { %v2319_v61 = vpack.c.bf16 %v2315_v12, %v2314_v3 }
 0xc46   : > { %3284 = vmatmul.mubr.msk.bf16.gmra.mxu0 %vm630_vm1, %v2319_v61  ;;  %v2316_v62 = vld [vmem:[#allocation2 + $0x20] sm:$0xff] }
 0xc47   : > { %3287 = vmatprep.mubr.msk.bf16.mxu0 %vm3527_vm2, %v3526_v34 }
 0xc4a   : > { %v2317_v0 = vld [vmem:[#allocation2 + $0x28] sm:$0xff] }
 0xc4b   : > { %v2320_v23 = vpack.c.bf16 %v2317_v0, %v2316_v62 }
 0xc4e   : > { %3288 = vmatmul.mubr.msk.bf16.gmra.mxu0 %vm630_vm1, %v2320_v23 }
 0xc4f   : > { %3315 = vmatprep.mubr.msk.bf16.mxu0 %vm3527_vm2, %v3526_v34 }
 0xcf6   : > { %v2387_v1 = vpop.f32.mrf.mxu0 }
 0xcf7   : > { %v2388_v35 = vadd.f32 %v2991_v27, %v2387_v1 }
 0xcf8   : > { %v3281_v37 = vpop.f32.mrf.mxu0 }
 0xcf9   : > { %v4189_v2 = vadd.f32 %v3719_v8, %v2388_v35 }
 0xcfa   : > { %v2390_v4 = vpop.f32.mrf.mxu0 }
 0xcfb   : > { %v2391_v5 = vadd.f32 %v2991_v27, %v2390_v4  ;;  %v2418_v6 = vsel %vm630_vm1, %v4189_v2, 0.0  ;;  %v2442_v7 = vmul.f32 %v4189_v2, %v4189_v2 }
 0xcfc   : > { %2419 = vadd.xlane.f32.xlu0 %v2418_v6  ;;  %v3282_v10 = vpop.f32.mrf.mxu0 }
 0xcfd   : > { %v4196_v11 = vadd.f32 %v3721_v9, %v2391_v5  ;;  %v2448_v13 = vsel %vm630_vm1, %v2442_v7, 0.0 }
 0xcff   : > { %v2421_v14 = vsel %vm630_vm1, %v4196_v11, 0.0  ;;  %v2443_v8 = vmul.f32 %v4196_v11, %v4196_v11 }
 0xd00   : > { %2449 = vadd.xlane.f32.xlu0 %v2448_v13  ;;  %2422 = vadd.xlane.f32.xlu1 %v2421_v14 }
 0xd01   : > { %v2451_v16 = vsel %vm630_vm1, %v2443_v8, 0.0 }
 0xd04   : > { %2452 = vadd.xlane.f32.xlu0 %v2451_v16 }
 0xd06   : > { %v2395_v19 = vpop.f32.mrf.mxu0 }
 0xd07   : > { %v2396_v20 = vadd.f32 %v2991_v27, %v2395_v19 }
 0xd08   : > { %v3285_v21 = vpop.f32.mrf.mxu0 }
 0xd09   : > { %v4205_v25 = vadd.f32 %v3732_v15, %v2396_v20  ;;  %v2997_v21 = vld [vmem:[%s578_s2] ss:$0 sm:$0xff] }
 0xd0a   : > { %v2398_v9 = vpop.f32.mrf.mxu0 }
 0xd0b   : > { %v2399_v28 = vadd.f32 %v2991_v27, %v2398_v9  ;;  %v2424_v29 = vsel %vm630_vm1, %v4205_v25, 0.0  ;;  %v2444_v30 = vmul.f32 %v4205_v25, %v4205_v25 }
 0xd0c   : > { %2425 = vadd.xlane.f32.xlu0 %v2424_v29  ;;  %v3286_v31 = vpop.f32.mrf.mxu0 }
 0xd0d   : > { %v4212_v38 = vadd.f32 %v3735_v17, %v2399_v28  ;;  %v2454_v39 = vsel %vm630_vm1, %v2444_v30, 0.0 }
 0xd0e   : > { %v2403_v32 = vpop.f32.mrf.mxu0 }
 0xd0f   : > { %v2404_v36 = vadd.f32 %v2991_v27, %v2403_v32  ;;  %v2427_v15 = vsel %vm630_vm1, %v4212_v38, 0.0  ;;  %v2445_v40 = vmul.f32 %v4212_v38, %v4212_v38 }
 0xd10   : > { %2455 = vadd.xlane.f32.xlu0 %v2454_v39  ;;  %2428 = vadd.xlane.f32.xlu1 %v2427_v15  ;;  %v3289_v41 = vpop.f32.mrf.mxu0 }
 0xd11   : > { %v4220_v42 = vadd.f32 %v3749_v24, %v2404_v36  ;;  %v2457_v47 = vsel %vm630_vm1, %v2445_v40, 0.0  ;;  %v2998_v41 = vld [vmem:[%s581_s20] ss:$0 sm:$0xff] }
 0xd12   : > { %v2406_v45 = vpop.f32.mrf.mxu0 }
 0xd13   : > { %v2407_v17 = vadd.f32 %v2991_v27, %v2406_v45  ;;  %v2430_v48 = vsel %vm630_vm1, %v4220_v42, 0.0  ;;  %v2446_v49 = vmul.f32 %v4220_v42, %v4220_v42 }
 0xd14   : > { %2458 = vadd.xlane.f32.xlu1 %v2457_v47  ;;  %2431 = vadd.xlane.f32.xlu0 %v2430_v48  ;;  %v3290_v22 = vpop.f32.mrf.mxu0 }
 0xd15   : > { %v4228_v44 = vadd.f32 %v3752_v26, %v2407_v17  ;;  %v2460_v24 = vsel %vm630_vm1, %v2446_v49, 0.0 }
 0xd17   : > { %v2433_v33 = vsel %vm630_vm1, %v4228_v44, 0.0  ;;  %v2447_v56 = vmul.f32 %v4228_v44, %v4228_v44 }
 0xd18   : > { %2461 = vadd.xlane.f32.xlu0 %v2460_v24  ;;  %2434 = vadd.xlane.f32.xlu1 %v2433_v33 }
 0xd19   : > { %v2463_v43 = vsel %vm630_vm1, %v2447_v56, 0.0 }
 0xd1c   : > { %2464 = vadd.xlane.f32.xlu1 %v2463_v43 }
 0xd85   : > { %v2420_v26 = vpop.xlane.xlu0 %2419 }
 0xd86   : > { %v2436_v55 = vmul.f32 0.03125, %v2420_v26 }
 0xd88   : > { %v2472_v52 = vmul.f32 %v2436_v55, %v2436_v55  ;;  %v2484_v5 = vsub.f32 %v4189_v2, %v2436_v55 }
 0xd89   : > { %v2450_v50 = vpop.xlane.xlu0 %2449  ;;  %v2423_v51 = vpop.xlane.xlu1 %2422 }
 0xd8a   : > { %v2466_v53 = vmul.f32 0.03125, %v2450_v50  ;;  %v2437_v54 = vmul.f32 0.03125, %v2423_v51 }
 0xd8c   : > { %v2478_v57 = vsub.f32 %v2466_v53, %v2472_v52  ;;  %v2473_v63 = vmul.f32 %v2437_v54, %v2437_v54  ;;  %v2485_v19 = vsub.f32 %v4196_v11, %v2437_v54 }
 0xd8d   : > { %v2453_v59 = vpop.xlane.xlu0 %2452 }
 0xd8e   : > { %v2490_v60 = vadd.f32 1e-06, %v2478_v57  ;;  %v2467_v18 = vmul.f32 0.03125, %v2453_v59 }
 0xd90   : > { %3494 = vrsqrt.f32 %v2490_v60  ;;  %v2479_v3 = vsub.f32 %v2467_v18, %v2473_v63 }
 0xd92   : > { %v2491_v12 = vadd.f32 1e-06, %v2479_v3 }
 0xd94   : > { %3496 = vrsqrt.f32 %v2491_v12 }
 0xd95   : > { %v2426_v61 = vpop.xlane.xlu0 %2425 }
 0xd96   : > { %v2438_v62 = vmul.f32 0.03125, %v2426_v61 }
 0xd98   : > { %v2474_v27 = vmul.f32 %v2438_v62, %v2438_v62  ;;  %v2486_v46 = vsub.f32 %v4205_v25, %v2438_v62 }
 0xd99   : > { %v2456_v0 = vpop.xlane.xlu0 %2455  ;;  %v2429_v23 = vpop.xlane.xlu1 %2428 }
 0xd9a   : > { %v2468_v1 = vmul.f32 0.03125, %v2456_v0  ;;  %v2439_v35 = vmul.f32 0.03125, %v2429_v23 }
 0xd9c   : > { %v2480_v37 = vsub.f32 %v2468_v1, %v2474_v27  ;;  %v2475_v13 = vmul.f32 %v2439_v35, %v2439_v35  ;;  %v2487_v55 = vsub.f32 %v4212_v38, %v2439_v35  ;;  %v3382_v35 = vld [vmem:[%s3671_s14 + $0x18] sm:$0xff]  }
 0xd9d   : > { %v3495_v4 = vpop.eup %3494  ;;  %v2432_v6 = vpop.xlane.xlu0 %2431  ;;  %3308 = vmatpush3.bf16.msra.mxu0 %v3382_v35 }
 0xd9e   : > { %v2459_v7 = vpop.xlane.xlu1 %2458  ;;  %v2492_v10 = vadd.f32 1e-06, %v2480_v37  ;;  %v2440_v14 = vmul.f32 0.03125, %v2432_v6  ;;  %v2502_v16 = vmul.f32 %v3495_v4, %v2484_v5  ;;  %3309 = vmatprep.subr.bf16.mxu0 %v3526_v34  ;;  %v3383_v37 = vld [vmem:[%s3671_s14 + $0x10] sm:$0xff]   ;;  %v3384_v4 = vld [vmem:[%s3671_s14 + $0x8] sm:$0xff]   ;;  %v3385_v5 = vld [vmem:[%s3671_s14] sm:$0xff]  }
 0xd9f   : > { %v2469_v8 = vmul.f32 0.03125, %v2459_v7  ;;  %v2999_v6 = vld [vmem:[%s589_s5] ss:$0 sm:$0xff] }
 0xda0   : > { %3498 = vrsqrt.f32 %v2492_v10  ;;  %v2476_v28 = vmul.f32 %v2440_v14, %v2440_v14  ;;  %v2514_v15 = vmul.f32 %v2997_v21, %v2502_v16  ;;  %v2488_v53 = vsub.f32 %v4220_v42, %v2440_v14 }
 0xda1   : > { %v2481_v20 = vsub.f32 %v2469_v8, %v2475_v13  ;;  %v3497_v9 = vpop.eup %3496  ;;  %v2462_v29 = vpop.xlane.xlu0 %2461  ;;  %3310 = vmatpush3.bf16.msra.mxu0 %v3383_v37 }
 0xda2   : > { %v2435_v30 = vpop.xlane.xlu1 %2434  ;;  %v2503_v31 = vmul.f32 %v3497_v9, %v2485_v19  ;;  %v2470_v36 = vmul.f32 0.03125, %v2462_v29  ;;  %v2526_v22 = vadd.f32 %v2998_v41, %v2514_v15  ;;  %3311 = vmatprep.subr.bf16.mxu0 %v3526_v34 }
 0xda3   : > { %v2493_v32 = vadd.f32 1e-06, %v2481_v20  ;;  %v2441_v39 = vmul.f32 0.03125, %v2435_v30 }
 0xda4   : > { %v2482_v40 = vsub.f32 %v2470_v36, %v2476_v28  ;;  %v2515_v17 = vmul.f32 %v2997_v21, %v2503_v31 }
 0xda5   : > { %3500 = vrsqrt.f32 %v2493_v32  ;;  %v2477_v48 = vmul.f32 %v2441_v39, %v2441_v39  ;;  %v2489_v18 = vsub.f32 %v4228_v44, %v2441_v39  ;;  %3312 = vmatpush3.bf16.msra.mxu0 %v3384_v4 }
 0xda6   : > { %v2465_v45 = vpop.xlane.xlu1 %2464  ;;  %v2494_v47 = vadd.f32 1e-06, %v2482_v40  ;;  %v2527_v24 = vadd.f32 %v2998_v41, %v2515_v17  ;;  %3313 = vmatprep.subr.bf16.mxu0 %v3526_v34 }
 0xda7   : > { %v2471_v49 = vmul.f32 0.03125, %v2465_v45 }
 0xda8   : > { %3502 = vrsqrt.f32 %v2494_v47  ;;  %v2532_v56 = vpack.c.bf16 %v2527_v24, %v2526_v22 }
 0xda9   : > { %v2483_v33 = vsub.f32 %v2471_v49, %v2477_v48  ;;  %3314 = vmatpush3.bf16.msra.mxu0 %v3385_v5 }
 0xdaa   : > { %3296 = vmatmul.mubr.msk.bf16.vlgmr.msra.gmra.mxu1 %vm630_vm1, %v2532_v56 }
 0xdab   : > { %v2495_v43 = vadd.f32 1e-06, %v2483_v33  ;;  %3299 = vmatprep.mubr.msk.bf16.mxu1 %vm3527_vm2, %v3526_v34 }
 0xdad   : > { %3504 = vrsqrt.f32 %v2495_v43  ;;  %v3499_v58 = vpop.eup %3498 }
 0xdae   : > { %v2504_v26 = vmul.f32 %v3499_v58, %v2486_v46 }
 0xdb0   : > { %v2516_v52 = vmul.f32 %v2997_v21, %v2504_v26 }
 0xdb2   : > { %v3501_v50 = vpop.eup %3500  ;;  %v2528_v59 = vadd.f32 %v2998_v41, %v2516_v52 }
 0xdb3   : > { %v2505_v51 = vmul.f32 %v3501_v50, %v2487_v55 }
 0xdb5   : > { %v2517_v54 = vmul.f32 %v2997_v21, %v2505_v51  ;;  %v3503_v57 = vpop.eup %3502 }
 0xdb6   : > { %v2506_v63 = vmul.f32 %v3503_v57, %v2488_v53 }
 0xdb7   : > { %v2529_v60 = vadd.f32 %v2998_v41, %v2517_v54 }
 0xdb8   : > { %v2518_v62 = vmul.f32 %v2997_v21, %v2506_v63 }
 0xdb9   : > { %v2533_v3 = vpack.c.bf16 %v2529_v60, %v2528_v59 }
 0xdba   : > { %v3505_v12 = vpop.eup %3504  ;;  %v2530_v23 = vadd.f32 %v2998_v41, %v2518_v62 }
 0xdbb   : > { %3300 = vmatmul.mubr.msk.bf16.gmra.mxu1 %vm630_vm1, %v2533_v3  ;;  %v2507_v61 = vmul.f32 %v3505_v12, %v2489_v18 }
 0xdbc   : > { %3303 = vmatprep.mubr.msk.bf16.mxu1 %vm3527_vm2, %v3526_v34 }
 0xdbd   : > { %v2519_v0 = vmul.f32 %v2997_v21, %v2507_v61 }
 0xdbf   : > { %v2531_v27 = vadd.f32 %v2998_v41, %v2519_v0 }
 0xdc1   : > { %v2534_v1 = vpack.c.bf16 %v2531_v27, %v2530_v23 }
 0xdc3   : > { %3304 = vmatmul.mubr.msk.bf16.gmra.mxu1 %vm630_vm1, %v2534_v1  ;;  %v3005_v1 = vld [vmem:[%s597_s18] ss:$0 sm:$0xff] }
 0xe6a   : > { %v2601_v7 = vpop.f32.mrf.mxu1 }
 0xe6b   : > { %v2602_v10 = vadd.f32 %v2999_v6, %v2601_v7 }
 0xe6c   : > { %v3297_v13 = vpop.f32.mrf.mxu1 }
 0xe6d   : > { %v2630_v14 = vmul.f32 0.70710677, %v2602_v10  ;;  %v2624_v41 = vmul.f32 0.5, %v2602_v10 }
 0xe6e   : > { %v2604_v8 = vpop.f32.mrf.mxu1 }
 0xe6f   : > { %3506 = verf.f32 %v2630_v14  ;;  %v2605_v16 = vadd.f32 %v2999_v6, %v2604_v8 }
 0xe70   : > { %v3298_v19 = vpop.f32.mrf.mxu1 }
 0xe71   : > { %v2631_v20 = vmul.f32 0.70710677, %v2605_v16  ;;  %v2625_v45 = vmul.f32 0.5, %v2605_v16 }
 0xe73   : > { %3508 = verf.f32 %v2631_v20 }
 0xe7b   : > { %v2609_v21 = vpop.f32.mrf.mxu1 }
 0xe7c   : > { %v2610_v9 = vadd.f32 %v2999_v6, %v2609_v21  ;;  %v3507_v29 = vpop.eup %3506 }
 0xe7d   : > { %v3301_v28 = vpop.f32.mrf.mxu1  ;;  %v2642_v36 = vadd.f32 1.0, %v3507_v29 }
 0xe7e   : > { %v2632_v30 = vmul.f32 0.70710677, %v2610_v9  ;;  %v2626_v52 = vmul.f32 0.5, %v2610_v9 }
 0xe7f   : > { %v2612_v31 = vpop.f32.mrf.mxu1  ;;  %v2648_v49 = vmul.f32 %v2642_v36, %v2624_v41 }
 0xe80   : > { %3510 = verf.f32 %v2632_v30  ;;  %v2613_v32 = vadd.f32 %v2999_v6, %v2612_v31  ;;  %v3509_v15 = vpop.eup %3508 }
 0xe81   : > { %v3302_v39 = vpop.f32.mrf.mxu1  ;;  %v2643_v17 = vadd.f32 1.0, %v3509_v15 }
 0xe82   : > { %v2633_v40 = vmul.f32 0.70710677, %v2613_v32  ;;  %v2627_v53 = vmul.f32 0.5, %v2613_v32 }
 0xe83   : > { %v2617_v47 = vpop.f32.mrf.mxu1  ;;  %v2649_v22 = vmul.f32 %v2643_v17, %v2625_v45 }
 0xe84   : > { %3512 = verf.f32 %v2633_v40  ;;  %v2618_v48 = vadd.f32 %v2999_v6, %v2617_v47 }
 0xe85   : > { %v3305_v24 = vpop.f32.mrf.mxu1  ;;  %v2654_v56 = vpack.c.bf16 %v2649_v22, %v2648_v49 }
 0xe86   : > { %v2634_v33 = vmul.f32 0.70710677, %v2618_v48  ;;  %v2628_v12 = vmul.f32 0.5, %v2618_v48 }
 0xe87   : > { %v2620_v43 = vpop.f32.mrf.mxu1  ;;  %3316 = vmatmul.mubr.msk.bf16.vlgmr.msra.gmra.mxu0 %vm2696_vm10, %v2654_v56 }
 0xe88   : > { %3514 = verf.f32 %v2634_v33  ;;  %v2621_v46 = vadd.f32 %v2999_v6, %v2620_v43  ;;  %3319 = vmatprep.mubr.msk.bf16.mxu0 %vm3527_vm2, %v3526_v34 }
 0xe89   : > { %v3306_v58 = vpop.f32.mrf.mxu1 }
 0xe8a   : > { %v2635_v26 = vmul.f32 0.70710677, %v2621_v46  ;;  %v2629_v61 = vmul.f32 0.5, %v2621_v46 }
 0xe8c   : > { %3516 = verf.f32 %v2635_v26 }
 0xe8d   : > { %v3511_v55 = vpop.eup %3510 }
 0xe8e   : > { %v2644_v50 = vadd.f32 1.0, %v3511_v55 }
 0xe90   : > { %v2650_v57 = vmul.f32 %v2644_v50, %v2626_v52 }
 0xe91   : > { %v3513_v51 = vpop.eup %3512 }
 0xe92   : > { %v2645_v54 = vadd.f32 1.0, %v3513_v51 }
 0xe94   : > { %v2651_v59 = vmul.f32 %v2645_v54, %v2627_v53 }
 0xe95   : > { %v3515_v60 = vpop.eup %3514 }
 0xe96   : > { %v2655_v63 = vpack.c.bf16 %v2651_v59, %v2650_v57  ;;  %v2646_v18 = vadd.f32 1.0, %v3515_v60 }
 0xe98   : > { %3320 = vmatmul.mubr.msk.bf16.gmra.mxu0 %vm2696_vm10, %v2655_v63  ;;  %v2652_v0 = vmul.f32 %v2646_v18, %v2628_v12 }
 0xe99   : > { %v3517_v3 = vpop.eup %3516  ;;  %3323 = vmatprep.mubr.msk.bf16.mxu0 %vm3527_vm2, %v3526_v34 }
 0xe9a   : > { %v2647_v62 = vadd.f32 1.0, %v3517_v3 }
 0xe9c   : > { %v2653_v23 = vmul.f32 %v2647_v62, %v2629_v61 }
 0xe9e   : > { %v2656_v27 = vpack.c.bf16 %v2653_v23, %v2652_v0 }
 0xea0   : > { %3324 = vmatmul.mubr.msk.bf16.gmra.mxu0 %vm2696_vm10, %v2656_v27 }
 0xf47   : > { %v2740_v35 = vpop.f32.mrf.mxu0 }
 0xf48   : > { %v2741_v37 = vadd.f32 %v3005_v1, %v2740_v35 }
 0xf49   : > { %v3317_v4 = vpop.f32.mrf.mxu0 }
 0xf4a   : > { %v2763_v5 = vadd.f32 %v2741_v37, %v4189_v2 }
 0xf4b   : > { %v2743_v34 = vpop.f32.mrf.mxu0 }
 0xf4c   : > { %v3025_v6 = vpack.c.bf16 %v2763_v5, %v2763_v5  ;;  %v2744_v7 = vadd.f32 %v3005_v1, %v2743_v34 }
 0xf4d   : > { %v3318_v10 = vpop.f32.mrf.mxu0 }
 0xf4e   : > { %2796 = vst.msk [vmem:[%s4332_s13] sm:$0xf] %vm2795_vm11, %v3025_v6  ;;  %v2764_v13 = vadd.f32 %v2744_v7, %v4196_v11 }
 0xf50   : > { %v3026_v14 = vpack.c.bf16 %v2764_v13, %v2764_v13 }
 0xf52   : > { %2797 = vst.msk [vmem:[%s4332_s13 + $0x4] sm:$0xf] %vm2795_vm11, %v3026_v14 }
 0xf58   : > { %v2748_v8 = vpop.f32.mrf.mxu0 }
 0xf59   : > { %v2749_v2 = vadd.f32 %v3005_v1, %v2748_v8 }
 0xf5a   : > { %v3321_v16 = vpop.f32.mrf.mxu0 }
 0xf5b   : > { %v2765_v19 = vadd.f32 %v2749_v2, %v4205_v25 }
 0xf5c   : > { %v2751_v20 = vpop.f32.mrf.mxu0 }
 0xf5d   : > { %v3027_v21 = vpack.c.bf16 %v2765_v19, %v2765_v19  ;;  %v2752_v9 = vadd.f32 %v3005_v1, %v2751_v20 }
 0xf5e   : > { %v3322_v28 = vpop.f32.mrf.mxu0 }
 0xf5f   : > { %2798 = vst.msk [vmem:[%s4332_s13 + $0x8] sm:$0xf] %vm2795_vm11, %v3027_v21  ;;  %v2766_v11 = vadd.f32 %v2752_v9, %v4212_v38 }
 0xf60   : > { %v2756_v29 = vpop.f32.mrf.mxu0 }
 0xf61   : > { %v3028_v30 = vpack.c.bf16 %v2766_v11, %v2766_v11  ;;  %v2757_v31 = vadd.f32 %v3005_v1, %v2756_v29 }
 0xf62   : > { %v3325_v32 = vpop.f32.mrf.mxu0 }
 0xf63   : > { %2799 = vst.msk [vmem:[%s4332_s13 + $0xc] sm:$0xf] %vm2795_vm11, %v3028_v30  ;;  %v2767_v25 = vadd.f32 %v2757_v31, %v4220_v42 }
 0xf64   : > { %v2759_v36 = vpop.f32.mrf.mxu0 }
 0xf65   : > { %v3029_v39 = vpack.c.bf16 %v2767_v25, %v2767_v25  ;;  %v2760_v15 = vadd.f32 %v3005_v1, %v2759_v36 }
 0xf66   : > { %v3326_v40 = vpop.f32.mrf.mxu0 }
 0xf67   : > { %2800 = vst.msk [vmem:[%s4332_s13 + $0x10] sm:$0xf] %vm2795_vm11, %v3029_v39  ;;  %v2768_v38 = vadd.f32 %v2760_v15, %v4228_v44 }
 0xf69   : > { %v3030_v41 = vpack.c.bf16 %v2768_v38, %v2768_v38 }
 0xf6b   : > { %2801 = vst.msk [vmem:[%s4332_s13 + $0x14] sm:$0xf] %vm2795_vm11, %v3030_v41 }
 0xf6c PF: > { %s4349_s3 = sld [smem:[#allocation3_spill]] }
 0xf72   : > { %s23_s25 = sadd.s32 1, %s4349_s3  }
 0xf73   : > { %p20_p5 = scmp.ge.s32.totalorder %s23_s25, 4  }
 0xf75   :  { %22 = sbr.rel (!%p20_p5) target bundleno = 4 (0x4), region = 135 }

</bundles_post_ra>
